<compile_context>
chip_gen: v6e
topology: v6e:2x2x1
jax: 0.10.0
libtpu: 0.0.40
codegen_flags: <defaults>
</compile_context>

<pallas_src>
import functools

import jax
import jax.numpy as jnp
from jax.experimental import pallas as pl
from jax.experimental.pallas import tpu as pltpu


def _hardswish(x):
    # x * relu6(x + 3) / 6  (matches torch.nn.Hardswish)
    return x * jnp.clip(x + 3.0, 0.0, 6.0) * (1.0 / 6.0)


# --------------------------------------------------------------------------
# Fused IRMB kernel.
#   refs = [xp, mask, w1, s1, b1, w2, s2, b2, w3, s3, b3,
#           (x3, (ws, ss, bs))?, out, epad_scratch]
# --------------------------------------------------------------------------
def _irmb_kernel(*refs, stride, tho, Wo, sc_mode):
    (xp_ref, mask_ref, w1_ref, s1_ref, b1_ref, w2_ref, s2_ref, b2_ref,
     w3_ref, s3_ref, b3_ref) = refs[:11]
    idx = 11
    x3_ref = ws_ref = ss_ref = bs_ref = None
    if sc_mode == "conv":
        x3_ref, ws_ref, ss_ref, bs_ref = refs[idx:idx + 4]
        idx += 4
    elif sc_mode == "identity":
        x3_ref = refs[idx]
        idx += 1
    o_ref, epad_ref = refs[idx], refs[idx + 1]

    Hp, Wp, Cmid = epad_ref.shape          # padded spatial dims, Wp % 8 == 0
    r = pl.program_id(1)

    # ---- Stage 1 (once per batch image): 1x1 expand conv + BN + Hardswish
    #      into the padded VMEM scratch.  `mask` zeroes the halo so the
    #      depthwise taps below see true zero padding.
    @pl.when(r == 0)
    def _():
        e = jnp.dot(xp_ref[0], w1_ref[...],
                    preferred_element_type=jnp.float32)
        e = _hardswish(e * s1_ref[...] + b1_ref[...]) * mask_ref[...]
        epad_ref[...] = e.reshape(Hp, Wp, Cmid)

    # ---- Stage 2 (per output-row tile): 3x3 depthwise conv + BN + Hardswish.
    w2 = w2_ref[...]                                     # (9, Cmid)
    row0 = r * (tho * stride)
    acc = jnp.zeros((tho, Wo, Cmid), jnp.float32)
    if stride == 1:
        slab = epad_ref[pl.ds(row0, tho + 2), :, :]      # (tho+2, Wp, Cmid)
        for ki in range(3):
            for kj in range(3):
                acc = acc + slab[ki:ki + tho, kj:kj + Wo, :] * w2[ki * 3 + kj]
    else:
        # TODO(synk): stride>1 path (no shortcut) uses strided ref reads and is
        # not exercised by the self-test below.
        for ki in range(3):
            for kj in range(3):
                win = epad_ref[pl.ds(row0 + ki, tho, stride=stride),
                               pl.ds(kj, Wo, stride=stride), :]
                acc = acc + win * w2[ki * 3 + kj]
    h2 = _hardswish(acc * s2_ref[0] + b2_ref[0]).reshape(tho * Wo, Cmid)

    # ---- Stage 3: 1x1 project conv + BN, with the shortcut fused in.
    y = jnp.dot(h2, w3_ref[...], preferred_element_type=jnp.float32)
    y = y * s3_ref[...] + b3_ref[...]
    if sc_mode == "conv":
        sc = jnp.dot(x3_ref[0], ws_ref[...],
                     preferred_element_type=jnp.float32)
        y = y + (sc * ss_ref[...] + bs_ref[...])
    elif sc_mode == "identity":
        y = y + x3_ref[0]
    o_ref[0] = y.astype(o_ref.dtype)                     # (tho*Wo, Cout)


def _pick_row_tile(ho, wo, cmid):
    # Largest divisor of Ho whose per-tile f32 intermediates stay well under
    # the VMEM budget (fewer grid steps => less per-step overhead).
    budget = 2 * 1024 * 1024
    best = 1
    for cand in range(1, ho + 1):
        if ho % cand == 0 and 4 * (4 * cand * wo * cmid) <= budget:
            best = cand
    return best


# --------------------------------------------------------------------------
# Wrapper: NCHW <-> NHWC plumbing, BlockSpecs, grid.
# --------------------------------------------------------------------------
def irmb_forward(x_nchw, params, stride):
    N, Cin, H, W = x_nchw.shape
    Cmid = params["w1"].shape[1]
    Cout = params["w3"].shape[1]
    Ho = (H + 2 - 3) // stride + 1
    Wo = (W + 2 - 3) // stride + 1
    Hp = H + 2
    Wp = 8 * ((W + 2 + 7) // 8)            # padded width rounded to sublane mult.
    tho = _pick_row_tile(Ho, Wo, Cmid)
    R = Ho // tho

    xh = jnp.transpose(x_nchw, (0, 2, 3, 1)).astype(jnp.float32)   # NHWC
    # Only the SMALL Cin-wide input is padded host-side (the Cmid-wide
    # expanded tensor never leaves VMEM).
    xp3 = jnp.pad(xh, ((0, 0), (1, 1), (1, Wp - W - 1), (0, 0)))
    xp3 = xp3.reshape(N, Hp * Wp, Cin)

    # Interior mask for the padded expanded intermediate (1 inside, 0 on halo).
    mask = jnp.zeros((Hp, Wp), jnp.float32).at[1:H + 1, 1:W + 1].set(1.0)
    mask = mask.reshape(Hp * Wp, 1)

    if stride == 1:
        sc_mode = "conv" if params["ws"] is not None else "identity"
    else:
        sc_mode = "none"

    in_specs = [
        pl.BlockSpec((1, Hp * Wp, Cin), lambda n, r: (n, 0, 0)),   # padded x
        pl.BlockSpec((Hp * Wp, 1), lambda n, r: (0, 0)),           # halo mask
        pl.BlockSpec((Cin, Cmid), lambda n, r: (0, 0)),            # w1
        pl.BlockSpec((1, Cmid), lambda n, r: (0, 0)),              # s1
        pl.BlockSpec((1, Cmid), lambda n, r: (0, 0)),              # b1
        pl.BlockSpec((9, Cmid), lambda n, r: (0, 0)),              # w2 (dw)
        pl.BlockSpec((1, Cmid), lambda n, r: (0, 0)),              # s2
        pl.BlockSpec((1, Cmid), lambda n, r: (0, 0)),              # b2
        pl.BlockSpec((Cmid, Cout), lambda n, r: (0, 0)),           # w3
        pl.BlockSpec((1, Cout), lambda n, r: (0, 0)),              # s3
        pl.BlockSpec((1, Cout), lambda n, r: (0, 0)),              # b3
    ]
    args = [xp3, mask, params["w1"], params["s1"], params["b1"],
            params["w2"], params["s2"], params["b2"],
            params["w3"], params["s3"], params["b3"]]
    if sc_mode != "none":
        x3 = xh.reshape(N, H * W, Cin)
        in_specs.append(pl.BlockSpec((1, tho * W, Cin),
                                     lambda n, r: (n, r, 0)))      # shortcut rows
        args.append(x3)
        if sc_mode == "conv":
            in_specs += [
                pl.BlockSpec((Cin, Cout), lambda n, r: (0, 0)),    # ws
                pl.BlockSpec((1, Cout), lambda n, r: (0, 0)),      # ss
                pl.BlockSpec((1, Cout), lambda n, r: (0, 0)),      # bs
            ]
            args += [params["ws"], params["ss"], params["bs"]]

    kernel = functools.partial(_irmb_kernel, stride=stride, tho=tho,
                               Wo=Wo, sc_mode=sc_mode)

    # VMEM budget estimate (double-buffered blocks + scratch); only raise the
    # scoped limit when the estimate approaches the 24 MiB mark.
    blk_bytes = 4 * (2 * Hp * Wp * Cin + Hp * Wp * Cmid + 2 * Hp * Wp
                     + 2 * tho * Wo * Cout + 2 * tho * W * Cin
                     + 2 * (Cin * Cmid + Cmid * Cout + Cin * Cout
                            + 13 * Cmid + 4 * Cout))
    cp_kwargs = dict(dimension_semantics=("parallel", "arbitrary"))
    if blk_bytes > 24 * 1024 * 1024:
        cp_kwargs["vmem_limit_bytes"] = min(128 * 1024 * 1024, 2 * blk_bytes)

    out = pl.pallas_call(
        kernel,
        out_shape=jax.ShapeDtypeStruct((N, Ho * Wo, Cout), jnp.float32),
        grid_spec=pltpu.PrefetchScalarGridSpec(
            num_scalar_prefetch=0,
            grid=(N, R),
            in_specs=in_specs,
            out_specs=pl.BlockSpec((1, tho * Wo, Cout),
                                   lambda n, r: (n, r, 0)),
            scratch_shapes=[pltpu.VMEM((Hp, Wp, Cmid), jnp.float32)],
        ),
        compiler_params=pltpu.CompilerParams(**cp_kwargs),
    )(*args)

    out = out.reshape(N, Ho, Wo, Cout)
    return jnp.transpose(out, (0, 3, 1, 2))            # NHWC -> NCHW


# --------------------------------------------------------------------------
# Deterministic parameter construction (folded inference-mode BN).
# --------------------------------------------------------------------------
def make_params(key, cin, cout, t, stride):
    cmid = cin * t
    keys = jax.random.split(key, 8)

    def bn_fold(k, c):
        k1, k2, k3, k4 = jax.random.split(k, 4)
        gamma = 1.0 + 0.1 * jax.random.normal(k1, (c,))
        beta = 0.05 * jax.random.normal(k2, (c,))
        mean = 0.1 * jax.random.normal(k3, (c,))
        var = 0.5 + 0.1 * jnp.abs(jax.random.normal(k4, (c,)))
        s = gamma / jnp.sqrt(var + 1e-5)
        b = beta - mean * s
        return (s.reshape(1, c).astype(jnp.float32),
                b.reshape(1, c).astype(jnp.float32))

    p = {}
    p["w1"] = (0.3 * jax.random.normal(keys[0], (cin, cmid))).astype(jnp.float32)
    p["s1"], p["b1"] = bn_fold(keys[1], cmid)
    # depthwise weight stored as (9, Cmid): w2[kh*3+kw, c] == torch_w[c, 0, kh, kw]
    p["w2"] = (0.3 * jax.random.normal(keys[2], (9, cmid))).astype(jnp.float32)
    p["s2"], p["b2"] = bn_fold(keys[3], cmid)
    p["w3"] = (0.3 * jax.random.normal(keys[4], (cmid, cout))).astype(jnp.float32)
    p["s3"], p["b3"] = bn_fold(keys[5], cout)
    if stride == 1 and cin != cout:
        p["ws"] = (0.3 * jax.random.normal(keys[6], (cin, cout))).astype(jnp.float32)
        p["ss"], p["bs"] = bn_fold(keys[7], cout)
    else:
        p["ws"] = None
    return p


# --------------------------------------------------------------------------
# Pure-JAX reference for verification (HIGHEST matmul precision so the
# reference itself does not introduce bf16 error).
# --------------------------------------------------------------------------
def irmb_reference(x_nchw, params, stride):
    hi = jax.lax.Precision.HIGHEST
    xh = jnp.transpose(x_nchw, (0, 2, 3, 1)).astype(jnp.float32)
    N, H, W, Cin = xh.shape
    h = _hardswish(jnp.einsum("nhwc,cd->nhwd", xh, params["w1"], precision=hi)
                   * params["s1"] + params["b1"])
    hp = jnp.pad(h, ((0, 0), (1, 1), (1, 1), (0, 0)))
    Ho = (H + 2 - 3) // stride + 1
    Wo = (W + 2 - 3) // stride + 1
    acc = jnp.zeros((N, Ho, Wo, h.shape[-1]), jnp.float32)
    for ki in range(3):
        for kj in range(3):
            win = hp[:, ki:ki + (Ho - 1) * stride + 1:stride,
                     kj:kj + (Wo - 1) * stride + 1:stride, :]
            acc = acc + win * params["w2"][ki * 3 + kj]
    h2 = _hardswish(acc * params["s2"] + params["b2"])
    out = (jnp.einsum("nhwc,cd->nhwd", h2, params["w3"], precision=hi)
           * params["s3"] + params["b3"])
    if stride == 1:
        if params["ws"] is not None:
            sc = (jnp.einsum("nhwc,cd->nhwd", xh, params["ws"], precision=hi)
                  * params["ss"] + params["bs"])
        else:
            sc = xh
        out = out + sc
    return jnp.transpose(out, (0, 3, 1, 2))


if __name__ == "__main__":
    configs = [
        # (in_channels, out_channels, stride, t)
        (4, 8, 1, 4),    # conv + BN shortcut
        (8, 8, 1, 2),    # identity shortcut
    ]
    base = jax.random.PRNGKey(0)
    for i, (cin, cout, stride, t) in enumerate(configs):
        kx, kp = jax.random.split(jax.random.fold_in(base, i))
        x = jax.random.normal(kx, (2, cin, 16, 16), dtype=jnp.float32)
        params = make_params(kp, cin, cout, t, stride)

        out = jax.block_until_ready(irmb_forward(x, params, stride))
        ref = irmb_reference(x, params, stride)
        assert out.shape == ref.shape, (out.shape, ref.shape)
        err = float(jnp.max(jnp.abs(out - ref)))
        assert jnp.allclose(out, ref, atol=1e-3, rtol=1e-3), err
    print("KERNEL_OK")
</pallas_src>

<mosaic_0001>
module attributes {stable_mosaic.version = 11 : i64} {
  func.func @_irmb_kernel(%arg0: i32, %arg1: i32, %arg2: memref<1x432x4xf32, #tpu.memory_space<vmem>>, %arg3: memref<432x1xf32, #tpu.memory_space<vmem>>, %arg4: memref<4x16xf32, #tpu.memory_space<vmem>>, %arg5: memref<1x16xf32, #tpu.memory_space<vmem>>, %arg6: memref<1x16xf32, #tpu.memory_space<vmem>>, %arg7: memref<9x16xf32, #tpu.memory_space<vmem>>, %arg8: memref<1x16xf32, #tpu.memory_space<vmem>>, %arg9: memref<1x16xf32, #tpu.memory_space<vmem>>, %arg10: memref<16x8xf32, #tpu.memory_space<vmem>>, %arg11: memref<1x8xf32, #tpu.memory_space<vmem>>, %arg12: memref<1x8xf32, #tpu.memory_space<vmem>>, %arg13: memref<1x256x4xf32, #tpu.memory_space<vmem>>, %arg14: memref<4x8xf32, #tpu.memory_space<vmem>>, %arg15: memref<1x8xf32, #tpu.memory_space<vmem>>, %arg16: memref<1x8xf32, #tpu.memory_space<vmem>>, %arg17: memref<1x256x8xf32, #tpu.memory_space<vmem>>, %arg18: memref<18x24x16xf32, #tpu.memory_space<vmem>>) attributes {dimension_semantics = [#tpu.dimension_semantics<parallel>, #tpu.dimension_semantics<arbitrary>], iteration_bounds = array<i64: 2, 1>, scalar_prefetch = 0 : i64, scratch_operands = 1 : i64, tpu.core_type = #tpu.core_type<tc>, window_params = [{transform_indices = @transform_0, window_bounds = array<i64: 1, 432, 4>}, {pipeline_mode = #tpu.pipeline_mode<synchronous>, transform_indices = @transform_1, window_bounds = array<i64: 432, 1>}, {pipeline_mode = #tpu.pipeline_mode<synchronous>, transform_indices = @transform_2, window_bounds = array<i64: 4, 16>}, {pipeline_mode = #tpu.pipeline_mode<synchronous>, transform_indices = @transform_3, window_bounds = array<i64: 1, 16>}, {pipeline_mode = #tpu.pipeline_mode<synchronous>, transform_indices = @transform_4, window_bounds = array<i64: 1, 16>}, {pipeline_mode = #tpu.pipeline_mode<synchronous>, transform_indices = @transform_5, window_bounds = array<i64: 9, 16>}, {pipeline_mode = #tpu.pipeline_mode<synchronous>, transform_indices = @transform_6, window_bounds = array<i64: 1, 16>}, {pipeline_mode = #tpu.pipeline_mode<synchronous>, transform_indices = @transform_7, window_bounds = array<i64: 1, 16>}, {pipeline_mode = #tpu.pipeline_mode<synchronous>, transform_indices = @transform_8, window_bounds = array<i64: 16, 8>}, {pipeline_mode = #tpu.pipeline_mode<synchronous>, transform_indices = @transform_9, window_bounds = array<i64: 1, 8>}, {pipeline_mode = #tpu.pipeline_mode<synchronous>, transform_indices = @transform_10, window_bounds = array<i64: 1, 8>}, {transform_indices = @transform_11, window_bounds = array<i64: 1, 256, 4>}, {pipeline_mode = #tpu.pipeline_mode<synchronous>, transform_indices = @transform_12, window_bounds = array<i64: 4, 8>}, {pipeline_mode = #tpu.pipeline_mode<synchronous>, transform_indices = @transform_13, window_bounds = array<i64: 1, 8>}, {pipeline_mode = #tpu.pipeline_mode<synchronous>, transform_indices = @transform_14, window_bounds = array<i64: 1, 8>}, {transform_indices = @transform_15, window_bounds = array<i64: 1, 256, 8>}]} {
    %c0_i32 = arith.constant 0 : i32
    %0 = arith.cmpi eq, %arg1, %c0_i32 : i32
    %1 = arith.extui %0 : i1 to i32
    %c0_i32_0 = arith.constant 0 : i32
    %2 = arith.cmpi ne, %1, %c0_i32_0 : i32
    scf.if %2 {
      %c0_32 = arith.constant 0 : index
      %c0_33 = arith.constant 0 : index
      %c0_34 = arith.constant 0 : index
      %113 = vector.load %arg2[%c0_32, %c0_33, %c0_34] : memref<1x432x4xf32, #tpu.memory_space<vmem>>, vector<1x432x4xf32>
      %114 = vector.shape_cast %113 : vector<1x432x4xf32> to vector<432x4xf32>
      %c0_35 = arith.constant 0 : index
      %c0_36 = arith.constant 0 : index
      %115 = vector.load %arg4[%c0_35, %c0_36] : memref<4x16xf32, #tpu.memory_space<vmem>>, vector<4x16xf32>
      %cst_37 = arith.constant dense<0.000000e+00> : vector<432x16xf32>
      %116 = tpu.matmul %114, %115, %cst_37 {dimension_numbers = #tpu.dot_dimension_numbers<[1], [0], [0], [1], [0, 0, 1, 1], [], []>} : vector<432x4xf32>, vector<4x16xf32>, vector<432x16xf32> -> vector<432x16xf32>
      %c0_38 = arith.constant 0 : index
      %c0_39 = arith.constant 0 : index
      %117 = vector.load %arg5[%c0_38, %c0_39] : memref<1x16xf32, #tpu.memory_space<vmem>>, vector<1x16xf32>
      %118 = vector.broadcast %117 : vector<1x16xf32> to vector<432x16xf32>
      %119 = arith.mulf %116, %118 : vector<432x16xf32>
      %c0_40 = arith.constant 0 : index
      %c0_41 = arith.constant 0 : index
      %120 = vector.load %arg6[%c0_40, %c0_41] : memref<1x16xf32, #tpu.memory_space<vmem>>, vector<1x16xf32>
      %121 = vector.broadcast %120 : vector<1x16xf32> to vector<432x16xf32>
      %122 = arith.addf %119, %121 : vector<432x16xf32>
      %cst_42 = arith.constant 3.000000e+00 : f32
      %123 = vector.broadcast %cst_42 : f32 to vector<432x16xf32>
      %124 = arith.addf %122, %123 : vector<432x16xf32>
      %cst_43 = arith.constant 0.000000e+00 : f32
      %cst_44 = arith.constant 6.000000e+00 : f32
      %125 = vector.broadcast %cst_43 : f32 to vector<432x16xf32>
      %126 = arith.maximumf %125, %124 : vector<432x16xf32>
      %127 = vector.broadcast %cst_44 : f32 to vector<432x16xf32>
      %128 = arith.minimumf %127, %126 : vector<432x16xf32>
      %129 = arith.mulf %122, %128 : vector<432x16xf32>
      %cst_45 = arith.constant 0.166666672 : f32
      %130 = vector.broadcast %cst_45 : f32 to vector<432x16xf32>
      %131 = arith.mulf %129, %130 : vector<432x16xf32>
      %c0_46 = arith.constant 0 : index
      %c0_47 = arith.constant 0 : index
      %132 = vector.load %arg3[%c0_46, %c0_47] : memref<432x1xf32, #tpu.memory_space<vmem>>, vector<432x1xf32>
      %133 = vector.broadcast %132 : vector<432x1xf32> to vector<432x16xf32>
      %134 = arith.mulf %131, %133 : vector<432x16xf32>
      %135 = vector.shape_cast %134 : vector<432x16xf32> to vector<18x24x16xf32>
      %c0_48 = arith.constant 0 : index
      %c0_49 = arith.constant 0 : index
      %c0_50 = arith.constant 0 : index
      %136 = vector.load %arg18[%c0_48, %c0_49, %c0_50] : memref<18x24x16xf32, #tpu.memory_space<vmem>>, vector<18x24x16xf32>
      tpu.vector_store %arg18[%c0_48, %c0_49, %c0_50], %135 {strides = array<i32>} : memref<18x24x16xf32, #tpu.memory_space<vmem>>, vector<18x24x16xf32>,
    } else {
    }
    %c0 = arith.constant 0 : index
    %c0_1 = arith.constant 0 : index
    %3 = vector.load %arg7[%c0, %c0_1] : memref<9x16xf32, #tpu.memory_space<vmem>>, vector<9x16xf32>
    %c16_i32 = arith.constant 16 : i32
    %4 = arith.muli %arg1, %c16_i32 : i32
    %cst = arith.constant 0.000000e+00 : f32
    %5 = vector.broadcast %cst : f32 to vector<16x16x16xf32>
    %6 = arith.index_cast %4 : i32 to index
    %c0_2 = arith.constant 0 : index
    %c0_3 = arith.constant 0 : index
    %7 = vector.load %arg18[%6, %c0_2, %c0_3] : memref<18x24x16xf32, #tpu.memory_space<vmem>>, vector<18x24x16xf32>
    %8 = vector.extract_strided_slice %7 {offsets = [0, 0, 0], sizes = [16, 16, 16], strides = [1, 1, 1]} : vector<18x24x16xf32> to vector<16x16x16xf32>
    %9 = vector.extract_strided_slice %3 {offsets = [0, 0], sizes = [1, 16], strides = [1, 1]} : vector<9x16xf32> to vector<1x16xf32>
    %10 = vector.shape_cast %9 : vector<1x16xf32> to vector<16xf32>
    %11 = vector.shape_cast %10 : vector<16xf32> to vector<1x1x16xf32>
    %12 = vector.broadcast %11 : vector<1x1x16xf32> to vector<16x16x16xf32>
    %13 = arith.mulf %8, %12 : vector<16x16x16xf32>
    %14 = arith.addf %5, %13 : vector<16x16x16xf32>
    %15 = vector.extract_strided_slice %7 {offsets = [0, 1, 0], sizes = [16, 16, 16], strides = [1, 1, 1]} : vector<18x24x16xf32> to vector<16x16x16xf32>
    %16 = vector.extract_strided_slice %3 {offsets = [1, 0], sizes = [1, 16], strides = [1, 1]} : vector<9x16xf32> to vector<1x16xf32>
    %17 = vector.shape_cast %16 : vector<1x16xf32> to vector<16xf32>
    %18 = vector.shape_cast %17 : vector<16xf32> to vector<1x1x16xf32>
    %19 = vector.broadcast %18 : vector<1x1x16xf32> to vector<16x16x16xf32>
    %20 = arith.mulf %15, %19 : vector<16x16x16xf32>
    %21 = arith.addf %14, %20 : vector<16x16x16xf32>
    %22 = vector.extract_strided_slice %7 {offsets = [0, 2, 0], sizes = [16, 16, 16], strides = [1, 1, 1]} : vector<18x24x16xf32> to vector<16x16x16xf32>
    %23 = vector.extract_strided_slice %3 {offsets = [2, 0], sizes = [1, 16], strides = [1, 1]} : vector<9x16xf32> to vector<1x16xf32>
    %24 = vector.shape_cast %23 : vector<1x16xf32> to vector<16xf32>
    %25 = vector.shape_cast %24 : vector<16xf32> to vector<1x1x16xf32>
    %26 = vector.broadcast %25 : vector<1x1x16xf32> to vector<16x16x16xf32>
    %27 = arith.mulf %22, %26 : vector<16x16x16xf32>
    %28 = arith.addf %21, %27 : vector<16x16x16xf32>
    %29 = vector.extract_strided_slice %7 {offsets = [1, 0, 0], sizes = [16, 16, 16], strides = [1, 1, 1]} : vector<18x24x16xf32> to vector<16x16x16xf32>
    %30 = vector.extract_strided_slice %3 {offsets = [3, 0], sizes = [1, 16], strides = [1, 1]} : vector<9x16xf32> to vector<1x16xf32>
    %31 = vector.shape_cast %30 : vector<1x16xf32> to vector<16xf32>
    %32 = vector.shape_cast %31 : vector<16xf32> to vector<1x1x16xf32>
    %33 = vector.broadcast %32 : vector<1x1x16xf32> to vector<16x16x16xf32>
    %34 = arith.mulf %29, %33 : vector<16x16x16xf32>
    %35 = arith.addf %28, %34 : vector<16x16x16xf32>
    %36 = vector.extract_strided_slice %7 {offsets = [1, 1, 0], sizes = [16, 16, 16], strides = [1, 1, 1]} : vector<18x24x16xf32> to vector<16x16x16xf32>
    %37 = vector.extract_strided_slice %3 {offsets = [4, 0], sizes = [1, 16], strides = [1, 1]} : vector<9x16xf32> to vector<1x16xf32>
    %38 = vector.shape_cast %37 : vector<1x16xf32> to vector<16xf32>
    %39 = vector.shape_cast %38 : vector<16xf32> to vector<1x1x16xf32>
    %40 = vector.broadcast %39 : vector<1x1x16xf32> to vector<16x16x16xf32>
    %41 = arith.mulf %36, %40 : vector<16x16x16xf32>
    %42 = arith.addf %35, %41 : vector<16x16x16xf32>
    %43 = vector.extract_strided_slice %7 {offsets = [1, 2, 0], sizes = [16, 16, 16], strides = [1, 1, 1]} : vector<18x24x16xf32> to vector<16x16x16xf32>
    %44 = vector.extract_strided_slice %3 {offsets = [5, 0], sizes = [1, 16], strides = [1, 1]} : vector<9x16xf32> to vector<1x16xf32>
    %45 = vector.shape_cast %44 : vector<1x16xf32> to vector<16xf32>
    %46 = vector.shape_cast %45 : vector<16xf32> to vector<1x1x16xf32>
    %47 = vector.broadcast %46 : vector<1x1x16xf32> to vector<16x16x16xf32>
    %48 = arith.mulf %43, %47 : vector<16x16x16xf32>
    %49 = arith.addf %42, %48 : vector<16x16x16xf32>
    %50 = vector.extract_strided_slice %7 {offsets = [2, 0, 0], sizes = [16, 16, 16], strides = [1, 1, 1]} : vector<18x24x16xf32> to vector<16x16x16xf32>
    %51 = vector.extract_strided_slice %3 {offsets = [6, 0], sizes = [1, 16], strides = [1, 1]} : vector<9x16xf32> to vector<1x16xf32>
    %52 = vector.shape_cast %51 : vector<1x16xf32> to vector<16xf32>
    %53 = vector.shape_cast %52 : vector<16xf32> to vector<1x1x16xf32>
    %54 = vector.broadcast %53 : vector<1x1x16xf32> to vector<16x16x16xf32>
    %55 = arith.mulf %50, %54 : vector<16x16x16xf32>
    %56 = arith.addf %49, %55 : vector<16x16x16xf32>
    %57 = vector.extract_strided_slice %7 {offsets = [2, 1, 0], sizes = [16, 16, 16], strides = [1, 1, 1]} : vector<18x24x16xf32> to vector<16x16x16xf32>
    %58 = vector.extract_strided_slice %3 {offsets = [7, 0], sizes = [1, 16], strides = [1, 1]} : vector<9x16xf32> to vector<1x16xf32>
    %59 = vector.shape_cast %58 : vector<1x16xf32> to vector<16xf32>
    %60 = vector.shape_cast %59 : vector<16xf32> to vector<1x1x16xf32>
    %61 = vector.broadcast %60 : vector<1x1x16xf32> to vector<16x16x16xf32>
    %62 = arith.mulf %57, %61 : vector<16x16x16xf32>
    %63 = arith.addf %56, %62 : vector<16x16x16xf32>
    %64 = vector.extract_strided_slice %7 {offsets = [2, 2, 0], sizes = [16, 16, 16], strides = [1, 1, 1]} : vector<18x24x16xf32> to vector<16x16x16xf32>
    %65 = vector.extract_strided_slice %3 {offsets = [8, 0], sizes = [1, 16], strides = [1, 1]} : vector<9x16xf32> to vector<1x16xf32>
    %66 = vector.shape_cast %65 : vector<1x16xf32> to vector<16xf32>
    %67 = vector.shape_cast %66 : vector<16xf32> to vector<1x1x16xf32>
    %68 = vector.broadcast %67 : vector<1x1x16xf32> to vector<16x16x16xf32>
    %69 = arith.mulf %64, %68 : vector<16x16x16xf32>
    %70 = arith.addf %63, %69 : vector<16x16x16xf32>
    %c0_4 = arith.constant 0 : index
    %c0_5 = arith.constant 0 : index
    %71 = vector.load %arg8[%c0_4, %c0_5] : memref<1x16xf32, #tpu.memory_space<vmem>>, vector<1x16xf32>
    %72 = vector.shape_cast %71 : vector<1x16xf32> to vector<16xf32>
    %73 = vector.shape_cast %72 : vector<16xf32> to vector<1x1x16xf32>
    %74 = vector.broadcast %73 : vector<1x1x16xf32> to vector<16x16x16xf32>
    %75 = arith.mulf %70, %74 : vector<16x16x16xf32>
    %c0_6 = arith.constant 0 : index
    %c0_7 = arith.constant 0 : index
    %76 = vector.load %arg9[%c0_6, %c0_7] : memref<1x16xf32, #tpu.memory_space<vmem>>, vector<1x16xf32>
    %77 = vector.shape_cast %76 : vector<1x16xf32> to vector<16xf32>
    %78 = vector.shape_cast %77 : vector<16xf32> to vector<1x1x16xf32>
    %79 = vector.broadcast %78 : vector<1x1x16xf32> to vector<16x16x16xf32>
    %80 = arith.addf %75, %79 : vector<16x16x16xf32>
    %cst_8 = arith.constant 3.000000e+00 : f32
    %81 = vector.broadcast %cst_8 : f32 to vector<16x16x16xf32>
    %82 = arith.addf %80, %81 : vector<16x16x16xf32>
    %cst_9 = arith.constant 0.000000e+00 : f32
    %cst_10 = arith.constant 6.000000e+00 : f32
    %83 = vector.broadcast %cst_9 : f32 to vector<16x16x16xf32>
    %84 = arith.maximumf %83, %82 : vector<16x16x16xf32>
    %85 = vector.broadcast %cst_10 : f32 to vector<16x16x16xf32>
    %86 = arith.minimumf %85, %84 : vector<16x16x16xf32>
    %87 = arith.mulf %80, %86 : vector<16x16x16xf32>
    %cst_11 = arith.constant 0.166666672 : f32
    %88 = vector.broadcast %cst_11 : f32 to vector<16x16x16xf32>
    %89 = arith.mulf %87, %88 : vector<16x16x16xf32>
    %90 = vector.shape_cast %89 : vector<16x16x16xf32> to vector<256x16xf32>
    %c0_12 = arith.constant 0 : index
    %c0_13 = arith.constant 0 : index
    %91 = vector.load %arg10[%c0_12, %c0_13] : memref<16x8xf32, #tpu.memory_space<vmem>>, vector<16x8xf32>
    %cst_14 = arith.constant dense<0.000000e+00> : vector<256x8xf32>
    %92 = tpu.matmul %90, %91, %cst_14 {dimension_numbers = #tpu.dot_dimension_numbers<[1], [0], [0], [1], [0, 0, 1, 1], [], []>} : vector<256x16xf32>, vector<16x8xf32>, vector<256x8xf32> -> vector<256x8xf32>
    %c0_15 = arith.constant 0 : index
    %c0_16 = arith.constant 0 : index
    %93 = vector.load %arg11[%c0_15, %c0_16] : memref<1x8xf32, #tpu.memory_space<vmem>>, vector<1x8xf32>
    %94 = vector.broadcast %93 : vector<1x8xf32> to vector<256x8xf32>
    %95 = arith.mulf %92, %94 : vector<256x8xf32>
    %c0_17 = arith.constant 0 : index
    %c0_18 = arith.constant 0 : index
    %96 = vector.load %arg12[%c0_17, %c0_18] : memref<1x8xf32, #tpu.memory_space<vmem>>, vector<1x8xf32>
    %97 = vector.broadcast %96 : vector<1x8xf32> to vector<256x8xf32>
    %98 = arith.addf %95, %97 : vector<256x8xf32>
    %c0_19 = arith.constant 0 : index
    %c0_20 = arith.constant 0 : index
    %c0_21 = arith.constant 0 : index
    %99 = vector.load %arg13[%c0_19, %c0_20, %c0_21] : memref<1x256x4xf32, #tpu.memory_space<vmem>>, vector<1x256x4xf32>
    %100 = vector.shape_cast %99 : vector<1x256x4xf32> to vector<256x4xf32>
    %c0_22 = arith.constant 0 : index
    %c0_23 = arith.constant 0 : index
    %101 = vector.load %arg14[%c0_22, %c0_23] : memref<4x8xf32, #tpu.memory_space<vmem>>, vector<4x8xf32>
    %cst_24 = arith.constant dense<0.000000e+00> : vector<256x8xf32>
    %102 = tpu.matmul %100, %101, %cst_24 {dimension_numbers = #tpu.dot_dimension_numbers<[1], [0], [0], [1], [0, 0, 1, 1], [], []>} : vector<256x4xf32>, vector<4x8xf32>, vector<256x8xf32> -> vector<256x8xf32>
    %c0_25 = arith.constant 0 : index
    %c0_26 = arith.constant 0 : index
    %103 = vector.load %arg15[%c0_25, %c0_26] : memref<1x8xf32, #tpu.memory_space<vmem>>, vector<1x8xf32>
    %104 = vector.broadcast %103 : vector<1x8xf32> to vector<256x8xf32>
    %105 = arith.mulf %102, %104 : vector<256x8xf32>
    %c0_27 = arith.constant 0 : index
    %c0_28 = arith.constant 0 : index
    %106 = vector.load %arg16[%c0_27, %c0_28] : memref<1x8xf32, #tpu.memory_space<vmem>>, vector<1x8xf32>
    %107 = vector.broadcast %106 : vector<1x8xf32> to vector<256x8xf32>
    %108 = arith.addf %105, %107 : vector<256x8xf32>
    %109 = arith.addf %98, %108 : vector<256x8xf32>
    %c0_29 = arith.constant 0 : index
    %c0_30 = arith.constant 0 : index
    %c0_31 = arith.constant 0 : index
    %110 = vector.load %arg17[%c0_29, %c0_30, %c0_31] : memref<1x256x8xf32, #tpu.memory_space<vmem>>, vector<1x256x8xf32>
    %111 = vector.shape_cast %110 : vector<1x256x8xf32> to vector<256x8xf32>
    %112 = vector.shape_cast %109 : vector<256x8xf32> to vector<1x256x8xf32>
    tpu.vector_store %arg17[%c0_29, %c0_30, %c0_31], %112 {strides = array<i32>} : memref<1x256x8xf32, #tpu.memory_space<vmem>>, vector<1x256x8xf32>,
    return
  }
  func.func @transform_0(%arg0: i32, %arg1: i32) -> (i32, i32, i32) {
    %c0_i32 = arith.constant 0 : i32
    %c0_i32_0 = arith.constant 0 : i32
    %c0_i32_1 = arith.constant 0 : i32
    return %arg0, %c0_i32, %c0_i32_0 : i32, i32, i32
  }
  func.func @transform_1(%arg0: i32, %arg1: i32) -> (i32, i32) {
    %c0_i32 = arith.constant 0 : i32
    %c0_i32_0 = arith.constant 0 : i32
    %c0_i32_1 = arith.constant 0 : i32
    return %c0_i32, %c0_i32_0 : i32, i32
  }
  func.func @transform_2(%arg0: i32, %arg1: i32) -> (i32, i32) {
    %c0_i32 = arith.constant 0 : i32
    %c0_i32_0 = arith.constant 0 : i32
    %c0_i32_1 = arith.constant 0 : i32
    return %c0_i32, %c0_i32_0 : i32, i32
  }
  func.func @transform_3(%arg0: i32, %arg1: i32) -> (i32, i32) {
    %c0_i32 = arith.constant 0 : i32
    %c0_i32_0 = arith.constant 0 : i32
    %c0_i32_1 = arith.constant 0 : i32
    return %c0_i32, %c0_i32_0 : i32, i32
  }
  func.func @transform_4(%arg0: i32, %arg1: i32) -> (i32, i32) {
    %c0_i32 = arith.constant 0 : i32
    %c0_i32_0 = arith.constant 0 : i32
    %c0_i32_1 = arith.constant 0 : i32
    return %c0_i32, %c0_i32_0 : i32, i32
  }
  func.func @transform_5(%arg0: i32, %arg1: i32) -> (i32, i32) {
    %c0_i32 = arith.constant 0 : i32
    %c0_i32_0 = arith.constant 0 : i32
    %c0_i32_1 = arith.constant 0 : i32
    return %c0_i32, %c0_i32_0 : i32, i32
  }
  func.func @transform_6(%arg0: i32, %arg1: i32) -> (i32, i32) {
    %c0_i32 = arith.constant 0 : i32
    %c0_i32_0 = arith.constant 0 : i32
    %c0_i32_1 = arith.constant 0 : i32
    return %c0_i32, %c0_i32_0 : i32, i32
  }
  func.func @transform_7(%arg0: i32, %arg1: i32) -> (i32, i32) {
    %c0_i32 = arith.constant 0 : i32
    %c0_i32_0 = arith.constant 0 : i32
    %c0_i32_1 = arith.constant 0 : i32
    return %c0_i32, %c0_i32_0 : i32, i32
  }
  func.func @transform_8(%arg0: i32, %arg1: i32) -> (i32, i32) {
    %c0_i32 = arith.constant 0 : i32
    %c0_i32_0 = arith.constant 0 : i32
    %c0_i32_1 = arith.constant 0 : i32
    return %c0_i32, %c0_i32_0 : i32, i32
  }
  func.func @transform_9(%arg0: i32, %arg1: i32) -> (i32, i32) {
    %c0_i32 = arith.constant 0 : i32
    %c0_i32_0 = arith.constant 0 : i32
    %c0_i32_1 = arith.constant 0 : i32
    return %c0_i32, %c0_i32_0 : i32, i32
  }
  func.func @transform_10(%arg0: i32, %arg1: i32) -> (i32, i32) {
    %c0_i32 = arith.constant 0 : i32
    %c0_i32_0 = arith.constant 0 : i32
    %c0_i32_1 = arith.constant 0 : i32
    return %c0_i32, %c0_i32_0 : i32, i32
  }
  func.func @transform_11(%arg0: i32, %arg1: i32) -> (i32, i32, i32) {
    %c0_i32 = arith.constant 0 : i32
    %c0_i32_0 = arith.constant 0 : i32
    return %arg0, %arg1, %c0_i32 : i32, i32, i32
  }
  func.func @transform_12(%arg0: i32, %arg1: i32) -> (i32, i32) {
    %c0_i32 = arith.constant 0 : i32
    %c0_i32_0 = arith.constant 0 : i32
    %c0_i32_1 = arith.constant 0 : i32
    return %c0_i32, %c0_i32_0 : i32, i32
  }
  func.func @transform_13(%arg0: i32, %arg1: i32) -> (i32, i32) {
    %c0_i32 = arith.constant 0 : i32
    %c0_i32_0 = arith.constant 0 : i32
    %c0_i32_1 = arith.constant 0 : i32
    return %c0_i32, %c0_i32_0 : i32, i32
  }
  func.func @transform_14(%arg0: i32, %arg1: i32) -> (i32, i32) {
    %c0_i32 = arith.constant 0 : i32
    %c0_i32_0 = arith.constant 0 : i32
    %c0_i32_1 = arith.constant 0 : i32
    return %c0_i32, %c0_i32_0 : i32, i32
  }
  func.func @transform_15(%arg0: i32, %arg1: i32) -> (i32, i32, i32) {
    %c0_i32 = arith.constant 0 : i32
    %c0_i32_0 = arith.constant 0 : i32
    return %arg0, %arg1, %c0_i32 : i32, i32, i32
  }
}

</mosaic_0001>

<bundles_post_ra>
// kernel: tpu_custom_call.1
= control target key start
LH: loop header
LB: loop body
LE: loop exit
PB: predicated region body
PF: predicated region fallthrough
CT: control target
= control target key end

     0   :  { %s5509_s18 = smov 0   ;;  %s5511_s19 = smov 0   ;;  %s8024_s0 = inlined_call_operand.vmem [shape: f32[2,432,4], index: 0, kind: input, shape index: {}]   ;;  %s8025_s1 = inlined_call_operand.vmem [shape: f32[432,1], index: 1, kind: input, shape index: {}]   ;;  %s8026_s2 = inlined_call_operand.vmem [shape: f32[4,16], index: 2, kind: input, shape index: {}]   ;;  %s8027_s3 = inlined_call_operand.vmem [shape: f32[1,16], index: 3, kind: input, shape index: {}]   ;;  %s8028_s4 = inlined_call_operand.vmem [shape: f32[1,16], index: 4, kind: input, shape index: {}]   ;;  %s8029_s5 = inlined_call_operand.vmem [shape: f32[9,16], index: 5, kind: input, shape index: {}]   ;;  %s8030_s6 = inlined_call_operand.vmem [shape: f32[1,16], index: 6, kind: input, shape index: {}]   ;;  %s8031_s7 = inlined_call_operand.vmem [shape: f32[1,16], index: 7, kind: input, shape index: {}]   ;;  %s8032_s8 = inlined_call_operand.vmem [shape: f32[16,8], index: 8, kind: input, shape index: {}]   ;;  %s8033_s9 = inlined_call_operand.vmem [shape: f32[1,8], index: 9, kind: input, shape index: {}]   ;;  %s8034_s10 = inlined_call_operand.vmem [shape: f32[1,8], index: 10, kind: input, shape index: {}]   ;;  %s8035_s11 = inlined_call_operand.vmem [shape: f32[2,256,4], index: 11, kind: input, shape index: {}]   ;;  %s8036_s12 = inlined_call_operand.vmem [shape: f32[4,8], index: 12, kind: input, shape index: {}]   ;;  %s8037_s13 = inlined_call_operand.vmem [shape: f32[1,8], index: 13, kind: input, shape index: {}]   ;;  %s8038_s14 = inlined_call_operand.vmem [shape: f32[1,8], index: 14, kind: input, shape index: {}]   ;;  %s8039_s15 = inlined_call_operand.vmem [shape: f32[2,256,8], index: 15, kind: output, shape index: {}]  }
   0x1   :  { %s5513_s20 = smov 0  }
   0x2 LB: > { %s37_s21 = sadd.s32 1, %s5422_s19  ;;  %p4916_p0 = scmp.ge.s32.totalorder %s5426_s20, 1  ;;  %s5426_s20 = sphi %s5513_s20, %s25_s20   ;;  %s5422_s19 = sphi %s5511_s19, %s8097_s19   ;;  %s5418_s18 = sphi %s5509_s18, %s8096_s18  }
   0x3   : > { %p39_p1 = scmp.ge.s32.totalorder %s37_s21, 2  ;;  %p468_p2 = scmp.lt.s32.totalorder %s5426_s20, 3 }
   0x5   : > { %s8099_s21 = smov (%p39_p1, %s37_s21), 0  ;;  %p469_p3 = pnand %p4916_p0, %p468_p2 }
   0x7   : > { %472 = sbr.rel (%p469_p3) target bundleno = 951 (0x3b7), region = 80 }
   0xc   : > { %v1515_v0 = vld [vmem:[%s8025_s1 + $0x40] sm:$0xff]  ;;  %v1513_v1 = vld [vmem:[%s8025_s1 + $0x30] sm:$0xff]  ;;  %vm776_vm0 = vcmask 1043456   ;;  %p529_p4 = scmp.lt.s32.totalorder %s5418_s18, 1  ;;  %v5428_v2 = vmov 0   ;;  %v1516_v4 = vld [vmem:[%s8025_s1 + $0x48] sm:$0xff] }
   0xd   : > { %5393 = vset.pattern.permute.xlu1 %v5428_v2  ;;  %5392 = vset.pattern.permute.xlu0 %v5428_v2  ;;  %v612_v3 = vld [vmem:[%s8026_s2] sm:$0xf]  ;;  %v1514_v5 = vld [vmem:[%s8025_s1 + $0x38] sm:$0xff]  ;;  %vm613_vm1 = vcmask 31744   ;;  %v1517_v9 = vld [vmem:[%s8025_s1 + $0x50] sm:$0xff]  ;;  %vm1885_vm2 = vcmask 130048  }
   0xe   : > { %1603 = vperm.xlu1 %5393, %v1515_v0   ;;  %1593 = vperm.xlu0 %5392, %v1513_v1   ;;  %s8101_s18 = smov (!%p529_p4, %s5418_s18), 1  ;;  %v1518_v6 = vld [vmem:[%s8025_s1 + $0x58] sm:$0xff]  ;;  %v1520_v12 = vld [vmem:[%s8025_s1 + $0x68] sm:$0xff]  ;;  %v1519_v13 = vld [vmem:[%s8025_s1 + $0x60] sm:$0xff]  ;;  %vm2167_vm3 = vcmask 1046528   ;;  %vm2412_vm4 = vcmask 1045504  }
   0xf   : > { %5177 = vmatprep.subr.msk.mxu0 %vm776_vm0, %v612_v3  ;;  %s5366_s17 = smul.u32 432, %s8101_s18  ;;  %v1522_v16 = vld [vmem:[%s8025_s1 + $0x78] sm:$0xff]  ;;  %v1521_v17 = vld [vmem:[%s8025_s1 + $0x70] sm:$0xff]  ;;  %v1524_v20 = vld [vmem:[%s8025_s1 + $0x88] sm:$0xff]  ;;  %s5053_s29 = sshll.u32 %s8101_s18, 8  ;;  %vm4778_vm5 = vcmask 64512  }
  0x10   : > { %5178 = vmatpush3.msk.msra.mxu0 %vm776_vm0, %v612_v3  ;;  %v1523_v21 = vld [vmem:[%s8025_s1 + $0x80] sm:$0xff]  ;;  %v1526_v24 = vld [vmem:[%s8025_s1 + $0x98] sm:$0xff]  ;;  %v1525_v25 = vld [vmem:[%s8025_s1 + $0x90] sm:$0xff]  ;;  %s7802_s22 = scalar_lea.vmem %s8039_s15, %s5053_s29 }
  0x11   : > { %s5550_s24 = scalar_lea.vmem %s8024_s0, %s5366_s17  ;;  %v1528_v28 = vld [vmem:[%s8025_s1 + $0xa8] sm:$0xff]  ;;  %v1527_v29 = vld [vmem:[%s8025_s1 + $0xa0] sm:$0xff]  ;;  %v1530_v32 = vld [vmem:[%s8025_s1 + $0xb8] sm:$0xff]  ;;  %s7651_s17 = scalar_lea.vmem %s8035_s11, %s5053_s29 }
  0x12   : > { %1608 = vperm.xlu1 %5393, %v1516_v4   ;;  %1598 = vperm.xlu0 %5392, %v1514_v5   ;;  %v558_v7 = vld [vmem:[%s5550_s24] sm:$0xff]  ;;  %v559_v8 = vld [vmem:[%s5550_s24 + $0x8] sm:$0xff]  ;;  %v560_v10 = vld [vmem:[%s5550_s24 + $0x10] sm:$0xff] }
  0x13   : > { %5179 = vmatprep.mubr.msk.f32.mxu0 %vm613_vm1, %v558_v7  ;;  %v561_v11 = vld [vmem:[%s5550_s24 + $0x18] sm:$0xff]  ;;  %v562_v14 = vld [vmem:[%s5550_s24 + $0x20] sm:$0xff]  ;;  %v563_v15 = vld [vmem:[%s5550_s24 + $0x28] sm:$0xff] }
  0x14   : > { %5180 = vmatmul.mubr.msk.f32.vlgmr.msra.gmra.mxu0 %vm613_vm1, %v559_v8  ;;  %v564_v18 = vld [vmem:[%s5550_s24 + $0x30] sm:$0xff]  ;;  %v565_v19 = vld [vmem:[%s5550_s24 + $0x38] sm:$0xff]  ;;  %v566_v22 = vld [vmem:[%s5550_s24 + $0x40] sm:$0xff] }
  0x15   : > { %5182 = vmatprep.mubr.msk.f32.mxu0 %vm613_vm1, %v560_v10  ;;  %v567_v23 = vld [vmem:[%s5550_s24 + $0x48] sm:$0xff]  ;;  %v568_v26 = vld [vmem:[%s5550_s24 + $0x50] sm:$0xff]  ;;  %v569_v27 = vld [vmem:[%s5550_s24 + $0x58] sm:$0xff] }
  0x16   : > { %1618 = vperm.xlu1 %5393, %v1518_v6   ;;  %1613 = vperm.xlu0 %5392, %v1517_v9   ;;  %v570_v30 = vld [vmem:[%s5550_s24 + $0x60] sm:$0xff]  ;;  %v571_v31 = vld [vmem:[%s5550_s24 + $0x68] sm:$0xff]  ;;  %v1529_v33 = vld [vmem:[%s8025_s1 + $0xb0] sm:$0xff] }
  0x17   : > { %v572_v34 = vld [vmem:[%s5550_s24 + $0x70] sm:$0xff]  ;;  %v573_v35 = vld [vmem:[%s5550_s24 + $0x78] sm:$0xff]  ;;  %v1532_v36 = vld [vmem:[%s8025_s1 + $0xc8] sm:$0xff] }
  0x18   : > { %5183 = vmatmul.mubr.msk.f32.gmra.mxu0 %vm613_vm1, %v561_v11  ;;  %v1531_v37 = vld [vmem:[%s8025_s1 + $0xc0] sm:$0xff]  ;;  %v575_v39 = vld [vmem:[%s5550_s24 + $0x88] sm:$0xff]  ;;  %v1534_v40 = vld [vmem:[%s8025_s1 + $0xd8] sm:$0xff] }
  0x19   : > { %5185 = vmatprep.mubr.msk.f32.mxu0 %vm613_vm1, %v562_v14  ;;  %v574_v38 = vld [vmem:[%s5550_s24 + $0x80] sm:$0xff]  ;;  %v1533_v41 = vld [vmem:[%s8025_s1 + $0xd0] sm:$0xff]  ;;  %v577_v43 = vld [vmem:[%s5550_s24 + $0x98] sm:$0xff] }
  0x1a   : > { %1628 = vperm.xlu1 %5393, %v1520_v12   ;;  %1623 = vperm.xlu0 %5392, %v1519_v13   ;;  %v576_v42 = vld [vmem:[%s5550_s24 + $0x90] sm:$0xff]  ;;  %v1536_v44 = vld [vmem:[%s8025_s1 + $0xe8] sm:$0xff]  ;;  %v1535_v45 = vld [vmem:[%s8025_s1 + $0xe0] sm:$0xff] }
  0x1b   : > { %v578_v46 = vld [vmem:[%s5550_s24 + $0xa0] sm:$0xff]  ;;  %v579_v47 = vld [vmem:[%s5550_s24 + $0xa8] sm:$0xff]  ;;  %v1538_v48 = vld [vmem:[%s8025_s1 + $0xf8] sm:$0xff] }
  0x1c   : > { %5186 = vmatmul.mubr.msk.f32.gmra.mxu0 %vm613_vm1, %v563_v15  ;;  %v1537_v49 = vld [vmem:[%s8025_s1 + $0xf0] sm:$0xff]  ;;  %v581_v51 = vld [vmem:[%s5550_s24 + $0xb8] sm:$0xff]  ;;  %v1540_v52 = vld [vmem:[%s8025_s1 + $0x108] sm:$0xff] }
  0x1d   : > { %5188 = vmatprep.mubr.msk.f32.mxu0 %vm613_vm1, %v564_v18  ;;  %v580_v50 = vld [vmem:[%s5550_s24 + $0xb0] sm:$0xff]  ;;  %v1539_v53 = vld [vmem:[%s8025_s1 + $0x100] sm:$0xff]  ;;  %v583_v55 = vld [vmem:[%s5550_s24 + $0xc8] sm:$0xff] }
  0x1e   : > { %1638 = vperm.xlu1 %5393, %v1522_v16   ;;  %1633 = vperm.xlu0 %5392, %v1521_v17   ;;  %v582_v54 = vld [vmem:[%s5550_s24 + $0xc0] sm:$0xff]  ;;  %v1542_v56 = vld [vmem:[%s8025_s1 + $0x118] sm:$0xff]  ;;  %v1541_v57 = vld [vmem:[%s8025_s1 + $0x110] sm:$0xff] }
  0x1f   : > { %v584_v58 = vld [vmem:[%s5550_s24 + $0xd0] sm:$0xff]  ;;  %v585_v59 = vld [vmem:[%s5550_s24 + $0xd8] sm:$0xff]  ;;  %v1544_v60 = vld [vmem:[%s8025_s1 + $0x128] sm:$0xff] }
  0x20   : > { %5189 = vmatmul.mubr.msk.f32.gmra.mxu0 %vm613_vm1, %v565_v19  ;;  %v1543_v61 = vld [vmem:[%s8025_s1 + $0x120] sm:$0xff]  ;;  %v587_v63 = vld [vmem:[%s5550_s24 + $0xe8] sm:$0xff]  ;;  %v1546_v0 = vld [vmem:[%s8025_s1 + $0x138] sm:$0xff] }
  0x21   : > { %5191 = vmatprep.mubr.msk.f32.mxu0 %vm613_vm1, %v566_v22  ;;  %v586_v62 = vld [vmem:[%s5550_s24 + $0xe0] sm:$0xff]  ;;  %v1545_v1 = vld [vmem:[%s8025_s1 + $0x130] sm:$0xff]  ;;  %v589_v3 = vld [vmem:[%s5550_s24 + $0xf8] sm:$0xff] }
  0x22   : > { %1648 = vperm.xlu1 %5393, %v1524_v20   ;;  %1643 = vperm.xlu0 %5392, %v1523_v21   ;;  %v588_v2 = vld [vmem:[%s5550_s24 + $0xf0] sm:$0xff]  ;;  %v1548_v4 = vld [vmem:[%s8025_s1 + $0x148] sm:$0xff]  ;;  %v1547_v5 = vld [vmem:[%s8025_s1 + $0x140] sm:$0xff] }
  0x23   : > { %v590_v6 = vld [vmem:[%s5550_s24 + $0x100] sm:$0xff]  ;;  %v591_v7 = vld [vmem:[%s5550_s24 + $0x108] sm:$0xff]  ;;  %v1550_v8 = vld [vmem:[%s8025_s1 + $0x158] sm:$0xff] }
  0x24   : > { %5192 = vmatmul.mubr.msk.f32.gmra.mxu0 %vm613_vm1, %v567_v23  ;;  %v1549_v9 = vld [vmem:[%s8025_s1 + $0x150] sm:$0xff]  ;;  %v593_v11 = vld [vmem:[%s5550_s24 + $0x118] sm:$0xff]  ;;  %v1552_v12 = vld [vmem:[%s8025_s1 + $0x168] sm:$0xff] }
  0x25   : > { %5194 = vmatprep.mubr.msk.f32.mxu0 %vm613_vm1, %v568_v26  ;;  %v592_v10 = vld [vmem:[%s5550_s24 + $0x110] sm:$0xff]  ;;  %v1551_v13 = vld [vmem:[%s8025_s1 + $0x160] sm:$0xff]  ;;  %v595_v15 = vld [vmem:[%s5550_s24 + $0x128] sm:$0xff] }
  0x26   : > { %1658 = vperm.xlu1 %5393, %v1526_v24   ;;  %1653 = vperm.xlu0 %5392, %v1525_v25   ;;  %v594_v14 = vld [vmem:[%s5550_s24 + $0x120] sm:$0xff]  ;;  %v1554_v16 = vld [vmem:[%s8025_s1 + $0x178] sm:$0xff]  ;;  %v1553_v17 = vld [vmem:[%s8025_s1 + $0x170] sm:$0xff] }
  0x27   : > { %v596_v18 = vld [vmem:[%s5550_s24 + $0x130] sm:$0xff]  ;;  %v597_v19 = vld [vmem:[%s5550_s24 + $0x138] sm:$0xff]  ;;  %v1556_v20 = vld [vmem:[%s8025_s1 + $0x188] sm:$0xff] }
  0x28   : > { %5195 = vmatmul.mubr.msk.f32.gmra.mxu0 %vm613_vm1, %v569_v27  ;;  %v1555_v21 = vld [vmem:[%s8025_s1 + $0x180] sm:$0xff]  ;;  %v599_v23 = vld [vmem:[%s5550_s24 + $0x148] sm:$0xff]  ;;  %v1558_v24 = vld [vmem:[%s8025_s1 + $0x198] sm:$0xff] }
  0x29   : > { %5197 = vmatprep.mubr.msk.f32.mxu0 %vm613_vm1, %v570_v30  ;;  %v598_v22 = vld [vmem:[%s5550_s24 + $0x140] sm:$0xff]  ;;  %v1557_v25 = vld [vmem:[%s8025_s1 + $0x190] sm:$0xff]  ;;  %v601_v27 = vld [vmem:[%s5550_s24 + $0x158] sm:$0xff] }
  0x2a   : > { %1668 = vperm.xlu1 %5393, %v1528_v28   ;;  %1663 = vperm.xlu0 %5392, %v1527_v29   ;;  %v600_v26 = vld [vmem:[%s5550_s24 + $0x150] sm:$0xff]  ;;  %v1560_v28 = vld [vmem:[%s8025_s1 + $0x1a8] sm:$0xff]  ;;  %v1559_v29 = vld [vmem:[%s8025_s1 + $0x1a0] sm:$0xff] }
  0x2b   : > { %v602_v30 = vld [vmem:[%s5550_s24 + $0x160] sm:$0xff] }
  0x2c   : > { %5198 = vmatmul.mubr.msk.f32.gmra.mxu0 %vm613_vm1, %v571_v31  ;;  %v603_v31 = vld [vmem:[%s5550_s24 + $0x168] sm:$0xff] }
  0x2d   : > { %5200 = vmatprep.mubr.msk.f32.mxu0 %vm613_vm1, %v572_v34  ;;  %v604_v34 = vld [vmem:[%s5550_s24 + $0x170] sm:$0xff] }
  0x2e   : > { %1678 = vperm.xlu1 %5393, %v1530_v32   ;;  %1673 = vperm.xlu0 %5392, %v1529_v33   ;;  %v1508_v32 = vld [vmem:[%s8025_s1 + $0x8] sm:$0xff]  ;;  %v1507_v33 = vld [vmem:[%s8025_s1] sm:$0xff] }
  0x30   : > { %5201 = vmatmul.mubr.msk.f32.gmra.mxu0 %vm613_vm1, %v573_v35  ;;  %v605_v35 = vld [vmem:[%s5550_s24 + $0x178] sm:$0xff] }
  0x31   : > { %5203 = vmatprep.mubr.msk.f32.mxu0 %vm613_vm1, %v574_v38  ;;  %v606_v38 = vld [vmem:[%s5550_s24 + $0x180] sm:$0xff] }
  0x32   : > { %1688 = vperm.xlu1 %5393, %v1532_v36   ;;  %1683 = vperm.xlu0 %5392, %v1531_v37   ;;  %v1510_v36 = vld [vmem:[%s8025_s1 + $0x18] sm:$0xff]  ;;  %v1509_v37 = vld [vmem:[%s8025_s1 + $0x10] sm:$0xff] }
  0x34   : > { %5204 = vmatmul.mubr.msk.f32.gmra.mxu0 %vm613_vm1, %v575_v39  ;;  %v607_v39 = vld [vmem:[%s5550_s24 + $0x188] sm:$0xff] }
  0x35   : > { %5206 = vmatprep.mubr.msk.f32.mxu0 %vm613_vm1, %v576_v42  ;;  %v608_v42 = vld [vmem:[%s5550_s24 + $0x190] sm:$0xff] }
  0x36   : > { %1698 = vperm.xlu1 %5393, %v1534_v40   ;;  %1693 = vperm.xlu0 %5392, %v1533_v41   ;;  %v1512_v40 = vld [vmem:[%s8025_s1 + $0x28] sm:$0xff]  ;;  %v1511_v41 = vld [vmem:[%s8025_s1 + $0x20] sm:$0xff] }
  0x38   : > { %5207 = vmatmul.mubr.msk.f32.gmra.mxu0 %vm613_vm1, %v577_v43  ;;  %v609_v43 = vld [vmem:[%s5550_s24 + $0x198] sm:$0xff] }
  0x39   : > { %5209 = vmatprep.mubr.msk.f32.mxu0 %vm613_vm1, %v578_v46 }
  0x3a   : > { %1708 = vperm.xlu1 %5393, %v1536_v44   ;;  %1703 = vperm.xlu0 %5392, %v1535_v45   ;;  %v610_v44 = vld [vmem:[%s5550_s24 + $0x1a0] sm:$0xff]  ;;  %v611_v45 = vld [vmem:[%s5550_s24 + $0x1a8] sm:$0xff] }
  0x3c   : > { %5210 = vmatmul.mubr.msk.f32.gmra.mxu0 %vm613_vm1, %v579_v47 }
  0x3d   : > { %5212 = vmatprep.mubr.msk.f32.mxu0 %vm613_vm1, %v580_v50 }
  0x3e   : > { %1718 = vperm.xlu1 %5393, %v1538_v48   ;;  %1713 = vperm.xlu0 %5392, %v1537_v49  }
  0x40   : > { %5213 = vmatmul.mubr.msk.f32.gmra.mxu0 %vm613_vm1, %v581_v51 }
  0x41   : > { %5215 = vmatprep.mubr.msk.f32.mxu0 %vm613_vm1, %v582_v54 }
  0x42   : > { %1728 = vperm.xlu1 %5393, %v1540_v52   ;;  %1723 = vperm.xlu0 %5392, %v1539_v53  }
  0x44   : > { %5216 = vmatmul.mubr.msk.f32.gmra.mxu0 %vm613_vm1, %v583_v55 }
  0x45   : > { %5218 = vmatprep.mubr.msk.f32.mxu0 %vm613_vm1, %v584_v58  ;;  %v3908_v58 = vld [vmem:[%s8032_s8 + $0x8] sm:$0xff] }
  0x46   : > { %1738 = vperm.xlu1 %5393, %v1542_v56   ;;  %1733 = vperm.xlu0 %5392, %v1541_v57  }
  0x47   : > { %5260 = vmatprep.subr.mxu0 %v3908_v58  ;;  %5362 = vmatprep.subr.mxu1 %v3908_v58 }
  0x48   : > { %5219 = vmatmul.mubr.msk.f32.gmra.mxu0 %vm613_vm1, %v585_v59  ;;  %5364 = vmatpush3.msra.mxu1 %v3908_v58 }
  0x49   : > { %5221 = vmatprep.mubr.msk.f32.mxu0 %vm613_vm1, %v586_v62  ;;  %5261 = vmatpush3.msra.mxu0 %v3908_v58 }
  0x4a   : > { %1748 = vperm.xlu1 %5393, %v1544_v60   ;;  %1743 = vperm.xlu0 %5392, %v1543_v61   ;;  %v3907_v61 = vld [vmem:[%s8032_s8] sm:$0xff] }
  0x4b   : > { %5262 = vmatprep.subr.mxu0 %v3907_v61  ;;  %5363 = vmatprep.subr.mxu1 %v3907_v61 }
  0x4c   : > { %5222 = vmatmul.mubr.msk.f32.gmra.mxu0 %vm613_vm1, %v587_v63  ;;  %5365 = vmatpush3.msra.mxu1 %v3907_v61 }
  0x4d   : > { %5224 = vmatprep.mubr.msk.f32.mxu0 %vm613_vm1, %v588_v2  ;;  %5263 = vmatpush3.msra.mxu0 %v3907_v61 }
  0x4e   : > { %1758 = vperm.xlu1 %5393, %v1546_v0   ;;  %1753 = vperm.xlu0 %5392, %v1545_v1  }
  0x50   : > { %5225 = vmatmul.mubr.msk.f32.gmra.mxu0 %vm613_vm1, %v589_v3 }
  0x51   : > { %5227 = vmatprep.mubr.msk.f32.mxu0 %vm613_vm1, %v590_v6 }
  0x52   : > { %1768 = vperm.xlu1 %5393, %v1548_v4   ;;  %1763 = vperm.xlu0 %5392, %v1547_v5  }
  0x54   : > { %5228 = vmatmul.mubr.msk.f32.gmra.mxu0 %vm613_vm1, %v591_v7 }
  0x55   : > { %5230 = vmatprep.mubr.msk.f32.mxu0 %vm613_vm1, %v592_v10 }
  0x56   : > { %1778 = vperm.xlu1 %5393, %v1550_v8   ;;  %1773 = vperm.xlu0 %5392, %v1549_v9  }
  0x58   : > { %5231 = vmatmul.mubr.msk.f32.gmra.mxu0 %vm613_vm1, %v593_v11 }
  0x59   : > { %5233 = vmatprep.mubr.msk.f32.mxu0 %vm613_vm1, %v594_v14 }
  0x5a   : > { %1788 = vperm.xlu1 %5393, %v1552_v12   ;;  %1783 = vperm.xlu0 %5392, %v1551_v13  }
  0x5c   : > { %5234 = vmatmul.mubr.msk.f32.gmra.mxu0 %vm613_vm1, %v595_v15 }
  0x5d   : > { %5236 = vmatprep.mubr.msk.f32.mxu0 %vm613_vm1, %v596_v18 }
  0x5e   : > { %1798 = vperm.xlu1 %5393, %v1554_v16   ;;  %1793 = vperm.xlu0 %5392, %v1553_v17  }
  0x60   : > { %5237 = vmatmul.mubr.msk.f32.gmra.mxu0 %vm613_vm1, %v597_v19 }
  0x61   : > { %5239 = vmatprep.mubr.msk.f32.mxu0 %vm613_vm1, %v598_v22  ;;  %v1999_v22 = vlaneseq }
  0x62   : > { %1808 = vperm.xlu1 %5393, %v1556_v20   ;;  %1803 = vperm.xlu0 %5392, %v1555_v21  }
  0x64   : > { %5240 = vmatmul.mubr.msk.f32.gmra.mxu0 %vm613_vm1, %v599_v23  ;;  %v5895_v23 = vld [vmem:[%s8027_s3] ss:$0 sm:$0xff] }
  0x65   : > { %5242 = vmatprep.mubr.msk.f32.mxu0 %vm613_vm1, %v600_v26 }
  0x66   : > { %1818 = vperm.xlu1 %5393, %v1558_v24   ;;  %1813 = vperm.xlu0 %5392, %v1557_v25  }
  0x68   : > { %5243 = vmatmul.mubr.msk.f32.gmra.mxu0 %vm613_vm1, %v601_v27  ;;  %v5904_v27 = vld [vmem:[%s8028_s4] ss:$0 sm:$0xff] }
  0x69   : > { %5245 = vmatprep.mubr.msk.f32.mxu0 %vm613_vm1, %v602_v30 }
  0x6a   : > { %1828 = vperm.xlu1 %5393, %v1560_v28   ;;  %1823 = vperm.xlu0 %5392, %v1559_v29   ;;  %v5906_v28 = vshrl.u32 %v1999_v22, 7 }
  0x6c   : > { %5246 = vmatmul.mubr.msk.f32.gmra.mxu0 %vm613_vm1, %v603_v31 }
  0x6d   : > { %5248 = vmatprep.mubr.msk.f32.mxu0 %vm613_vm1, %v604_v34 }
  0x6e   : > { %1568 = vperm.xlu1 %5393, %v1508_v32   ;;  %1563 = vperm.xlu0 %5392, %v1507_v33  }
  0x70   : > { %5249 = vmatmul.mubr.msk.f32.gmra.mxu0 %vm613_vm1, %v605_v35 }
  0x71   : > { %5251 = vmatprep.mubr.msk.f32.mxu0 %vm613_vm1, %v606_v38  ;;  %v2001_v38 = vsub.s32 0, %v5906_v28 }
  0x72   : > { %1578 = vperm.xlu1 %5393, %v1510_v36   ;;  %1573 = vperm.xlu0 %5392, %v1509_v37   ;;  %v2069_v36 = vsub.s32 1, %v5906_v28  ;;  %v2314_v37 = vsub.s32 2, %v5906_v28 }
  0x74   : > { %5252 = vmatmul.mubr.msk.f32.gmra.mxu0 %vm613_vm1, %v607_v39 }
  0x75   : > { %5254 = vmatprep.mubr.msk.f32.mxu0 %vm613_vm1, %v608_v42  ;;  %v1940_v42 = vld [vmem:[%s8029_s5] sm:$0xff] }
  0x76   : > { %1588 = vperm.xlu1 %5393, %v1512_v40   ;;  %1583 = vperm.xlu0 %5392, %v1511_v41  }
  0x78   : > { %5255 = vmatmul.mubr.msk.f32.gmra.mxu0 %vm613_vm1, %v609_v43 }
  0x79   : > { %5257 = vmatprep.mubr.msk.f32.mxu0 %vm613_vm1, %v610_v44  ;;  %v2559_v44 = vsub.s32 3, %v5906_v28 }
  0x7c   : > { %5258 = vmatmul.mubr.msk.f32.gmra.mxu0 %vm613_vm1, %v611_v45 }
  0x89   : > { %v5810_v46 = vpop.permute.xlu1 %1603  ;;  %v5812_v47 = vpop.permute.xlu0 %1593 }
  0x8d   : > { %v5814_v48 = vpop.permute.xlu1 %1608  ;;  %v5816_v49 = vpop.permute.xlu0 %1598 }
  0x91   : > { %v5818_v50 = vpop.permute.xlu1 %1618  ;;  %v5820_v51 = vpop.permute.xlu0 %1613 }
  0x95   : > { %v5822_v52 = vpop.permute.xlu1 %1628  ;;  %v5824_v53 = vpop.permute.xlu0 %1623 }
  0x99   : > { %v5826_v54 = vpop.permute.xlu1 %1638  ;;  %v5828_v55 = vpop.permute.xlu0 %1633 }
  0x9d   : > { %v5830_v56 = vpop.permute.xlu1 %1648  ;;  %v5832_v57 = vpop.permute.xlu0 %1643 }
  0xa1   : > { %v5837_v59 = vpop.permute.xlu1 %1658  ;;  %v5839_v60 = vpop.permute.xlu0 %1653 }
  0xa5   : > { %v5844_v62 = vpop.permute.xlu1 %1668  ;;  %v5846_v63 = vpop.permute.xlu0 %1663 }
  0xa9   : > { %v5848_v0 = vpop.permute.xlu1 %1678  ;;  %v5850_v1 = vpop.permute.xlu0 %1673 }
  0xad   : > { %v5852_v2 = vpop.permute.xlu1 %1688  ;;  %v5854_v3 = vpop.permute.xlu0 %1683 }
  0xb1   : > { %v5856_v4 = vpop.permute.xlu1 %1698  ;;  %v5858_v5 = vpop.permute.xlu0 %1693 }
  0xb5   : > { %v5860_v6 = vpop.permute.xlu1 %1708  ;;  %v5862_v7 = vpop.permute.xlu0 %1703 }
  0xb9   : > { %v5864_v8 = vpop.permute.xlu1 %1718  ;;  %v5866_v9 = vpop.permute.xlu0 %1713 }
  0xbd   : > { %v5868_v10 = vpop.permute.xlu1 %1728  ;;  %v5870_v11 = vpop.permute.xlu0 %1723 }
  0xbe   : > { %8044 = vst [vmem:[#allocation3_spill] sm:$0xff] %v5868_v10  ;;  %8045 = vst [vmem:[#allocation4_spill] sm:$0xff] %v5870_v11 }
  0xc1   : > { %v5872_v12 = vpop.permute.xlu1 %1738  ;;  %v5874_v13 = vpop.permute.xlu0 %1733 }
  0xc2   : > { %8046 = vst [vmem:[#allocation5_spill] sm:$0xff] %v5872_v12  ;;  %8047 = vst [vmem:[#allocation6_spill] sm:$0xff] %v5874_v13 }
  0xc5   : > { %v5876_v14 = vpop.permute.xlu1 %1748  ;;  %v5878_v15 = vpop.permute.xlu0 %1743 }
  0xc6   : > { %8048 = vst [vmem:[#allocation7_spill] sm:$0xff] %v5876_v14  ;;  %8049 = vst [vmem:[#allocation8_spill] sm:$0xff] %v5878_v15 }
  0xc9   : > { %v5880_v16 = vpop.permute.xlu1 %1758  ;;  %v5882_v17 = vpop.permute.xlu0 %1753 }
  0xca   : > { %8050 = vst [vmem:[#allocation9_spill] sm:$0xff] %v5880_v16  ;;  %8051 = vst [vmem:[#allocation10_spill] sm:$0xff] %v5882_v17 }
  0xcd   : > { %v5884_v18 = vpop.permute.xlu1 %1768  ;;  %v5886_v19 = vpop.permute.xlu0 %1763 }
  0xce   : > { %8052 = vst [vmem:[#allocation11_spill] sm:$0xff] %v5884_v18  ;;  %8053 = vst [vmem:[#allocation12_spill] sm:$0xff] %v5886_v19  ;;  %v3183_v18 = vsub.s32 7, %v5906_v28 }
  0xd1   : > { %v5888_v20 = vpop.permute.xlu1 %1778  ;;  %v5890_v21 = vpop.permute.xlu0 %1773 }
  0xd2   : > { %8054 = vst [vmem:[#allocation13_spill] sm:$0xff] %v5888_v20  ;;  %8055 = vst [vmem:[#allocation14_spill] sm:$0xff] %v5890_v21 }
  0xd4   : > { %v5181_v26 = vpop.f32.mrf.mxu0 }
  0xd5   : > { %v5897_v24 = vpop.permute.xlu1 %1788  ;;  %v5899_v25 = vpop.permute.xlu0 %1783  ;;  %v1123_v29 = vmul.f32 %v5181_v26, %v5895_v23 }
  0xd6   : > { %8056 = vst [vmem:[#allocation15_spill] sm:$0xff] %v5897_v24  ;;  %8057 = vst [vmem:[#allocation16_spill] sm:$0xff] %v5899_v25  ;;  %v846_v30 = vpop.f32.mrf.mxu0 }
  0xd7   : > { %v1184_v31 = vadd.f32 %v5904_v27, %v1123_v29  ;;  %v1122_v32 = vmul.f32 %v5895_v23, %v846_v30 }
  0xd8   : > { %v5184_v35 = vpop.f32.mrf.mxu0 }
  0xd9   : > { %v5911_v33 = vpop.permute.xlu1 %1798  ;;  %v5913_v34 = vpop.permute.xlu0 %1793  ;;  %v1238_v39 = vadd.f32 3.0, %v1184_v31  ;;  %v1183_v40 = vadd.f32 %v5904_v27, %v1122_v32  ;;  %v1125_v41 = vmul.f32 %v5184_v35, %v5895_v23  ;;  %v5930_v32 = vrot.slane %v1940_v42, %v2069_v36 }
  0xda   : > { %8058 = vst [vmem:[#allocation17_spill] sm:$0xff] %v5911_v33  ;;  %8059 = vst [vmem:[#allocation18_spill] sm:$0xff] %v5913_v34  ;;  %v856_v43 = vpop.f32.mrf.mxu0  ;;  %v5932_v35 = vrot.slane %v1940_v42, %v2314_v37  ;;  %v5934_v34 = vrot.slane %v1940_v42, %v2001_v38 }
  0xdb   : > { %v1292_v45 = vmax.f32 %v1238_v39, 0.0  ;;  %v1237_v58 = vadd.f32 3.0, %v1183_v40  ;;  %v1186_v61 = vadd.f32 %v5904_v27, %v1125_v41  ;;  %v1124_v22 = vmul.f32 %v5895_v23, %v856_v43 }
  0xdc   : > { %v5187_v30 = vpop.f32.mrf.mxu0  ;;  %v5938_v43 = vrot.slane %v1940_v42, %v2559_v44  ;;  %v3115_v44 = vsub.s32 6, %v5906_v28 }
  0xdd   : > { %v5926_v26 = vpop.permute.xlu1 %1808  ;;  %v5928_v29 = vpop.permute.xlu0 %1803  ;;  %v1291_v33 = vmax.f32 %v1237_v58, 0.0  ;;  %v1240_v25 = vadd.f32 3.0, %v1186_v61  ;;  %v1185_v39 = vadd.f32 %v5904_v27, %v1124_v22  ;;  %v1127_v24 = vmul.f32 %v5187_v30, %v5895_v23 }
  0xde   : > { %8060 = vst [vmem:[#allocation19_spill] sm:$0xff] %v5926_v26  ;;  %8061 = vst [vmem:[#allocation20_spill] sm:$0xff] %v5928_v29  ;;  %v866_v41 = vpop.f32.mrf.mxu0  ;;  %v1346_v21 = vmin.f32 %v1292_v45, 6.0  ;;  %v2627_v26 = vsub.s32 4, %v5906_v28  ;;  %v2871_v29 = vsub.s32 5, %v5906_v28 }
  0xdf   : > { %v1294_v36 = vmax.f32 %v1240_v25, 0.0  ;;  %v1239_v20 = vadd.f32 3.0, %v1185_v39  ;;  %v1188_v37 = vadd.f32 %v5904_v27, %v1127_v24  ;;  %v1126_v38 = vmul.f32 %v5895_v23, %v866_v41 }
  0xe0   : > { %v5190_v22 = vpop.f32.mrf.mxu0  ;;  %v1400_v30 = vmul.f32 %v1346_v21, %v1184_v31  ;;  %v1345_v45 = vmin.f32 %v1291_v33, 6.0  ;;  %v5954_v14 = vrot.slane %v1940_v42, %v2627_v26  ;;  %v5967_v26 = vrot.slane %v1940_v42, %v3183_v18 }
  0xe1   : > { %v5944_v58 = vpop.permute.xlu1 %1818  ;;  %v5946_v19 = vpop.permute.xlu0 %1813  ;;  %v1293_v17 = vmax.f32 %v1239_v20, 0.0  ;;  %v1242_v16 = vadd.f32 3.0, %v1188_v37  ;;  %v5951_v25 = vadd.f32 %v5904_v27, %v1126_v38  ;;  %v1129_v24 = vmul.f32 %v5190_v22, %v5895_v23 }
  0xe2   : > { %8062 = vst [vmem:[#allocation21_spill] sm:$0xff] %v5944_v58  ;;  %8063 = vst [vmem:[#allocation22_spill] sm:$0xff] %v5946_v19  ;;  %v876_v41 = vpop.f32.mrf.mxu0  ;;  %v1399_v15 = vmul.f32 %v1345_v45, %v1183_v40  ;;  %v1348_v58 = vmin.f32 %v1294_v36, 6.0  ;;  %v5956_v19 = vrot.slane %v1940_v42, %v2871_v29  ;;  %v5965_v40 = vrot.slane %v1940_v42, %v3115_v44 }
  0xe3   : > { %8064 = vst [vmem:[#allocation23_spill] sm:$0xff] %v5954_v14  ;;  %v1296_v21 = vmax.f32 %v1242_v16, 0.0  ;;  %v1241_v31 = vadd.f32 3.0, %v5951_v25  ;;  %v1190_v33 = vadd.f32 %v5904_v27, %v1129_v24  ;;  %v1128_v20 = vmul.f32 %v5895_v23, %v876_v41  ;;  %8069 = vst [vmem:[#allocation28_spill] sm:$0xff] %v5967_v26 }
  0xe4   : > { %8065 = vst [vmem:[#allocation24_spill] sm:$0xff] %v5956_v19  ;;  %v5193_v13 = vpop.f32.mrf.mxu0  ;;  %v1402_v22 = vmul.f32 %v1348_v58, %v1186_v61  ;;  %v1347_v12 = vmin.f32 %v1293_v17, 6.0  ;;  %8068 = vst [vmem:[#allocation27_spill] sm:$0xff] %v5965_v40  ;;  %v1454_v45 = vmul.f32 0.16666667, %v1400_v30 }
  0xe5   : > { %v5961_v28 = vpop.permute.xlu1 %1828  ;;  %v5963_v38 = vpop.permute.xlu0 %1823  ;;  %v1244_v29 = vadd.f32 3.0, %v1190_v33  ;;  %v1189_v16 = vadd.f32 %v5904_v27, %v1128_v20  ;;  %v1131_v36 = vmul.f32 %v5193_v13, %v5895_v23  ;;  %v1295_v24 = vmax.f32 %v1241_v31, 0.0 }
  0xe6   : > { %8066 = vst [vmem:[#allocation25_spill] sm:$0xff] %v5961_v28  ;;  %8067 = vst [vmem:[#allocation26_spill] sm:$0xff] %v5963_v38  ;;  %v886_v19 = vpop.f32.mrf.mxu0  ;;  %v1453_v41 = vmul.f32 0.16666667, %v1399_v15  ;;  %v1401_v11 = vmul.f32 %v1347_v12, %v1185_v39  ;;  %v1350_v28 = vmin.f32 %v1296_v21, 6.0 }
  0xe7   : > { %v1298_v10 = vmax.f32 %v1244_v29, 0.0  ;;  %v1243_v38 = vadd.f32 3.0, %v1189_v16  ;;  %v1192_v61 = vadd.f32 %v5904_v27, %v1131_v36  ;;  %v1130_v17 = vmul.f32 %v5895_v23, %v886_v19 }
  0xe8   : > { %v5196_v26 = vpop.f32.mrf.mxu0  ;;  %v1456_v20 = vmul.f32 0.16666667, %v1402_v22  ;;  %v1404_v40 = vmul.f32 %v1350_v28, %v1188_v37  ;;  %v1455_v19 = vmul.f32 0.16666667, %v1401_v11  ;;  %v1349_v29 = vmin.f32 %v1295_v24, 6.0 }
  0xe9   : > { %v1569_v58 = vpop.permute.xlu1 %1568  ;;  %v1564_v18 = vpop.permute.xlu0 %1563  ;;  %v1352_v13 = vmin.f32 %v1298_v10, 6.0  ;;  %v1297_v30 = vmax.f32 %v1243_v38, 0.0  ;;  %v1246_v31 = vadd.f32 3.0, %v1192_v61  ;;  %v1191_v15 = vadd.f32 %v5904_v27, %v1130_v17 }
  0xea   : > { %v1832_v42 = vmul.f32 %v1569_v58, %v1454_v45  ;;  %v1831_v44 = vmul.f32 %v1564_v18, %v1453_v41  ;;  %v1133_v12 = vmul.f32 %v5196_v26, %v5895_v23  ;;  %v896_v39 = vpop.f32.mrf.mxu0  ;;  %v1458_v21 = vmul.f32 0.16666667, %v1404_v40 }
  0xeb   : > { %v1406_v36 = vmul.f32 %v1352_v13, %v1190_v33  ;;  %v1351_v45 = vmin.f32 %v1297_v30, 6.0  ;;  %v1300_v41 = vmax.f32 %v1246_v31, 0.0  ;;  %v1245_v22 = vadd.f32 3.0, %v1191_v15 }
  0xec   : > { %1887 = vst.msk [vmem:[#allocation2 + $0x8] sm:$0xff] %vm1885_vm2, %v1832_v42  ;;  %1886 = vst.msk [vmem:[#allocation2] sm:$0xff] %vm1885_vm2, %v1831_v44  ;;  %v1194_v28 = vadd.f32 %v5904_v27, %v1133_v12  ;;  %v1132_v38 = vmul.f32 %v5895_v23, %v896_v39  ;;  %v5199_v18 = vpop.f32.mrf.mxu0  ;;  %v1403_v13 = vmul.f32 %v1349_v29, %v5951_v25 }
  0xed   : > { %v1579_v37 = vpop.permute.xlu1 %1578  ;;  %v1574_v10 = vpop.permute.xlu0 %1573  ;;  %v1460_v42 = vmul.f32 0.16666667, %v1406_v36  ;;  %v1405_v44 = vmul.f32 %v1351_v45, %v1189_v16  ;;  %v1354_v26 = vmin.f32 %v1300_v41, 6.0  ;;  %v1299_v14 = vmax.f32 %v1245_v22, 0.0 }
  0xee   : > { %v1834_v17 = vmul.f32 %v1579_v37, %v1456_v20  ;;  %v1833_v58 = vmul.f32 %v1574_v10, %v1455_v19  ;;  %v1248_v11 = vadd.f32 3.0, %v1194_v28  ;;  %v1193_v40 = vadd.f32 %v5904_v27, %v1132_v38  ;;  %v906_v24 = vpop.f32.mrf.mxu0 }
  0xef   : > { %v1135_v33 = vmul.f32 %v5199_v18, %v5895_v23  ;;  %v1838_v20 = vmul.f32 %v5816_v49, %v1460_v42  ;;  %v1459_v30 = vmul.f32 0.16666667, %v1405_v44  ;;  %v1408_v31 = vmul.f32 %v1354_v26, %v1192_v61 }
  0xf0   : > { %1889 = vst.msk [vmem:[#allocation2 + $0x18] sm:$0xff] %vm1885_vm2, %v1834_v17  ;;  %1888 = vst.msk [vmem:[#allocation2 + $0x10] sm:$0xff] %vm1885_vm2, %v1833_v58  ;;  %v1353_v12 = vmin.f32 %v1299_v14, 6.0  ;;  %v1302_v39 = vmax.f32 %v1248_v11, 0.0  ;;  %v1247_v19 = vadd.f32 3.0, %v1193_v40  ;;  %v1134_v45 = vmul.f32 %v5895_v23, %v906_v24  ;;  %v5202_v41 = vpop.f32.mrf.mxu0 }
  0xf1   : > { %v1589_v16 = vpop.permute.xlu1 %1588  ;;  %v1196_v36 = vadd.f32 %v5904_v27, %v1135_v33  ;;  %1893 = vst.msk [vmem:[#allocation2 + $0x38] sm:$0xff] %vm1885_vm2, %v1838_v20  ;;  %v1837_v22 = vmul.f32 %v5812_v47, %v1459_v30  ;;  %v1462_v37 = vmul.f32 0.16666667, %v1408_v31  ;;  %v1584_v61 = vpop.permute.xlu0 %1583  ;;  %v1457_v42 = vmul.f32 0.16666667, %v1403_v13 }
  0xf2   : > { %v1407_v10 = vmul.f32 %v1353_v12, %v1191_v15  ;;  %v1836_v25 = vmul.f32 %v1589_v16, %v1458_v21  ;;  %v1356_v29 = vmin.f32 %v1302_v39, 6.0  ;;  %v1301_v49 = vmax.f32 %v1247_v19, 0.0  ;;  %v916_v17 = vpop.f32.mrf.mxu0 }
  0xf3   : > { %v1250_v38 = vadd.f32 3.0, %v1196_v36  ;;  %v1195_v14 = vadd.f32 %v5904_v27, %v1134_v45  ;;  %1892 = vst.msk [vmem:[#allocation2 + $0x30] sm:$0xff] %vm1885_vm2, %v1837_v22  ;;  %v1840_v58 = vmul.f32 %v5814_v48, %v1462_v37  ;;  %v1137_v47 = vmul.f32 %v5202_v41, %v5895_v23 }
  0xf4   : > { %v1461_v18 = vmul.f32 0.16666667, %v1407_v10  ;;  %1891 = vst.msk [vmem:[#allocation2 + $0x28] sm:$0xff] %vm1885_vm2, %v1836_v25  ;;  %v1410_v44 = vmul.f32 %v1356_v29, %v1194_v28  ;;  %v1355_v15 = vmin.f32 %v1301_v49, 6.0  ;;  %v5205_v11 = vpop.f32.mrf.mxu0  ;;  %v1835_v20 = vmul.f32 %v1584_v61, %v1457_v42 }
  0xf5   : > { %v1304_v21 = vmax.f32 %v1250_v38, 0.0  ;;  %v1249_v26 = vadd.f32 3.0, %v1195_v14  ;;  %1895 = vst.msk [vmem:[#allocation2 + $0x48] sm:$0xff] %vm1885_vm2, %v1840_v58  ;;  %v1198_v30 = vadd.f32 %v5904_v27, %v1137_v47  ;;  %v1136_v48 = vmul.f32 %v5895_v23, %v916_v17 }
  0xf6   : > { %v1839_v33 = vmul.f32 %v5810_v46, %v1461_v18  ;;  %v1464_v31 = vmul.f32 0.16666667, %v1410_v44  ;;  %v1409_v12 = vmul.f32 %v1355_v15, %v1193_v40  ;;  %v926_v16 = vpop.f32.mrf.mxu0  ;;  %1890 = vst.msk [vmem:[#allocation2 + $0x20] sm:$0xff] %vm1885_vm2, %v1835_v20  ;;  %v1139_v17 = vmul.f32 %v5205_v11, %v5895_v23 }
  0xf7   : > { %v1947_v24 = vld [vmem:[#allocation2 + $0x10] sm:$0xff]  ;;  %v1358_v39 = vmin.f32 %v1304_v21, 6.0  ;;  %v1303_v19 = vmax.f32 %v1249_v26, 0.0  ;;  %v1252_v46 = vadd.f32 3.0, %v1198_v30  ;;  %v1197_v45 = vadd.f32 %v5904_v27, %v1136_v48 }
  0xf8   : > { %v5999_v13 = vmul.f32 %v5930_v32, %v1947_v24  ;;  %v6002_v28 = vmul.f32 %v5932_v35, %v1947_v24  ;;  %1894 = vst.msk [vmem:[#allocation2 + $0x40] sm:$0xff] %vm1885_vm2, %v1839_v33  ;;  %v1842_v41 = vmul.f32 %v5818_v50, %v1464_v31  ;;  %v1463_v22 = vmul.f32 0.16666667, %v1409_v12  ;;  %v5208_v10 = vpop.f32.mrf.mxu0 }
  0xf9   : > { %v1412_v25 = vmul.f32 %v1358_v39, %v1196_v36  ;;  %v1357_v29 = vmin.f32 %v1303_v19, 6.0  ;;  %v1306_v49 = vmax.f32 %v1252_v46, 0.0  ;;  %v1251_v38 = vadd.f32 3.0, %v1197_v45 }
  0xfa   : > { %v2171_v40 = vrot.slane %v5999_v13, 1  ;;  %v2416_v37 = vrot.slane %v6002_v28, 2  ;;  %1897 = vst.msk [vmem:[#allocation2 + $0x58] sm:$0xff] %vm1885_vm2, %v1842_v41  ;;  %v1841_v61 = vmul.f32 %v5820_v51, %v1463_v22  ;;  %v1138_v58 = vmul.f32 %v5895_v23, %v926_v16  ;;  %v936_v18 = vpop.f32.mrf.mxu0 }
  0xfb   : > { %v1141_v50 = vmul.f32 %v5208_v10, %v5895_v23  ;;  %v1466_v42 = vmul.f32 0.16666667, %v1412_v25  ;;  %v1411_v47 = vmul.f32 %v1357_v29, %v1195_v14  ;;  %v1360_v44 = vmin.f32 %v1306_v49, 6.0 }
  0xfc   : > { %v1305_v15 = vmax.f32 %v1251_v38, 0.0  ;;  %1896 = vst.msk [vmem:[#allocation2 + $0x50] sm:$0xff] %vm1885_vm2, %v1841_v61  ;;  %v1200_v36 = vadd.f32 %v5904_v27, %v1139_v17  ;;  %v1199_v21 = vadd.f32 %v5904_v27, %v1138_v58  ;;  %v1140_v51 = vmul.f32 %v5895_v23, %v936_v18  ;;  %v5211_v11 = vpop.f32.mrf.mxu0 }
  0xfd   : > { %v1202_v26 = vadd.f32 %v5904_v27, %v1141_v50  ;;  %v1844_v33 = vmul.f32 %v5822_v52, %v1466_v42  ;;  %v1465_v24 = vmul.f32 0.16666667, %v1411_v47  ;;  %v1414_v20 = vmul.f32 %v1360_v44, %v1198_v30 }
  0xfe   : > { %v1359_v48 = vmin.f32 %v1305_v15, 6.0  ;;  %v1254_v31 = vadd.f32 3.0, %v1200_v36  ;;  %v1253_v14 = vadd.f32 3.0, %v1199_v21  ;;  %v1201_v16 = vadd.f32 %v5904_v27, %v1140_v51  ;;  %v946_v39 = vpop.f32.mrf.mxu0 }
  0xff   : > { %v1256_v12 = vadd.f32 3.0, %v1202_v26  ;;  %1899 = vst.msk [vmem:[#allocation2 + $0x68] sm:$0xff] %vm1885_vm2, %v1844_v33  ;;  %v1843_v19 = vmul.f32 %v5824_v53, %v1465_v24  ;;  %v1468_v46 = vmul.f32 0.16666667, %v1414_v20  ;;  %v1143_v22 = vmul.f32 %v5211_v11, %v5895_v23 }
 0x100   : > { %v1413_v41 = vmul.f32 %v1359_v48, %v1197_v45  ;;  %v1308_v10 = vmax.f32 %v1254_v31, 0.0  ;;  %v1307_v25 = vmax.f32 %v1253_v14, 0.0  ;;  %v1255_v29 = vadd.f32 3.0, %v1201_v16  ;;  %v5214_v30 = vpop.f32.mrf.mxu0 }
 0x101   : > { %v1310_v52 = vmax.f32 %v1256_v12, 0.0  ;;  %1898 = vst.msk [vmem:[#allocation2 + $0x60] sm:$0xff] %vm1885_vm2, %v1843_v19  ;;  %v1846_v49 = vmul.f32 %v5826_v54, %v1468_v46  ;;  %v1204_v61 = vadd.f32 %v5904_v27, %v1143_v22  ;;  %v1142_v17 = vmul.f32 %v5895_v23, %v946_v39 }
 0x102   : > { %v1467_v38 = vmul.f32 0.16666667, %v1413_v41  ;;  %v1362_v58 = vmin.f32 %v1308_v10, 6.0  ;;  %v1361_v53 = vmin.f32 %v1307_v25, 6.0  ;;  %v1309_v45 = vmax.f32 %v1255_v29, 0.0  ;;  %v956_v18 = vpop.f32.mrf.mxu0 }
 0x103   : > { %v1364_v50 = vmin.f32 %v1310_v52, 6.0  ;;  %1901 = vst.msk [vmem:[#allocation2 + $0x78] sm:$0xff] %vm1885_vm2, %v1846_v49  ;;  %v1258_v47 = vadd.f32 3.0, %v1204_v61  ;;  %v1203_v44 = vadd.f32 %v5904_v27, %v1142_v17  ;;  %v1145_v15 = vmul.f32 %v5214_v30, %v5895_v23 }
 0x104   : > { %v1845_v42 = vmul.f32 %v5828_v55, %v1467_v38  ;;  %v1416_v54 = vmul.f32 %v1362_v58, %v1200_v36  ;;  %v1415_v51 = vmul.f32 %v1361_v53, %v1199_v21  ;;  %v1363_v33 = vmin.f32 %v1309_v45, 6.0  ;;  %v5217_v24 = vpop.f32.mrf.mxu0 }
 0x105   : > { %v1418_v11 = vmul.f32 %v1364_v50, %v1202_v26  ;;  %v1312_v20 = vmax.f32 %v1258_v47, 0.0  ;;  %v1257_v48 = vadd.f32 3.0, %v1203_v44  ;;  %v1206_v31 = vadd.f32 %v5904_v27, %v1145_v15 }
 0x106   : > { %1900 = vst.msk [vmem:[#allocation2 + $0x70] sm:$0xff] %vm1885_vm2, %v1845_v42  ;;  %v1144_v14 = vmul.f32 %v5895_v23, %v956_v18  ;;  %v1470_v12 = vmul.f32 0.16666667, %v1416_v54  ;;  %v1469_v55 = vmul.f32 0.16666667, %v1415_v51  ;;  %v1417_v19 = vmul.f32 %v1363_v33, %v1201_v16  ;;  %v966_v46 = vpop.f32.mrf.mxu0 }
 0x107   : > { %v1472_v39 = vmul.f32 0.16666667, %v1418_v11  ;;  %v1366_v41 = vmin.f32 %v1312_v20, 6.0  ;;  %v1311_v22 = vmax.f32 %v1257_v48, 0.0  ;;  %v1260_v36 = vadd.f32 3.0, %v1206_v31 }
 0x108   : > { %v1205_v21 = vadd.f32 %v5904_v27, %v1144_v14  ;;  %v1848_v26 = vmul.f32 %v5830_v56, %v1470_v12  ;;  %v1847_v10 = vmul.f32 %v5832_v57, %v1469_v55  ;;  %v1471_v52 = vmul.f32 0.16666667, %v1417_v19  ;;  %v5220_v29 = vpop.f32.mrf.mxu0 }
 0x109   : > { %v1850_v25 = vmul.f32 %v5837_v59, %v1472_v39  ;;  %v1420_v30 = vmul.f32 %v1366_v41, %v1204_v61  ;;  %v1365_v49 = vmin.f32 %v1311_v22, 6.0  ;;  %v1314_v38 = vmax.f32 %v1260_v36, 0.0 }
 0x10a   : > { %v1259_v17 = vadd.f32 3.0, %v1205_v21  ;;  %1903 = vst.msk [vmem:[#allocation2 + $0x88] sm:$0xff] %vm1885_vm2, %v1848_v26  ;;  %1902 = vst.msk [vmem:[#allocation2 + $0x80] sm:$0xff] %vm1885_vm2, %v1847_v10  ;;  %v1849_v16 = vmul.f32 %v5839_v60, %v1471_v52  ;;  %v1147_v56 = vmul.f32 %v5217_v24, %v5895_v23  ;;  %v1146_v57 = vmul.f32 %v5895_v23, %v966_v46  ;;  %v976_v58 = vpop.f32.mrf.mxu0 }
 0x10b   : > { %1905 = vst.msk [vmem:[#allocation2 + $0x98] sm:$0xff] %vm1885_vm2, %v1850_v25  ;;  %v1149_v59 = vmul.f32 %v5220_v29, %v5895_v23  ;;  %v1474_v53 = vmul.f32 0.16666667, %v1420_v30  ;;  %v1419_v61 = vmul.f32 %v1365_v49, %v1203_v44  ;;  %v1368_v50 = vmin.f32 %v1314_v38, 6.0 }
 0x10c   : > { %v1313_v45 = vmax.f32 %v1259_v17, 0.0  ;;  %1904 = vst.msk [vmem:[#allocation2 + $0x90] sm:$0xff] %vm1885_vm2, %v1849_v16  ;;  %v1208_v18 = vadd.f32 %v5904_v27, %v1147_v56  ;;  %v1207_v42 = vadd.f32 %v5904_v27, %v1146_v57  ;;  %v1148_v60 = vmul.f32 %v5895_v23, %v976_v58  ;;  %v5223_v15 = vpop.f32.mrf.mxu0 }
 0x10d   : > { %v1210_v47 = vadd.f32 %v5904_v27, %v1149_v59  ;;  %v1852_v54 = vmul.f32 %v5844_v62, %v1474_v53  ;;  %v1473_v51 = vmul.f32 0.16666667, %v1419_v61  ;;  %v1422_v11 = vmul.f32 %v1368_v50, %v1206_v31 }
 0x10e   : > { %v1367_v33 = vmin.f32 %v1313_v45, 6.0  ;;  %v1262_v24 = vadd.f32 3.0, %v1208_v18  ;;  %v1261_v44 = vadd.f32 3.0, %v1207_v42  ;;  %v1209_v48 = vadd.f32 %v5904_v27, %v1148_v60  ;;  %v986_v14 = vpop.f32.mrf.mxu0 }
 0x10f   : > { %v1264_v20 = vadd.f32 3.0, %v1210_v47  ;;  %1907 = vst.msk [vmem:[#allocation2 + $0xa8] sm:$0xff] %vm1885_vm2, %v1852_v54  ;;  %v1851_v12 = vmul.f32 %v5846_v63, %v1473_v51  ;;  %v1476_v55 = vmul.f32 0.16666667, %v1422_v11  ;;  %v1151_v19 = vmul.f32 %v5223_v15, %v5895_v23 }
 0x110   : > { %v1421_v39 = vmul.f32 %v1367_v33, %v1205_v21  ;;  %v1316_v46 = vmax.f32 %v1262_v24, 0.0  ;;  %v1315_v41 = vmax.f32 %v1261_v44, 0.0  ;;  %v1263_v22 = vadd.f32 3.0, %v1209_v48  ;;  %v5226_v31 = vpop.f32.mrf.mxu0 }
 0x111   : > { %v1318_v62 = vmax.f32 %v1264_v20, 0.0  ;;  %1906 = vst.msk [vmem:[#allocation2 + $0xa0] sm:$0xff] %vm1885_vm2, %v1851_v12  ;;  %v1854_v36 = vmul.f32 %v5848_v0, %v1476_v55  ;;  %v1212_v10 = vadd.f32 %v5904_v27, %v1151_v19  ;;  %v1150_v25 = vmul.f32 %v5895_v23, %v986_v14 }
 0x112   : > { %v1475_v26 = vmul.f32 0.16666667, %v1421_v39  ;;  %v1370_v52 = vmin.f32 %v1316_v46, 6.0  ;;  %v1369_v63 = vmin.f32 %v1315_v41, 6.0  ;;  %v1317_v21 = vmax.f32 %v1263_v22, 0.0  ;;  %v996_v30 = vpop.f32.mrf.mxu0  ;;  %v1945_v46 = vld [vmem:[#allocation2] sm:$0xff] }
 0x113   : > { %v1372_v29 = vmin.f32 %v1318_v62, 6.0  ;;  %1909 = vst.msk [vmem:[#allocation2 + $0xb8] sm:$0xff] %vm1885_vm2, %v1854_v36  ;;  %v1266_v38 = vadd.f32 3.0, %v1212_v10  ;;  %v1211_v17 = vadd.f32 %v5904_v27, %v1150_v25  ;;  %v1153_v16 = vmul.f32 %v5226_v31, %v5895_v23  ;;  %v1946_v36 = vld [vmem:[#allocation2 + $0x8] sm:$0xff] }
 0x114   : > { %v1853_v49 = vmul.f32 %v5850_v1, %v1475_v26  ;;  %v1424_v0 = vmul.f32 %v1370_v52, %v1208_v18  ;;  %v1423_v56 = vmul.f32 %v1369_v63, %v1207_v42  ;;  %v1371_v59 = vmin.f32 %v1317_v21, 6.0  ;;  %v5229_v58 = vpop.f32.mrf.mxu0 }
 0x115   : > { %v1426_v57 = vmul.f32 %v1372_v29, %v1210_v47  ;;  %v1320_v53 = vmax.f32 %v1266_v38, 0.0  ;;  %v1265_v61 = vadd.f32 3.0, %v1211_v17  ;;  %v1214_v50 = vadd.f32 %v5904_v27, %v1153_v16 }
 0x116   : > { %1908 = vst.msk [vmem:[#allocation2 + $0xb0] sm:$0xff] %vm1885_vm2, %v1853_v49  ;;  %v1152_v45 = vmul.f32 %v5895_v23, %v996_v30  ;;  %v1478_v60 = vmul.f32 0.16666667, %v1424_v0  ;;  %v1477_v1 = vmul.f32 0.16666667, %v1423_v56  ;;  %v1425_v54 = vmul.f32 %v1371_v59, %v1209_v48  ;;  %v1006_v51 = vpop.f32.mrf.mxu0  ;;  %v6091_v59 = vld [vmem:[#allocation2 + $0x18] sm:$0xff] }
 0x117   : > { %v1480_v15 = vmul.f32 0.16666667, %v1426_v57  ;;  %v1374_v11 = vmin.f32 %v1320_v53, 6.0  ;;  %v1319_v33 = vmax.f32 %v1265_v61, 0.0  ;;  %v1268_v18 = vadd.f32 3.0, %v1214_v50 }
 0x118   : > { %v1213_v42 = vadd.f32 %v5904_v27, %v1152_v45  ;;  %v1856_v47 = vmul.f32 %v5852_v2, %v1478_v60  ;;  %v1855_v24 = vmul.f32 %v5854_v3, %v1477_v1  ;;  %v1479_v20 = vmul.f32 0.16666667, %v1425_v54  ;;  %v5232_v14 = vpop.f32.mrf.mxu0 }
 0x119   : > { %v1858_v44 = vmul.f32 %v5856_v4, %v1480_v15  ;;  %v1428_v12 = vmul.f32 %v1374_v11, %v1212_v10  ;;  %v1373_v55 = vmin.f32 %v1319_v33, 6.0  ;;  %v1322_v39 = vmax.f32 %v1268_v18, 0.0  ;;  %v6097_v11 = vld [vmem:[#allocation2 + $0x20] sm:$0xff] }
 0x11a   : > { %v1267_v19 = vadd.f32 3.0, %v1213_v42  ;;  %1911 = vst.msk [vmem:[#allocation2 + $0xc8] sm:$0xff] %vm1885_vm2, %v1856_v47  ;;  %1910 = vst.msk [vmem:[#allocation2 + $0xc0] sm:$0xff] %vm1885_vm2, %v1855_v24  ;;  %v1857_v2 = vmul.f32 %v5858_v5, %v1479_v20  ;;  %v1155_v3 = vmul.f32 %v5229_v58, %v5895_v23  ;;  %v1154_v4 = vmul.f32 %v5895_v23, %v1006_v51  ;;  %v6104_v47 = vld [vmem:[#allocation2 + $0x28] sm:$0xff] }
 0x11b   : > { %1913 = vst.msk [vmem:[#allocation2 + $0xd8] sm:$0xff] %vm1885_vm2, %v1858_v44  ;;  %v1157_v48 = vmul.f32 %v5232_v14, %v5895_v23  ;;  %v1482_v41 = vmul.f32 0.16666667, %v1428_v12  ;;  %v1427_v62 = vmul.f32 %v1373_v55, %v1211_v17  ;;  %v1376_v22 = vmin.f32 %v1322_v39, 6.0  ;;  %v8070_v39 = vld [vmem:[#allocation23_spill] sm:$0xff] }
 0x11c   : > { %v1321_v31 = vmax.f32 %v1267_v19, 0.0  ;;  %1912 = vst.msk [vmem:[#allocation2 + $0xd0] sm:$0xff] %vm1885_vm2, %v1857_v2  ;;  %v1216_v26 = vadd.f32 %v5904_v27, %v1155_v3  ;;  %v1215_v10 = vadd.f32 %v5904_v27, %v1154_v4  ;;  %v2003_v5 = vmul.f32 %v5934_v34, %v1945_v46 }
 0x11d   : > { %v1218_v25 = vadd.f32 %v5904_v27, %v1157_v48  ;;  %v1860_v52 = vmul.f32 %v5860_v6, %v1482_v41  ;;  %v1481_v63 = vmul.f32 0.16666667, %v1427_v62  ;;  %v1430_v29 = vmul.f32 %v1376_v22, %v1214_v50  ;;  %v6115_v48 = vld [vmem:[#allocation2 + $0x30] sm:$0xff] }
 0x11e   : > { %v1375_v21 = vmin.f32 %v1321_v31, 6.0  ;;  %v1270_v30 = vadd.f32 3.0, %v1216_v26  ;;  %v1269_v49 = vadd.f32 3.0, %v1215_v10  ;;  %v6086_v17 = vmul.f32 %v5934_v34, %v1946_v36  ;;  %v8071_v22 = vld [vmem:[#allocation3_spill] sm:$0xff] }
 0x11f   : > { %v1272_v38 = vadd.f32 3.0, %v1218_v25  ;;  %1915 = vst.msk [vmem:[#allocation2 + $0xe8] sm:$0xff] %vm1885_vm2, %v1860_v52  ;;  %v1859_v16 = vmul.f32 %v5862_v7, %v1481_v63  ;;  %v1484_v0 = vmul.f32 0.16666667, %v1430_v29  ;;  %v2071_v57 = vmul.f32 %v5930_v32, %v1945_v46  ;;  %v1016_v52 = vpop.f32.mrf.mxu0  ;;  %v6126_v63 = vld [vmem:[#allocation2 + $0x38] sm:$0xff]  ;;  %v6128_v29 = vld [vmem:[#allocation2 + $0x40] sm:$0xff] }
 0x120   : > { %v1429_v56 = vmul.f32 %v1375_v21, %v1213_v42  ;;  %v1324_v6 = vmax.f32 %v1270_v30, 0.0  ;;  %v1323_v58 = vmax.f32 %v1269_v49, 0.0  ;;  %v2072_v61 = vmul.f32 %v5930_v32, %v1946_v36 }
 0x121   : > { %v1326_v53 = vmax.f32 %v1272_v38, 0.0  ;;  %1914 = vst.msk [vmem:[#allocation2 + $0xe0] sm:$0xff] %vm1885_vm2, %v1859_v16  ;;  %v1862_v50 = vmul.f32 %v5864_v8, %v1484_v0  ;;  %v2168_v60 = vrot.slane %v2071_v57, 1  ;;  %v2316_v1 = vmul.f32 %v5932_v35, %v1945_v46  ;;  %v6140_v38 = vld [vmem:[%s8029_s5 + $0x8] ss:$0 sm:$0xff] }
 0x122   : > { %v1483_v45 = vmul.f32 0.16666667, %v1429_v56  ;;  %v1378_v7 = vmin.f32 %v1324_v6, 6.0  ;;  %v1377_v15 = vmin.f32 %v1323_v58, 6.0  ;;  %v2169_v51 = vrot.slane %v2072_v61, 1  ;;  %v8075_v56 = vld [vmem:[#allocation27_spill] sm:$0xff] }
 0x123   : > { %v1380_v54 = vmin.f32 %v1326_v53, 6.0  ;;  %1917 = vst.msk [vmem:[#allocation2 + $0xf8] sm:$0xff] %vm1885_vm2, %v1862_v50  ;;  %v2317_v18 = vmul.f32 %v5932_v35, %v1946_v36  ;;  %v2413_v42 = vrot.slane %v2316_v1, 2  ;;  %v2561_v8 = vmul.f32 %v5938_v43, %v6091_v59  ;;  %v8072_v36 = vld [vmem:[#allocation4_spill] sm:$0xff] }
 0x124   : > { %v1861_v33 = vmul.f32 %v5866_v9, %v1483_v45  ;;  %v1432_v24 = vmul.f32 %v1378_v7, %v1216_v26  ;;  %v1431_v44 = vmul.f32 %v1377_v15, %v1215_v10  ;;  %v2170_v14 = vsel %vm2167_vm3, %v2168_v60, %v2169_v51  ;;  %v8073_v10 = vld [vmem:[#allocation5_spill] sm:$0xff]  ;;  %v8076_v6 = vld [vmem:[#allocation28_spill] sm:$0xff] }
 0x125   : > { %v1434_v20 = vmul.f32 %v1380_v54, %v1218_v25  ;;  %v2172_v12 = vsel %vm2167_vm3, %v2169_v51, %v2171_v40  ;;  %v2280_v9 = vadd.f32 %v2170_v14, %v2003_v5  ;;  %v2414_v55 = vrot.slane %v2317_v18, 2  ;;  %v5235_v54 = vpop.f32.mrf.mxu0 }
 0x126   : > { %1916 = vst.msk [vmem:[#allocation2 + $0xf0] sm:$0xff] %vm1885_vm2, %v1861_v33  ;;  %v2629_v19 = vmul.f32 %v8070_v39, %v6091_v59  ;;  %v1486_v46 = vmul.f32 0.16666667, %v1432_v24  ;;  %v1485_v2 = vmul.f32 0.16666667, %v1431_v44  ;;  %v2630_v4 = vmul.f32 %v8070_v39, %v6097_v11 }
 0x127   : > { %v1488_v3 = vmul.f32 0.16666667, %v1434_v20  ;;  %v2415_v41 = vsel %vm2412_vm4, %v2413_v42, %v2414_v55  ;;  %v2417_v13 = vsel %vm2412_vm4, %v2414_v55, %v2416_v37  ;;  %v2631_v40 = vmul.f32 %v8070_v39, %v6104_v47  ;;  %v8074_v37 = vld [vmem:[#allocation24_spill] sm:$0xff] }
 0x128   : > { %v2725_v62 = vrot.slane %v2629_v19, 1  ;;  %v1864_v31 = vmul.f32 %v8071_v22, %v1486_v46  ;;  %v1863_v26 = vmul.f32 %v8072_v36, %v1485_v2  ;;  %v2525_v5 = vadd.f32 %v2415_v41, %v2280_v9  ;;  %v1026_v41 = vpop.f32.mrf.mxu0 }
 0x129   : > { %v1866_v25 = vmul.f32 %v8073_v10, %v1488_v3  ;;  %v2726_v21 = vrot.slane %v2630_v4, 1  ;;  %v2728_v28 = vrot.slane %v2631_v40, 1  ;;  %v2873_v30 = vmul.f32 %v8074_v37, %v6091_v59 }
 0x12a   : > { %v2874_v49 = vmul.f32 %v8074_v37, %v6097_v11  ;;  %1919 = vst.msk [vmem:[#allocation2 + $0x108] sm:$0xff] %vm1885_vm2, %v1864_v31  ;;  %1918 = vst.msk [vmem:[#allocation2 + $0x100] sm:$0xff] %vm1885_vm2, %v1863_v26  ;;  %v2593_v16 = vadd.f32 %v2561_v8, %v2525_v5  ;;  %v2875_v0 = vmul.f32 %v8074_v37, %v6104_v47 }
 0x12b   : > { %1921 = vst.msk [vmem:[#allocation2 + $0x118] sm:$0xff] %vm1885_vm2, %v1866_v25  ;;  %v3117_v57 = vmul.f32 %v8075_v56, %v6115_v48  ;;  %v3185_v58 = vmul.f32 %v8076_v6, %v6115_v48  ;;  %v2727_v53 = vsel %vm2167_vm3, %v2725_v62, %v2726_v21  ;;  %v2729_v61 = vsel %vm2167_vm3, %v2726_v21, %v2728_v28 }
 0x12c   : > { %v2969_v50 = vrot.slane %v2873_v30, 2  ;;  %v2970_v45 = vrot.slane %v2874_v49, 2  ;;  %v2837_v60 = vadd.f32 %v2727_v53, %v2593_v16  ;;  %v2972_v1 = vrot.slane %v2875_v0, 2  ;;  %v6188_v16 = vld [vmem:[%s8031_s7] ss:$0 sm:$0xff] }
 0x12d   : > { %v3186_v7 = vmul.f32 %v8076_v6, %v6126_v63  ;;  %v3187_v15 = vmul.f32 %v8076_v6, %v6128_v29  ;;  %v3281_v33 = vrot.slane %v3185_v58, 1  ;;  %v3429_v18 = vmul.f32 %v6140_v38, %v6115_v48 }
 0x12e   : > { %v2971_v51 = vsel %vm2412_vm4, %v2969_v50, %v2970_v45  ;;  %v3430_v42 = vmul.f32 %v6140_v38, %v6126_v63  ;;  %v2973_v8 = vsel %vm2412_vm4, %v2970_v45, %v2972_v1  ;;  %v3431_v14 = vmul.f32 %v6140_v38, %v6128_v29 }
 0x12f   : > { %v3081_v24 = vadd.f32 %v2971_v51, %v2837_v60  ;;  %v3282_v44 = vrot.slane %v3186_v7, 1  ;;  %v3284_v20 = vrot.slane %v3187_v15, 1  ;;  %v3525_v9 = vrot.slane %v3429_v18, 2 }
 0x130   : > { %v3526_v55 = vrot.slane %v3430_v42, 2  ;;  %v1156_v19 = vmul.f32 %v5895_v23, %v1016_v52  ;;  %v2281_v4 = vadd.f32 %v2172_v12, %v6086_v17  ;;  %v3528_v62 = vrot.slane %v3431_v14, 2  ;;  %v6177_v17 = vld [vmem:[%s8030_s6] ss:$0 sm:$0xff] }
 0x131   : > { %v3149_v46 = vadd.f32 %v3117_v57, %v3081_v24  ;;  %v3283_v2 = vsel %vm2167_vm3, %v3281_v33, %v3282_v44  ;;  %v3285_v3 = vsel %vm2167_vm3, %v3282_v44, %v3284_v20  ;;  %v2562_v31 = vmul.f32 %v5938_v43, %v6097_v11 }
 0x132   : > { %v3527_v40 = vsel %vm2412_vm4, %v3525_v9, %v3526_v55  ;;  %v1217_v22 = vadd.f32 %v5904_v27, %v1156_v19  ;;  %v2526_v26 = vadd.f32 %v2417_v13, %v2281_v4  ;;  %v3118_v10 = vmul.f32 %v8075_v56, %v6126_v63 }
 0x133   : > { %v3393_v36 = vadd.f32 %v3283_v2, %v3149_v46  ;;  %v1159_v25 = vmul.f32 %v5235_v54, %v5895_v23  ;;  %v3529_v5 = vsel %vm2412_vm4, %v3526_v55, %v3528_v62  ;;  %v1158_v52 = vmul.f32 %v5895_v23, %v1026_v41  ;;  %v8077_v62 = vld [vmem:[#allocation6_spill] sm:$0xff] }
 0x134   : > { %v1271_v12 = vadd.f32 3.0, %v1217_v22  ;;  %v2005_v21 = vmul.f32 %v5934_v34, %v6091_v59  ;;  %v2594_v13 = vadd.f32 %v2562_v31, %v2526_v26  ;;  %v2074_v49 = vmul.f32 %v5930_v32, %v6091_v59 }
 0x135   : > { %v3637_v28 = vadd.f32 %v3527_v40, %v3393_v36  ;;  %v1220_v30 = vadd.f32 %v5904_v27, %v1159_v25  ;;  %v1219_v57 = vadd.f32 %v5904_v27, %v1158_v52  ;;  %v6193_v23 = vmul.f32 %v5930_v32, %v6097_v11  ;;  %v6220_v52 = vld [vmem:[#allocation2 + $0x48] sm:$0xff] }
 0x136   : > { %v1325_v0 = vmax.f32 %v1271_v12, 0.0  ;;  %v2319_v58 = vmul.f32 %v5932_v35, %v6091_v59  ;;  %v2838_v50 = vadd.f32 %v2729_v61, %v2594_v13  ;;  %v2173_v60 = vrot.slane %v2074_v49, 1 }
 0x137   : > { %v3676_v53 = vmul.f32 %v6177_v17, %v3637_v28  ;;  %v1274_v45 = vadd.f32 3.0, %v1220_v30  ;;  %v1273_v7 = vadd.f32 3.0, %v1219_v57  ;;  %v2174_v15 = vrot.slane %v6193_v23, 1 }
 0x138   : > { %v1379_v1 = vmin.f32 %v1325_v0, 6.0  ;;  %v6201_v54 = vmul.f32 %v5932_v35, %v6097_v11  ;;  %v3082_v51 = vadd.f32 %v2973_v8, %v2838_v50  ;;  %v2418_v18 = vrot.slane %v2319_v58, 2  ;;  %v8079_v50 = vld [vmem:[#allocation8_spill] sm:$0xff] }
 0x139   : > { %v3715_v27 = vadd.f32 %v6188_v16, %v3676_v53  ;;  %v1328_v33 = vmax.f32 %v1274_v45, 0.0  ;;  %v1327_v59 = vmax.f32 %v1273_v7, 0.0  ;;  %v2175_v61 = vsel %vm2167_vm3, %v2173_v60, %v2174_v15  ;;  %v6228_v53 = vld [vmem:[#allocation2 + $0x50] sm:$0xff] }
 0x13a   : > { %v1433_v42 = vmul.f32 %v1379_v1, %v1217_v22  ;;  %v2419_v24 = vrot.slane %v6201_v54, 2  ;;  %v3150_v20 = vadd.f32 %v3118_v10, %v3082_v51  ;;  %v2282_v9 = vadd.f32 %v2175_v61, %v2005_v21  ;;  %v6281_v54 = vld [vmem:[%s8027_s3] ss:$0 sm:$0xff] }
 0x13b   : > { %v3747_v44 = vadd.f32 3.0, %v3715_v27  ;;  %v1382_v14 = vmin.f32 %v1328_v33, 6.0  ;;  %v1381_v19 = vmin.f32 %v1327_v59, 6.0  ;;  %v2563_v46 = vmul.f32 %v5938_v43, %v6115_v48 }
 0x13c   : > { %v1487_v55 = vmul.f32 0.16666667, %v1433_v42  ;;  %v2420_v8 = vsel %vm2412_vm4, %v2418_v18, %v2419_v24  ;;  %v3394_v4 = vadd.f32 %v3285_v3, %v3150_v20  ;;  %v2632_v36 = vmul.f32 %v8070_v39, %v6115_v48 }
 0x13d   : > { %v3779_v2 = vmax.f32 %v3747_v44, 0.0  ;;  %v1436_v41 = vmul.f32 %v1382_v14, %v1220_v30  ;;  %v2527_v40 = vadd.f32 %v2420_v8, %v2282_v9  ;;  %v1435_v31 = vmul.f32 %v1381_v19, %v1219_v57  ;;  %v8078_v57 = vld [vmem:[#allocation7_spill] sm:$0xff] }
 0x13e   : > { %v1865_v22 = vmul.f32 %v8077_v62, %v1487_v55  ;;  %v6218_v26 = vmul.f32 %v8070_v39, %v6126_v63  ;;  %v3638_v25 = vadd.f32 %v3529_v5, %v3394_v4  ;;  %v2730_v28 = vrot.slane %v2632_v36, 1  ;;  %v6256_v36 = vld [vmem:[#allocation2 + $0x58] sm:$0xff] }
 0x13f   : > { %v3811_v10 = vmin.f32 %v3779_v2, 6.0  ;;  %v1490_v12 = vmul.f32 0.16666667, %v1436_v41  ;;  %v2595_v21 = vadd.f32 %v2563_v46, %v2527_v40  ;;  %v1489_v3 = vmul.f32 0.16666667, %v1435_v31 }
 0x140   : > { %1920 = vst.msk [vmem:[#allocation2 + $0x110] sm:$0xff] %vm1885_vm2, %v1865_v22  ;;  %v2731_v13 = vrot.slane %v6218_v26, 1  ;;  %v2876_v30 = vmul.f32 %v8074_v37, %v6115_v48  ;;  %v3677_v0 = vmul.f32 %v6177_v17, %v3638_v25  ;;  %v2877_v5 = vmul.f32 %v8074_v37, %v6126_v63 }
 0x141   : > { %v3843_v49 = vmul.f32 %v3811_v10, %v3715_v27  ;;  %v1868_v58 = vmul.f32 %v8078_v57, %v1490_v12  ;;  %v1867_v45 = vmul.f32 %v8079_v50, %v1489_v3  ;;  %v3119_v7 = vmul.f32 %v8075_v56, %v6220_v52 }
 0x142   : > { %v2732_v60 = vsel %vm2167_vm3, %v2730_v28, %v2731_v13  ;;  %v2974_v1 = vrot.slane %v2876_v30, 2  ;;  %v3716_v27 = vadd.f32 %v6188_v16, %v3677_v0  ;;  %v2975_v18 = vrot.slane %v2877_v5, 2 }
 0x143   : > { %v3875_v51 = vmul.f32 0.16666667, %v3843_v49  ;;  %1923 = vst.msk [vmem:[#allocation2 + $0x128] sm:$0xff] %vm1885_vm2, %v1868_v58  ;;  %v2839_v33 = vadd.f32 %v2732_v60, %v2595_v21  ;;  %1922 = vst.msk [vmem:[#allocation2 + $0x120] sm:$0xff] %vm1885_vm2, %v1867_v45  ;;  %v3188_v42 = vmul.f32 %v8076_v6, %v6220_v52  ;;  %v3189_v59 = vmul.f32 %v8076_v6, %v6228_v53  ;;  %v5238_v49 = vpop.f32.mrf.mxu0 }
 0x144   : > { %v3432_v61 = vmul.f32 %v6140_v38, %v6220_v52  ;;  %v3433_v44 = vmul.f32 %v6140_v38, %v6228_v53  ;;  %v3748_v20 = vadd.f32 3.0, %v3716_v27  ;;  %v2976_v14 = vsel %vm2412_vm4, %v2974_v1, %v2975_v18 }
 0x145   : > { %5264 = vmatprep.mubr.msk.f32.mxu0 %vm1885_vm2, %v3875_v51  ;;  %v2006_v9 = vmul.f32 %v5934_v34, %v6097_v11  ;;  %v2076_v55 = vmul.f32 %v5930_v32, %v6104_v47  ;;  %v3083_v19 = vadd.f32 %v2976_v14, %v2839_v33  ;;  %v3286_v8 = vrot.slane %v3188_v42, 1 }
 0x146   : > { %v3287_v46 = vrot.slane %v3189_v59, 1  ;;  %v3530_v2 = vrot.slane %v3432_v61, 2  ;;  %v3780_v4 = vmax.f32 %v3748_v20, 0.0  ;;  %v3531_v41 = vrot.slane %v3433_v44, 2  ;;  %v6293_v61 = vld [vmem:[%s8028_s4] ss:$0 sm:$0xff] }
 0x147   : > { %v2176_v40 = vrot.slane %v2076_v55, 1  ;;  %v2321_v62 = vmul.f32 %v5932_v35, %v6104_v47  ;;  %v3151_v22 = vadd.f32 %v3119_v7, %v3083_v19  ;;  %v2564_v11 = vmul.f32 %v5938_v43, %v6126_v63 }
 0x148   : > { %v3288_v31 = vsel %vm2167_vm3, %v3286_v8, %v3287_v46  ;;  %v2634_v26 = vmul.f32 %v8070_v39, %v6128_v29  ;;  %v3812_v10 = vmin.f32 %v3780_v4, 6.0  ;;  %v3532_v25 = vsel %vm2412_vm4, %v3530_v2, %v3531_v41 }
 0x149   : > { %v2177_v12 = vsel %vm2167_vm3, %v2174_v15, %v2176_v40  ;;  %v2421_v21 = vrot.slane %v2321_v62, 2  ;;  %v3395_v47 = vadd.f32 %v3288_v31, %v3151_v22  ;;  %v2878_v30 = vmul.f32 %v8074_v37, %v6128_v29 }
 0x14a   : > { %v2283_v3 = vadd.f32 %v2177_v12, %v2006_v9  ;;  %v2733_v28 = vrot.slane %v2634_v26, 1  ;;  %v3844_v0 = vmul.f32 %v3812_v10, %v3716_v27  ;;  %v3120_v58 = vmul.f32 %v8075_v56, %v6228_v53 }
 0x14b   : > { %v2422_v57 = vsel %vm2412_vm4, %v2419_v24, %v2421_v21  ;;  %v3190_v23 = vmul.f32 %v8076_v6, %v6256_v36  ;;  %v3639_v15 = vadd.f32 %v3532_v25, %v3395_v47  ;;  %v2977_v45 = vrot.slane %v2878_v30, 2  ;;  %v6316_v25 = vld [vmem:[#allocation2 + $0x60] sm:$0xff] }
 0x14c   : > { %v2528_v5 = vadd.f32 %v2422_v57, %v2283_v3  ;;  %v2734_v50 = vsel %vm2167_vm3, %v2731_v13, %v2733_v28  ;;  %v3876_v60 = vmul.f32 0.16666667, %v3844_v0  ;;  %v3434_v7 = vmul.f32 %v6140_v38, %v6256_v36 }
 0x14d   : > { %v3289_v1 = vrot.slane %v3190_v23, 1  ;;  %v1161_v24 = vmul.f32 %v6281_v54, %v5238_v49  ;;  %v3678_v51 = vmul.f32 %v6177_v17, %v3639_v15  ;;  %v2978_v33 = vsel %vm2412_vm4, %v2975_v18, %v2977_v45  ;;  %v6331_v15 = vld [vmem:[#allocation2 + $0x68] sm:$0xff] }
 0x14e   : > { %v2596_v27 = vadd.f32 %v2564_v11, %v2528_v5  ;;  %v2007_v13 = vmul.f32 %v5934_v34, %v6115_v48  ;;  %5265 = vmatmul.mubr.msk.f32.vlgmr.msra.gmra.mxu0 %vm1885_vm2, %v3876_v60  ;;  %v3533_v59 = vrot.slane %v3434_v7, 2  ;;  %v2077_v20 = vmul.f32 %v5930_v32, %v6115_v48 }
 0x14f   : > { %v3290_v42 = vsel %vm2167_vm3, %v3287_v46, %v3289_v1  ;;  %v1222_v44 = vadd.f32 %v6293_v61, %v1161_v24  ;;  %v3717_v18 = vadd.f32 %v6188_v16, %v3678_v51  ;;  %v6301_v9 = vmul.f32 %v5930_v32, %v6126_v63 }
 0x150   : > { %v2840_v14 = vadd.f32 %v2734_v50, %v2596_v27  ;;  %v2322_v55 = vmul.f32 %v5932_v35, %v6115_v48  ;;  %v3534_v19 = vsel %vm2412_vm4, %v3531_v41, %v3533_v59  ;;  %v2178_v46 = vrot.slane %v2077_v20, 1 }
 0x151   : > { %v1276_v8 = vadd.f32 3.0, %v1222_v44  ;;  %v6308_v2 = vmul.f32 %v5932_v35, %v6126_v63  ;;  %v3749_v4 = vadd.f32 3.0, %v3717_v18  ;;  %v2179_v62 = vrot.slane %v6301_v9, 1 }
 0x152   : > { %v3084_v40 = vadd.f32 %v2978_v33, %v2840_v14  ;;  %v2423_v22 = vrot.slane %v2322_v55, 2  ;;  %v2565_v26 = vmul.f32 %v5938_v43, %v6220_v52  ;;  %v2635_v48 = vmul.f32 %v8070_v39, %v6220_v52  ;;  %v8080_v14 = vld [vmem:[#allocation9_spill] sm:$0xff] }
 0x153   : > { %v1330_v31 = vmax.f32 %v1276_v8, 0.0  ;;  %v2424_v11 = vrot.slane %v6308_v2, 2  ;;  %v3781_v41 = vmax.f32 %v3749_v4, 0.0  ;;  %v2180_v12 = vsel %vm2167_vm3, %v2178_v46, %v2179_v62 }
 0x154   : > { %v3152_v10 = vadd.f32 %v3120_v58, %v3084_v40  ;;  %v6323_v21 = vmul.f32 %v8070_v39, %v6228_v53  ;;  %v2284_v3 = vadd.f32 %v2180_v12, %v2007_v13  ;;  %v2735_v30 = vrot.slane %v2635_v48, 1 }
 0x155   : > { %v1384_v47 = vmin.f32 %v1330_v31, 6.0  ;;  %v2425_v28 = vsel %vm2412_vm4, %v2423_v22, %v2424_v11  ;;  %v3813_v49 = vmin.f32 %v3781_v41, 6.0  ;;  %v2879_v58 = vmul.f32 %v8074_v37, %v6220_v52 }
 0x156   : > { %v3396_v0 = vadd.f32 %v3290_v42, %v3152_v10  ;;  %v2736_v57 = vrot.slane %v6323_v21, 1  ;;  %v2529_v5 = vadd.f32 %v2425_v28, %v2284_v3  ;;  %v6335_v50 = vmul.f32 %v8074_v37, %v6228_v53 }
 0x157   : > { %v1438_v23 = vmul.f32 %v1384_v47, %v1222_v44  ;;  %v3121_v45 = vmul.f32 %v8075_v56, %v6316_v25  ;;  %v3845_v60 = vmul.f32 %v3813_v49, %v3717_v18  ;;  %v2979_v24 = vrot.slane %v2879_v58, 2  ;;  %v1036_v18 = vpop.f32.mrf.mxu0 }
 0x158   : > { %v3640_v1 = vadd.f32 %v3534_v19, %v3396_v0  ;;  %v2737_v7 = vsel %vm2167_vm3, %v2735_v30, %v2736_v57  ;;  %v2597_v27 = vadd.f32 %v2565_v26, %v2529_v5  ;;  %v2980_v33 = vrot.slane %v6335_v50, 2 }
 0x159   : > { %v1492_v51 = vmul.f32 0.16666667, %v1438_v23  ;;  %v3191_v13 = vmul.f32 %v8076_v6, %v6316_v25  ;;  %v3877_v42 = vmul.f32 0.16666667, %v3845_v60  ;;  %v6348_v44 = vmul.f32 %v8076_v6, %v6331_v15  ;;  %v5241_v60 = vpop.f32.mrf.mxu0 }
 0x15a   : > { %v3679_v59 = vmul.f32 %v6177_v17, %v3640_v1  ;;  %v3435_v20 = vmul.f32 %v6140_v38, %v6316_v25  ;;  %v2841_v19 = vadd.f32 %v2737_v7, %v2597_v27  ;;  %v2981_v8 = vsel %vm2412_vm4, %v2979_v24, %v2980_v33  ;;  %v6374_v24 = vld [vmem:[#allocation2 + $0x70] sm:$0xff] }
 0x15b   : > { %v1870_v55 = vmul.f32 %v8080_v14, %v1492_v51  ;;  %v3291_v46 = vrot.slane %v3191_v13, 1  ;;  %5267 = vmatprep.mubr.msk.f32.mxu0 %vm1885_vm2, %v3877_v42  ;;  %v3292_v40 = vrot.slane %v6348_v44, 1  ;;  %v3436_v22 = vmul.f32 %v6140_v38, %v6331_v15 }
 0x15c   : > { %v3718_v4 = vadd.f32 %v6188_v16, %v3679_v59  ;;  %v3535_v31 = vrot.slane %v3435_v20, 2  ;;  %v3085_v26 = vadd.f32 %v2981_v8, %v2841_v19  ;;  %v1160_v48 = vmul.f32 %v6281_v54, %v1036_v18  ;;  %v1046_v19 = vpop.f32.mrf.mxu0 }
 0x15d   : > { %1925 = vst.msk [vmem:[#allocation2 + $0x138] sm:$0xff] %vm1885_vm2, %v1870_v55  ;;  %v2008_v41 = vmul.f32 %v5934_v34, %v6126_v63  ;;  %v2079_v10 = vmul.f32 %v5930_v32, %v6128_v29  ;;  %v3293_v47 = vsel %vm2167_vm3, %v3291_v46, %v3292_v40  ;;  %v3536_v3 = vrot.slane %v3436_v22, 2 }
 0x15e   : > { %v3750_v12 = vadd.f32 3.0, %v3718_v4  ;;  %v2324_v28 = vmul.f32 %v5932_v35, %v6128_v29  ;;  %v3153_v30 = vadd.f32 %v3121_v45, %v3085_v26  ;;  %v1221_v49 = vadd.f32 %v6293_v61, %v1160_v48 }
 0x15f   : > { %v2181_v0 = vrot.slane %v2079_v10, 1  ;;  %v2566_v58 = vmul.f32 %v5938_v43, %v6228_v53  ;;  %v3537_v63 = vsel %vm2412_vm4, %v3535_v31, %v3536_v3  ;;  %v2637_v50 = vmul.f32 %v8070_v39, %v6256_v36 }
 0x160   : > { %v3782_v23 = vmax.f32 %v3750_v12, 0.0  ;;  %v2426_v5 = vrot.slane %v2324_v28, 2  ;;  %v3397_v1 = vadd.f32 %v3293_v47, %v3153_v30  ;;  %v1275_v7 = vadd.f32 3.0, %v1221_v49 }
 0x161   : > { %v2182_v29 = vsel %vm2167_vm3, %v2179_v62, %v2181_v0  ;;  %v2881_v45 = vmul.f32 %v8074_v37, %v6256_v36  ;;  %v2738_v42 = vrot.slane %v2637_v50, 1  ;;  %v3122_v18 = vmul.f32 %v8075_v56, %v6331_v15  ;;  %v8081_v50 = vld [vmem:[#allocation10_spill] sm:$0xff] }
 0x162   : > { %v3814_v51 = vmin.f32 %v3782_v23, 6.0  ;;  %v2285_v27 = vadd.f32 %v2182_v29, %v2008_v41  ;;  %v2427_v13 = vsel %vm2412_vm4, %v2424_v11, %v2426_v5  ;;  %v3641_v59 = vadd.f32 %v3537_v63, %v3397_v1 }
 0x163   : > { %v1329_v44 = vmax.f32 %v1275_v7, 0.0  ;;  %v2982_v20 = vrot.slane %v2881_v45, 2  ;;  %v2739_v62 = vsel %vm2167_vm3, %v2736_v57, %v2738_v42  ;;  %v3193_v55 = vmul.f32 %v8076_v6, %v6374_v24 }
 0x164   : > { %v3846_v14 = vmul.f32 %v3814_v51, %v3718_v4  ;;  %v2530_v9 = vadd.f32 %v2427_v13, %v2285_v27  ;;  %v3680_v2 = vmul.f32 %v6177_v17, %v3641_v59  ;;  %v3437_v46 = vmul.f32 %v6140_v38, %v6374_v24 }
 0x165   : > { %v1383_v11 = vmin.f32 %v1329_v44, 6.0  ;;  %v2983_v8 = vsel %vm2412_vm4, %v2980_v33, %v2982_v20  ;;  %v3294_v4 = vrot.slane %v3193_v55, 1  ;;  %v1163_v26 = vmul.f32 %v6281_v54, %v5241_v60  ;;  %v6423_v44 = vld [vmem:[%s8036_s12] sm:$0xf] }
 0x166   : > { %v3878_v22 = vmul.f32 0.16666667, %v3846_v14  ;;  %v2598_v31 = vadd.f32 %v2566_v58, %v2530_v9  ;;  %v3719_v21 = vadd.f32 %v6188_v16, %v3680_v2  ;;  %v3538_v48 = vrot.slane %v3437_v46, 2  ;;  %5312 = vmatprep.subr.msk.mxu1 %vm776_vm0, %v6423_v44 }
 0x167   : > { %v1437_v57 = vmul.f32 %v1383_v11, %v1221_v49  ;;  %v1162_v41 = vmul.f32 %v6281_v54, %v1046_v19  ;;  %v3295_v12 = vsel %vm2167_vm3, %v3292_v40, %v3294_v4  ;;  %v1224_v33 = vadd.f32 %v6293_v61, %v1163_v26  ;;  %v6439_v4 = vld [vmem:[#allocation2 + $0x78] sm:$0xff] }
 0x168   : > { %5268 = vmatmul.mubr.msk.f32.gmra.mxu0 %vm1885_vm2, %v3878_v22  ;;  %v2842_v10 = vadd.f32 %v2739_v62, %v2598_v31  ;;  %v2009_v47 = vmul.f32 %v5934_v34, %v6220_v52  ;;  %v3751_v28 = vadd.f32 3.0, %v3719_v21  ;;  %v3539_v0 = vsel %vm2412_vm4, %v3536_v3, %v3538_v48 }
 0x169   : > { %v1491_v30 = vmul.f32 0.16666667, %v1437_v57  ;;  %v1223_v58 = vadd.f32 %v6293_v61, %v1162_v41  ;;  %v1278_v23 = vadd.f32 3.0, %v1224_v33  ;;  %v2080_v63 = vmul.f32 %v5930_v32, %v6220_v52 }
 0x16a   : > { %v3086_v49 = vadd.f32 %v2983_v8, %v2842_v10  ;;  %v6409_v5 = vmul.f32 %v5930_v32, %v6228_v53  ;;  %v3783_v40 = vmax.f32 %v3751_v28, 0.0  ;;  %v2325_v7 = vmul.f32 %v5932_v35, %v6220_v52 }
 0x16b   : > { %v1869_v60 = vmul.f32 %v8081_v50, %v1491_v30  ;;  %v1277_v1 = vadd.f32 3.0, %v1223_v58  ;;  %v1332_v3 = vmax.f32 %v1278_v23, 0.0  ;;  %v2183_v45 = vrot.slane %v2080_v63, 1  ;;  %v8083_v50 = vld [vmem:[#allocation12_spill] sm:$0xff] }
 0x16c   : > { %v3154_v29 = vadd.f32 %v3122_v18, %v3086_v49  ;;  %v2184_v51 = vrot.slane %v6409_v5, 1  ;;  %v3815_v27 = vmin.f32 %v3783_v40, 6.0  ;;  %v6418_v42 = vmul.f32 %v5932_v35, %v6228_v53  ;;  %v5244_v40 = vpop.f32.mrf.mxu0 }
 0x16d   : > { %1924 = vst.msk [vmem:[#allocation2 + $0x130] sm:$0xff] %vm1885_vm2, %v1869_v60  ;;  %v1331_v13 = vmax.f32 %v1277_v1, 0.0  ;;  %v2428_v59 = vrot.slane %v2325_v7, 2  ;;  %v1386_v20 = vmin.f32 %v1332_v3, 6.0  ;;  %v2567_v14 = vmul.f32 %v5938_v43, %v6316_v25 }
 0x16e   : > { %v3398_v52 = vadd.f32 %v3295_v12, %v3154_v29  ;;  %v2185_v18 = vsel %vm2167_vm3, %v2183_v45, %v2184_v51  ;;  %v3847_v9 = vmul.f32 %v3815_v27, %v3719_v21  ;;  %v2429_v19 = vrot.slane %v6418_v42, 2 }
 0x16f   : > { %v1385_v62 = vmin.f32 %v1331_v13, 6.0  ;;  %v2286_v55 = vadd.f32 %v2185_v18, %v2009_v47  ;;  %v1440_v11 = vmul.f32 %v1386_v20, %v1224_v33  ;;  %v2638_v8 = vmul.f32 %v8070_v39, %v6316_v25  ;;  %v6448_v33 = vld [vmem:[#allocation2 + $0x80] sm:$0xff] }
 0x170   : > { %v3642_v2 = vadd.f32 %v3539_v0, %v3398_v52  ;;  %v6437_v46 = vmul.f32 %v8070_v39, %v6331_v15  ;;  %v3879_v22 = vmul.f32 0.16666667, %v3847_v9  ;;  %v2430_v26 = vsel %vm2412_vm4, %v2428_v59, %v2429_v19 }
 0x171   : > { %v1439_v31 = vmul.f32 %v1385_v62, %v1223_v58  ;;  %v2882_v21 = vmul.f32 %v8074_v37, %v6316_v25  ;;  %v1494_v48 = vmul.f32 0.16666667, %v1440_v11  ;;  %v2531_v41 = vadd.f32 %v2430_v26, %v2286_v55  ;;  %v8082_v58 = vld [vmem:[#allocation11_spill] sm:$0xff] }
 0x172   : > { %v3681_v57 = vmul.f32 %v6177_v17, %v3642_v2  ;;  %v2740_v10 = vrot.slane %v2638_v8, 1  ;;  %5270 = vmatprep.mubr.msk.f32.mxu1 %vm1885_vm2, %v3879_v22  ;;  %v2741_v47 = vrot.slane %v6437_v46, 1  ;;  %v6453_v28 = vmul.f32 %v8074_v37, %v6331_v15 }
 0x173   : > { %v1493_v12 = vmul.f32 0.16666667, %v1439_v31  ;;  %v2984_v30 = vrot.slane %v2882_v21, 2  ;;  %v1872_v49 = vmul.f32 %v8082_v58, %v1494_v48  ;;  %v2599_v23 = vadd.f32 %v2567_v14, %v2531_v41 }
 0x174   : > { %v3720_v0 = vadd.f32 %v6188_v16, %v3681_v57  ;;  %v3123_v63 = vmul.f32 %v8075_v56, %v6439_v4  ;;  %v2742_v1 = vsel %vm2167_vm3, %v2740_v10, %v2741_v47  ;;  %v2985_v7 = vrot.slane %v6453_v28, 2 }
 0x175   : > { %v1871_v60 = vmul.f32 %v8083_v50, %v1493_v12  ;;  %v3194_v29 = vmul.f32 %v8076_v6, %v6439_v4  ;;  %1927 = vst.msk [vmem:[#allocation2 + $0x148] sm:$0xff] %vm1885_vm2, %v1872_v49  ;;  %v2843_v45 = vadd.f32 %v2742_v1, %v2599_v23  ;;  %v3195_v27 = vmul.f32 %v8076_v6, %v6448_v33  ;;  %v1056_v23 = vpop.f32.mrf.mxu0 }
 0x176   : > { %v3752_v3 = vadd.f32 3.0, %v3720_v0  ;;  %v3438_v13 = vmul.f32 %v6140_v38, %v6439_v4  ;;  %v2986_v59 = vsel %vm2412_vm4, %v2984_v30, %v2985_v7  ;;  %v3439_v20 = vmul.f32 %v6140_v38, %v6448_v33 }
 0x177   : > { %1926 = vst.msk [vmem:[#allocation2 + $0x140] sm:$0xff] %vm1885_vm2, %v1871_v60  ;;  %v3296_v52 = vrot.slane %v3194_v29, 1  ;;  %v1165_v18 = vmul.f32 %v6281_v54, %v5244_v40  ;;  %v3087_v9 = vadd.f32 %v2986_v59, %v2843_v45  ;;  %v3297_v62 = vrot.slane %v3195_v27, 1 }
 0x178   : > { %v3784_v14 = vmax.f32 %v3752_v3, 0.0  ;;  %v3540_v55 = vrot.slane %v3438_v13, 2  ;;  %v3541_v2 = vrot.slane %v3439_v20, 2  ;;  %v2010_v8 = vmul.f32 %v5934_v34, %v6228_v53  ;;  %v6487_v53 = vld [vmem:[#allocation2 + $0x88] sm:$0xff]  ;;  %v5247_v20 = vpop.f32.mrf.mxu0 }
 0x179   : > { %v1226_v11 = vadd.f32 %v6293_v61, %v1165_v18  ;;  %v2082_v22 = vmul.f32 %v5930_v32, %v6256_v36  ;;  %v3155_v26 = vadd.f32 %v3123_v63, %v3087_v9  ;;  %v3298_v21 = vsel %vm2167_vm3, %v3296_v52, %v3297_v62 }
 0x17a   : > { %v3816_v31 = vmin.f32 %v3784_v14, 6.0  ;;  %v2327_v57 = vmul.f32 %v5932_v35, %v6256_v36  ;;  %v3542_v48 = vsel %vm2412_vm4, %v3540_v55, %v3541_v2  ;;  %v2568_v12 = vmul.f32 %v5938_v43, %v6331_v15 }
 0x17b   : > { %v1280_v41 = vadd.f32 3.0, %v1226_v11  ;;  %v2186_v10 = vrot.slane %v2082_v22, 1  ;;  %v3399_v30 = vadd.f32 %v3298_v21, %v3155_v26  ;;  %v2640_v49 = vmul.f32 %v8070_v39, %v6374_v24 }
 0x17c   : > { %v3848_v28 = vmul.f32 %v3816_v31, %v3720_v0  ;;  %v2431_v58 = vrot.slane %v2327_v57, 2  ;;  %v2884_v40 = vmul.f32 %v8074_v37, %v6374_v24  ;;  %v3124_v50 = vmul.f32 %v8075_v56, %v6448_v33 }
 0x17d   : > { %v1334_v63 = vmax.f32 %v1280_v41, 0.0  ;;  %v2187_v36 = vsel %vm2167_vm3, %v2184_v51, %v2186_v10  ;;  %v3643_v60 = vadd.f32 %v3542_v48, %v3399_v30  ;;  %v2743_v45 = vrot.slane %v2640_v49, 1 }
 0x17e   : > { %v3880_v0 = vmul.f32 0.16666667, %v3848_v28  ;;  %v2287_v1 = vadd.f32 %v2187_v36, %v2010_v8  ;;  %v2432_v29 = vsel %vm2412_vm4, %v2429_v19, %v2431_v58  ;;  %v2987_v27 = vrot.slane %v2884_v40, 2 }
 0x17f   : > { %v1388_v3 = vmin.f32 %v1334_v63, 6.0  ;;  %v3196_v5 = vmul.f32 %v8076_v6, %v6487_v53  ;;  %v3682_v51 = vmul.f32 %v6177_v17, %v3643_v60  ;;  %v3440_v59 = vmul.f32 %v6140_v38, %v6487_v53 }
 0x180   : > { %5271 = vmatmul.mubr.msk.f32.vlgmr.msra.gmra.mxu1 %vm1885_vm2, %v3880_v0  ;;  %v2532_v13 = vadd.f32 %v2432_v29, %v2287_v1  ;;  %v1164_v52 = vmul.f32 %v6281_v54, %v1056_v23  ;;  %v2744_v19 = vsel %vm2167_vm3, %v2741_v47, %v2743_v45  ;;  %v2988_v18 = vsel %vm2412_vm4, %v2985_v7, %v2987_v27 }
 0x181   : > { %v1442_v42 = vmul.f32 %v1388_v3, %v1226_v11  ;;  %v3299_v14 = vrot.slane %v3196_v5, 1  ;;  %5313 = vmatpush3.msk.msra.mxu1 %vm776_vm0, %v6423_v44  ;;  %v3721_v9 = vadd.f32 %v6188_v16, %v3682_v51  ;;  %v3543_v8 = vrot.slane %v3440_v59, 2  ;;  %v8084_v44 = vld [vmem:[#allocation13_spill] sm:$0xff] }
 0x182   : > { %v2600_v55 = vadd.f32 %v2568_v12, %v2532_v13  ;;  %v1225_v22 = vadd.f32 %v6293_v61, %v1164_v52  ;;  %v1167_v11 = vmul.f32 %v6281_v54, %v5247_v20  ;;  %v2011_v46 = vmul.f32 %v5934_v34, %v6316_v25 }
 0x183   : > { %v1496_v31 = vmul.f32 0.16666667, %v1442_v42  ;;  %v3300_v26 = vsel %vm2167_vm3, %v3297_v62, %v3299_v14  ;;  %v3753_v47 = vadd.f32 3.0, %v3721_v9  ;;  %v3544_v21 = vsel %vm2412_vm4, %v3541_v2, %v3543_v8 }
 0x184   : > { %v2844_v7 = vadd.f32 %v2744_v19, %v2600_v55  ;;  %v1279_v57 = vadd.f32 3.0, %v1225_v22  ;;  %v1228_v41 = vadd.f32 %v6293_v61, %v1167_v11  ;;  %v2083_v10 = vmul.f32 %v5930_v32, %v6316_v25 }
 0x185   : > { %v1874_v48 = vmul.f32 %v8084_v44, %v1496_v31  ;;  %v6527_v62 = vmul.f32 %v5930_v32, %v6331_v15  ;;  %v3785_v12 = vmax.f32 %v3753_v47, 0.0  ;;  %v2328_v58 = vmul.f32 %v5932_v35, %v6316_v25 }
 0x186   : > { %v3088_v28 = vadd.f32 %v2988_v18, %v2844_v7  ;;  %v1333_v30 = vmax.f32 %v1279_v57, 0.0  ;;  %v1282_v2 = vadd.f32 3.0, %v1228_v41  ;;  %v2188_v49 = vrot.slane %v2083_v10, 1  ;;  %v6552_v18 = vld [vmem:[#allocation2 + $0x90] sm:$0xff] }
 0x187   : > { %1929 = vst.msk [vmem:[#allocation2 + $0x158] sm:$0xff] %vm1885_vm2, %v1874_v48  ;;  %v2189_v23 = vrot.slane %v6527_v62, 1  ;;  %v6535_v63 = vmul.f32 %v5932_v35, %v6331_v15  ;;  %v3817_v36 = vmin.f32 %v3785_v12, 6.0  ;;  %v2433_v60 = vrot.slane %v2328_v58, 2  ;;  %v8086_v58 = vld [vmem:[#allocation15_spill] sm:$0xff] }
 0x188   : > { %v3156_v40 = vadd.f32 %v3124_v50, %v3088_v28  ;;  %v1387_v0 = vmin.f32 %v1333_v30, 6.0  ;;  %v1336_v1 = vmax.f32 %v1282_v2, 0.0  ;;  %v2569_v3 = vmul.f32 %v5938_v43, %v6439_v4 }
 0x189   : > { %v2190_v29 = vsel %vm2167_vm3, %v2188_v49, %v2189_v23  ;;  %v2434_v25 = vrot.slane %v6535_v63, 2  ;;  %v3849_v45 = vmul.f32 %v3817_v36, %v3721_v9  ;;  %v2641_v59 = vmul.f32 %v8070_v39, %v6439_v4 }
 0x18a   : > { %v3400_v27 = vadd.f32 %v3300_v26, %v3156_v40  ;;  %v1441_v5 = vmul.f32 %v1387_v0, %v1225_v22  ;;  %v2288_v51 = vadd.f32 %v2190_v29, %v2011_v46  ;;  %v1390_v13 = vmin.f32 %v1336_v1, 6.0  ;;  %v8085_v26 = vld [vmem:[#allocation14_spill] sm:$0xff]  ;;  %v6560_v46 = vld [vmem:[#allocation2 + $0x98] sm:$0xff] }
 0x18b   : > { %v2435_v50 = vsel %vm2412_vm4, %v2433_v60, %v2434_v25  ;;  %v6550_v52 = vmul.f32 %v8070_v39, %v6448_v33  ;;  %v3881_v20 = vmul.f32 0.16666667, %v3849_v45  ;;  %v2745_v55 = vrot.slane %v2641_v59, 1 }
 0x18c   : > { %v3644_v42 = vadd.f32 %v3544_v21, %v3400_v27  ;;  %v1495_v19 = vmul.f32 0.16666667, %v1441_v5  ;;  %v2533_v14 = vadd.f32 %v2435_v50, %v2288_v51  ;;  %v1444_v9 = vmul.f32 %v1390_v13, %v1228_v41  ;;  %v1066_v41 = vpop.f32.mrf.mxu0 }
 0x18d   : > { %v2746_v8 = vrot.slane %v6550_v52, 1  ;;  %v2885_v22 = vmul.f32 %v8074_v37, %v6439_v4  ;;  %5273 = vmatprep.mubr.msk.f32.mxu1 %vm1885_vm2, %v3881_v20  ;;  %v6564_v7 = vmul.f32 %v8074_v37, %v6448_v33  ;;  %v3125_v48 = vmul.f32 %v8075_v56, %v6552_v18 }
 0x18e   : > { %v3683_v31 = vmul.f32 %v6177_v17, %v3644_v42  ;;  %v1873_v11 = vmul.f32 %v8085_v26, %v1495_v19  ;;  %v2601_v47 = vadd.f32 %v2569_v3, %v2533_v14  ;;  %v1498_v21 = vmul.f32 0.16666667, %v1444_v9  ;;  %v5250_v26 = vpop.f32.mrf.mxu0 }
 0x18f   : > { %v2747_v57 = vsel %vm2167_vm3, %v2745_v55, %v2746_v8  ;;  %v2989_v44 = vrot.slane %v2885_v22, 2  ;;  %v2990_v28 = vrot.slane %v6564_v7, 2  ;;  %v3197_v30 = vmul.f32 %v8076_v6, %v6552_v18 }
 0x190   : > { %v3722_v10 = vadd.f32 %v6188_v16, %v3683_v31  ;;  %1928 = vst.msk [vmem:[#allocation2 + $0x150] sm:$0xff] %vm1885_vm2, %v1873_v11  ;;  %v2845_v12 = vadd.f32 %v2747_v57, %v2601_v47  ;;  %v1876_v2 = vmul.f32 %v8086_v58, %v1498_v21  ;;  %v3198_v49 = vmul.f32 %v8076_v6, %v6560_v46 }
 0x191   : > { %v3441_v36 = vmul.f32 %v6140_v38, %v6552_v18  ;;  %v3442_v40 = vmul.f32 %v6140_v38, %v6560_v46  ;;  %v2991_v60 = vsel %vm2412_vm4, %v2989_v44, %v2990_v28  ;;  %v3301_v1 = vrot.slane %v3197_v30, 1 }
 0x192   : > { %v3754_v0 = vadd.f32 3.0, %v3722_v10  ;;  %v1166_v29 = vmul.f32 %v6281_v54, %v1066_v41  ;;  %1931 = vst.msk [vmem:[#allocation2 + $0x168] sm:$0xff] %vm1885_vm2, %v1876_v2  ;;  %v3089_v3 = vadd.f32 %v2991_v60, %v2845_v12  ;;  %v3302_v45 = vrot.slane %v3198_v49, 1 }
 0x193   : > { %v3545_v27 = vrot.slane %v3441_v36, 2  ;;  %v3546_v5 = vrot.slane %v3442_v40, 2  ;;  %v2012_v50 = vmul.f32 %v5934_v34, %v6331_v15  ;;  %v2085_v59 = vmul.f32 %v5930_v32, %v6374_v24  ;;  %v6597_v15 = vld [vmem:[#allocation2 + $0xa0] sm:$0xff]  ;;  %v1076_v40 = vpop.f32.mrf.mxu0 }
 0x194   : > { %v3786_v51 = vmax.f32 %v3754_v0, 0.0  ;;  %v1227_v13 = vadd.f32 %v6293_v61, %v1166_v29  ;;  %v3157_v20 = vadd.f32 %v3125_v48, %v3089_v3  ;;  %v3303_v42 = vsel %vm2167_vm3, %v3301_v1, %v3302_v45 }
 0x195   : > { %v3547_v19 = vsel %vm2412_vm4, %v3545_v27, %v3546_v5  ;;  %v2330_v14 = vmul.f32 %v5932_v35, %v6374_v24  ;;  %v2191_v22 = vrot.slane %v2085_v59, 1  ;;  %v2570_v31 = vmul.f32 %v5938_v43, %v6448_v33 }
 0x196   : > { %v3818_v9 = vmin.f32 %v3786_v51, 6.0  ;;  %v1281_v55 = vadd.f32 3.0, %v1227_v13  ;;  %v3401_v11 = vadd.f32 %v3303_v42, %v3157_v20  ;;  %v2643_v7 = vmul.f32 %v8070_v39, %v6487_v53  ;;  %v8087_v42 = vld [vmem:[#allocation16_spill] sm:$0xff] }
 0x197   : > { %v2436_v47 = vrot.slane %v2330_v14, 2  ;;  %v2887_v21 = vmul.f32 %v8074_v37, %v6487_v53  ;;  %v2192_v24 = vsel %vm2167_vm3, %v2189_v23, %v2191_v22  ;;  %v3126_v48 = vmul.f32 %v8075_v56, %v6560_v46 }
 0x198   : > { %v3850_v57 = vmul.f32 %v3818_v9, %v3722_v10  ;;  %v1335_v44 = vmax.f32 %v1281_v55, 0.0  ;;  %v3645_v41 = vadd.f32 %v3547_v19, %v3401_v11  ;;  %v2289_v12 = vadd.f32 %v2192_v24, %v2012_v50 }
 0x199   : > { %v2437_v30 = vsel %vm2412_vm4, %v2434_v25, %v2436_v47  ;;  %v2748_v58 = vrot.slane %v2643_v7, 1  ;;  %v2992_v36 = vrot.slane %v2887_v21, 2  ;;  %v3199_v10 = vmul.f32 %v8076_v6, %v6597_v15 }
 0x19a   : > { %v3882_v2 = vmul.f32 0.16666667, %v3850_v57  ;;  %v1389_v49 = vmin.f32 %v1335_v44, 6.0  ;;  %v3684_v62 = vmul.f32 %v6177_v17, %v3645_v41  ;;  %v2534_v23 = vadd.f32 %v2437_v30, %v2289_v12 }
 0x19b   : > { %v2749_v0 = vsel %vm2167_vm3, %v2746_v8, %v2748_v58  ;;  %v3443_v63 = vmul.f32 %v6140_v38, %v6597_v15  ;;  %v2993_v60 = vsel %vm2412_vm4, %v2990_v28, %v2992_v36  ;;  %v3304_v1 = vrot.slane %v3199_v10, 1 }
 0x19c   : > { %5274 = vmatmul.mubr.msk.f32.gmra.mxu1 %vm1885_vm2, %v3882_v2  ;;  %v1443_v25 = vmul.f32 %v1389_v49, %v1227_v13  ;;  %v1169_v29 = vmul.f32 %v6281_v54, %v5250_v26  ;;  %v3723_v3 = vadd.f32 %v6188_v16, %v3684_v62  ;;  %v2602_v27 = vadd.f32 %v2570_v31, %v2534_v23 }
 0x19d   : > { %v3548_v17 = vrot.slane %v3443_v63, 2  ;;  %v1168_v51 = vmul.f32 %v6281_v54, %v1076_v40  ;;  %v3305_v8 = vsel %vm2167_vm3, %v3302_v45, %v3304_v1  ;;  %v2013_v38 = vmul.f32 %v5934_v34, %v6439_v4  ;;  %v6660_v63 = vld [vmem:[#allocation2 + $0xa8] sm:$0xff] }
 0x19e   : > { %v1497_v52 = vmul.f32 0.16666667, %v1443_v25  ;;  %v1230_v50 = vadd.f32 %v6293_v61, %v1169_v29  ;;  %v3755_v13 = vadd.f32 3.0, %v3723_v3  ;;  %v2846_v59 = vadd.f32 %v2749_v0, %v2602_v27  ;;  %v6669_v27 = vld [vmem:[%s8030_s6] ss:$0 sm:$0xff] }
 0x19f   : > { %v3549_v28 = vsel %vm2412_vm4, %v3546_v5, %v3548_v17  ;;  %v1229_v20 = vadd.f32 %v6293_v61, %v1168_v51  ;;  %v2086_v14 = vmul.f32 %v5930_v32, %v6439_v4  ;;  %v6635_v45 = vmul.f32 %v5930_v32, %v6448_v33 }
 0x1a0   : > { %v1875_v16 = vmul.f32 %v8087_v42, %v1497_v52  ;;  %v1284_v19 = vadd.f32 3.0, %v1230_v50  ;;  %v3787_v9 = vmax.f32 %v3755_v13, 0.0  ;;  %v3090_v55 = vadd.f32 %v2993_v60, %v2846_v59  ;;  %v6672_v52 = vld [vmem:[#allocation2 + $0xb0] sm:$0xff]  ;;  %v5253_v42 = vpop.f32.mrf.mxu0 }
 0x1a1   : > { %v1283_v22 = vadd.f32 3.0, %v1229_v20  ;;  %v2331_v31 = vmul.f32 %v5932_v35, %v6439_v4  ;;  %v2193_v26 = vrot.slane %v2086_v14, 1  ;;  %v2194_v11 = vrot.slane %v6635_v45, 1  ;;  %v8089_v14 = vld [vmem:[#allocation18_spill] sm:$0xff] }
 0x1a2   : > { %1930 = vst.msk [vmem:[#allocation2 + $0x160] sm:$0xff] %vm1885_vm2, %v1875_v16  ;;  %v1338_v5 = vmax.f32 %v1284_v19, 0.0  ;;  %v6643_v47 = vmul.f32 %v5932_v35, %v6448_v33  ;;  %v3819_v7 = vmin.f32 %v3787_v9, 6.0  ;;  %v3158_v21 = vadd.f32 %v3126_v48, %v3090_v55  ;;  %v6687_v16 = vld [vmem:[%s8031_s7] ss:$0 sm:$0xff] }
 0x1a3   : > { %v1337_v57 = vmax.f32 %v1283_v22, 0.0  ;;  %v2438_v44 = vrot.slane %v2331_v31, 2  ;;  %v2195_v41 = vsel %vm2167_vm3, %v2193_v26, %v2194_v11  ;;  %v2571_v12 = vmul.f32 %v5938_v43, %v6552_v18  ;;  %v6700_v26 = vld [vmem:[%s8029_s5 + $0x8] ss:$0 sm:$0xff] }
 0x1a4   : > { %v1392_v24 = vmin.f32 %v1338_v5, 6.0  ;;  %v2439_v4 = vrot.slane %v6643_v47, 2  ;;  %v3851_v30 = vmul.f32 %v3819_v7, %v3723_v3  ;;  %v3402_v58 = vadd.f32 %v3305_v8, %v3158_v21 }
 0x1a5   : > { %v1391_v2 = vmin.f32 %v1337_v57, 6.0  ;;  %v2290_v49 = vadd.f32 %v2195_v41, %v2013_v38  ;;  %v2644_v10 = vmul.f32 %v8070_v39, %v6552_v18  ;;  %v6658_v40 = vmul.f32 %v8070_v39, %v6560_v46  ;;  %v8088_v38 = vld [vmem:[#allocation17_spill] sm:$0xff] }
 0x1a6   : > { %v1446_v36 = vmul.f32 %v1392_v24, %v1230_v50  ;;  %v2440_v48 = vsel %vm2412_vm4, %v2438_v44, %v2439_v4  ;;  %v3883_v62 = vmul.f32 0.16666667, %v3851_v30  ;;  %v3646_v23 = vadd.f32 %v3549_v28, %v3402_v58 }
 0x1a7   : > { %v1445_v0 = vmul.f32 %v1391_v2, %v1229_v20  ;;  %v2535_v25 = vadd.f32 %v2440_v48, %v2290_v49  ;;  %v2750_v1 = vrot.slane %v2644_v10, 1  ;;  %v2751_v29 = vrot.slane %v6658_v40, 1 }
 0x1a8   : > { %v1500_v60 = vmul.f32 0.16666667, %v1446_v36  ;;  %v2888_v3 = vmul.f32 %v8074_v37, %v6552_v18  ;;  %5276 = vmatprep.mubr.msk.f32.mxu1 %vm1885_vm2, %v3883_v62  ;;  %v3685_v17 = vmul.f32 %v6669_v27, %v3646_v23  ;;  %v6676_v50 = vmul.f32 %v8074_v37, %v6560_v46 }
 0x1a9   : > { %v1499_v51 = vmul.f32 0.16666667, %v1445_v0  ;;  %v2603_v8 = vadd.f32 %v2571_v12, %v2535_v25  ;;  %v2752_v59 = vsel %vm2167_vm3, %v2750_v1, %v2751_v29  ;;  %v3127_v20 = vmul.f32 %v8075_v56, %v6660_v63 }
 0x1aa   : > { %v1878_v13 = vmul.f32 %v8088_v38, %v1500_v60  ;;  %v2994_v28 = vrot.slane %v2888_v3, 2  ;;  %v3724_v19 = vadd.f32 %v6687_v16, %v3685_v17  ;;  %v2995_v22 = vrot.slane %v6676_v50, 2  ;;  %v1086_v17 = vpop.f32.mrf.mxu0 }
 0x1ab   : > { %v1877_v9 = vmul.f32 %v8089_v14, %v1499_v51  ;;  %v2847_v55 = vadd.f32 %v2752_v59, %v2603_v8  ;;  %v3200_v31 = vmul.f32 %v8076_v6, %v6660_v63  ;;  %v3201_v5 = vmul.f32 %v8076_v6, %v6672_v52  ;;  %v6720_v8 = vld [vmem:[#allocation2 + $0xb8] sm:$0xff] }
 0x1ac   : > { %1933 = vst.msk [vmem:[#allocation2 + $0x178] sm:$0xff] %vm1885_vm2, %v1878_v13  ;;  %v3444_v7 = vmul.f32 %v6700_v26, %v6660_v63  ;;  %v3445_v21 = vmul.f32 %v6700_v26, %v6672_v52  ;;  %v3756_v57 = vadd.f32 3.0, %v3724_v19  ;;  %v2996_v44 = vsel %vm2412_vm4, %v2994_v28, %v2995_v22 }
 0x1ad   : > { %1932 = vst.msk [vmem:[#allocation2 + $0x170] sm:$0xff] %vm1885_vm2, %v1877_v9  ;;  %v1171_v24 = vmul.f32 %v6281_v54, %v5253_v42  ;;  %v2014_v41 = vmul.f32 %v5934_v34, %v6448_v33  ;;  %v3091_v12 = vadd.f32 %v2996_v44, %v2847_v55  ;;  %v3306_v30 = vrot.slane %v3200_v31, 1 }
 0x1ae   : > { %v3307_v58 = vrot.slane %v3201_v5, 1  ;;  %v3550_v2 = vrot.slane %v3444_v7, 2  ;;  %v3788_v49 = vmax.f32 %v3756_v57, 0.0  ;;  %v3551_v36 = vrot.slane %v3445_v21, 2  ;;  %v5256_v21 = vpop.f32.mrf.mxu0 }
 0x1af   : > { %v1232_v48 = vadd.f32 %v6293_v61, %v1171_v24  ;;  %v2088_v10 = vmul.f32 %v5930_v32, %v6487_v53  ;;  %v3159_v62 = vadd.f32 %v3127_v20, %v3091_v12  ;;  %v2333_v0 = vmul.f32 %v5932_v35, %v6487_v53 }
 0x1b0   : > { %v3308_v23 = vsel %vm2167_vm3, %v3306_v30, %v3307_v58  ;;  %v2572_v33 = vmul.f32 %v5938_v43, %v6560_v46  ;;  %v3820_v25 = vmin.f32 %v3788_v49, 6.0  ;;  %v3552_v60 = vsel %vm2412_vm4, %v3550_v2, %v3551_v36 }
 0x1b1   : > { %v1286_v1 = vadd.f32 3.0, %v1232_v48  ;;  %v2196_v3 = vrot.slane %v2088_v10, 1  ;;  %v3403_v51 = vadd.f32 %v3308_v23, %v3159_v62  ;;  %v2441_v50 = vrot.slane %v2333_v0, 2 }
 0x1b2   : > { %v2646_v38 = vmul.f32 %v8070_v39, %v6597_v15  ;;  %v2890_v13 = vmul.f32 %v8074_v37, %v6597_v15  ;;  %v3852_v53 = vmul.f32 %v3820_v25, %v3724_v19  ;;  %v3128_v20 = vmul.f32 %v8075_v56, %v6672_v52  ;;  %v8090_v25 = vld [vmem:[#allocation19_spill] sm:$0xff] }
 0x1b3   : > { %v1340_v59 = vmax.f32 %v1286_v1, 0.0  ;;  %v2197_v28 = vsel %vm2167_vm3, %v2194_v11, %v2196_v3  ;;  %v3647_v42 = vadd.f32 %v3552_v60, %v3403_v51  ;;  %v2442_v9 = vsel %vm2412_vm4, %v2439_v4, %v2441_v50 }
 0x1b4   : > { %v2291_v14 = vadd.f32 %v2197_v28, %v2014_v41  ;;  %v2753_v55 = vrot.slane %v2646_v38, 1  ;;  %v3884_v31 = vmul.f32 0.16666667, %v3852_v53  ;;  %v2997_v7 = vrot.slane %v2890_v13, 2 }
 0x1b5   : > { %v1394_v5 = vmin.f32 %v1340_v59, 6.0  ;;  %v3202_v19 = vmul.f32 %v8076_v6, %v6720_v8  ;;  %v3686_v45 = vmul.f32 %v6669_v27, %v3647_v42  ;;  %v3446_v47 = vmul.f32 %v6700_v26, %v6720_v8 }
 0x1b6   : > { %v2536_v11 = vadd.f32 %v2442_v9, %v2291_v14  ;;  %v2754_v57 = vsel %vm2167_vm3, %v2751_v29, %v2753_v55  ;;  %5277 = vmatmul.mubr.msk.f32.gmra.mxu1 %vm1885_vm2, %v3884_v31  ;;  %v2998_v44 = vsel %vm2412_vm4, %v2995_v22, %v2997_v7  ;;  %v1170_v41 = vmul.f32 %v6281_v54, %v1086_v17 }
 0x1b7   : > { %v1448_v4 = vmul.f32 %v1394_v5, %v1232_v48  ;;  %v3309_v24 = vrot.slane %v3202_v19, 1  ;;  %v3725_v12 = vadd.f32 %v6687_v16, %v3686_v45  ;;  %v3553_v2 = vrot.slane %v3446_v47, 2 }
 0x1b8   : > { %v2604_v30 = vadd.f32 %v2572_v33, %v2536_v11  ;;  %v1173_v49 = vmul.f32 %v6281_v54, %v5256_v21  ;;  %v1231_v10 = vadd.f32 %v6293_v61, %v1170_v41  ;;  %v2015_v62 = vmul.f32 %v5934_v34, %v6552_v18 }
 0x1b9   : > { %v1502_v40 = vmul.f32 0.16666667, %v1448_v4  ;;  %v3310_v29 = vsel %vm2167_vm3, %v3307_v58, %v3309_v24  ;;  %v3757_v48 = vadd.f32 3.0, %v3725_v12  ;;  %v3554_v22 = vsel %vm2412_vm4, %v3551_v36, %v3553_v2  ;;  %v6783_v4 = vld [vmem:[#allocation2 + $0xc0] sm:$0xff] }
 0x1ba   : > { %v2848_v23 = vadd.f32 %v2754_v57, %v2604_v30  ;;  %v1234_v0 = vadd.f32 %v6293_v61, %v1173_v49  ;;  %v1285_v33 = vadd.f32 3.0, %v1231_v10  ;;  %v2089_v54 = vmul.f32 %v5930_v32, %v6552_v18 }
 0x1bb   : > { %v1880_v60 = vmul.f32 %v8090_v25, %v1502_v40  ;;  %v6758_v58 = vmul.f32 %v5930_v32, %v6560_v46  ;;  %v3789_v1 = vmax.f32 %v3757_v48, 0.0  ;;  %v2334_v51 = vmul.f32 %v5932_v35, %v6552_v18  ;;  %v6790_v40 = vld [vmem:[#allocation2 + $0xc8] sm:$0xff]  ;;  %v1096_v25 = vpop.f32.mrf.mxu0 }
 0x1bc   : > { %v3092_v3 = vadd.f32 %v2998_v44, %v2848_v23  ;;  %v1288_v17 = vadd.f32 3.0, %v1234_v0  ;;  %v1339_v36 = vmax.f32 %v1285_v33, 0.0  ;;  %v2198_v61 = vrot.slane %v2089_v54, 1  ;;  %v8092_v33 = vld [vmem:[#allocation21_spill] sm:$0xff] }
 0x1bd   : > { %1935 = vst.msk [vmem:[#allocation2 + $0x188] sm:$0xff] %vm1885_vm2, %v1880_v60  ;;  %v2199_v50 = vrot.slane %v6758_v58, 1  ;;  %v6766_v38 = vmul.f32 %v5932_v35, %v6560_v46  ;;  %v3821_v13 = vmin.f32 %v3789_v1, 6.0  ;;  %v2443_v28 = vrot.slane %v2334_v51, 2 }
 0x1be   : > { %v3160_v53 = vadd.f32 %v3128_v20, %v3092_v3  ;;  %v1342_v59 = vmax.f32 %v1288_v17, 0.0  ;;  %v1393_v42 = vmin.f32 %v1339_v36, 6.0  ;;  %v2573_v9 = vmul.f32 %v5938_v43, %v6660_v63 }
 0x1bf   : > { %v2200_v14 = vsel %vm2167_vm3, %v2198_v61, %v2199_v50  ;;  %v2444_v18 = vrot.slane %v6766_v38, 2  ;;  %v3853_v55 = vmul.f32 %v3821_v13, %v3725_v12  ;;  %v2647_v21 = vmul.f32 %v8070_v39, %v6660_v63 }
 0x1c0   : > { %v3404_v31 = vadd.f32 %v3310_v29, %v3160_v53  ;;  %v1396_v5 = vmin.f32 %v1342_v59, 6.0  ;;  %v2292_v7 = vadd.f32 %v2200_v14, %v2015_v62  ;;  %v1447_v19 = vmul.f32 %v1393_v42, %v1231_v10  ;;  %v8091_v62 = vld [vmem:[#allocation20_spill] sm:$0xff]  ;;  %v5399_v59 = vld [vmem:[%s8027_s3] ss:$0 sm:$0xff] }
 0x1c1   : > { %v2445_v20 = vsel %vm2412_vm4, %v2443_v28, %v2444_v18  ;;  %v6781_v45 = vmul.f32 %v8070_v39, %v6672_v52  ;;  %v3885_v11 = vmul.f32 0.16666667, %v3853_v55  ;;  %v2755_v41 = vrot.slane %v2647_v21, 1 }
 0x1c2   : > { %v3648_v57 = vadd.f32 %v3554_v22, %v3404_v31  ;;  %v1450_v47 = vmul.f32 %v1396_v5, %v1234_v0  ;;  %v2537_v44 = vadd.f32 %v2445_v20, %v2292_v7  ;;  %v1501_v24 = vmul.f32 0.16666667, %v1447_v19  ;;  %v5400_v19 = vld [vmem:[%s8028_s4] ss:$0 sm:$0xff] }
 0x1c3   : > { %v2756_v12 = vrot.slane %v6781_v45, 1  ;;  %v2891_v30 = vmul.f32 %v8074_v37, %v6660_v63  ;;  %5279 = vmatprep.mubr.msk.f32.mxu1 %vm1885_vm2, %v3885_v11  ;;  %v6794_v10 = vmul.f32 %v8074_v37, %v6672_v52  ;;  %v3129_v0 = vmul.f32 %v8075_v56, %v6783_v4 }
 0x1c4   : > { %v3687_v2 = vmul.f32 %v6669_v27, %v3648_v57  ;;  %v1504_v49 = vmul.f32 0.16666667, %v1450_v47  ;;  %v2605_v29 = vadd.f32 %v2573_v9, %v2537_v44  ;;  %v1879_v48 = vmul.f32 %v8091_v62, %v1501_v24 }
 0x1c5   : > { %v2757_v23 = vsel %vm2167_vm3, %v2755_v41, %v2756_v12  ;;  %v2999_v22 = vrot.slane %v2891_v30, 2  ;;  %v3000_v3 = vrot.slane %v6794_v10, 2  ;;  %v3203_v17 = vmul.f32 %v8076_v6, %v6783_v4 }
 0x1c6   : > { %v3726_v60 = vadd.f32 %v6687_v16, %v3687_v2  ;;  %v1882_v54 = vmul.f32 %v8092_v33, %v1504_v49  ;;  %v2849_v1 = vadd.f32 %v2757_v23, %v2605_v29  ;;  %1934 = vst.msk [vmem:[#allocation2 + $0x180] sm:$0xff] %vm1885_vm2, %v1879_v48  ;;  %v3204_v51 = vmul.f32 %v8076_v6, %v6790_v40  ;;  %v5259_v2 = vpop.f32.mrf.mxu0  ;;  %v6835_v29 = vld [vmem:[#allocation2 + $0xd0] sm:$0xff] }
 0x1c7   : > { %v3447_v36 = vmul.f32 %v6700_v26, %v6783_v4  ;;  %v6814_v61 = vmul.f32 %v6700_v26, %v6790_v40  ;;  %v3001_v53 = vsel %vm2412_vm4, %v2999_v22, %v3000_v3  ;;  %v1172_v28 = vmul.f32 %v5399_v59, %v1096_v25 }
 0x1c8   : > { %v3758_v13 = vadd.f32 3.0, %v3726_v60  ;;  %1937 = vst.msk [vmem:[#allocation2 + $0x198] sm:$0xff] %vm1885_vm2, %v1882_v54  ;;  %v2016_v42 = vmul.f32 %v5934_v34, %v6560_v46  ;;  %v3093_v14 = vadd.f32 %v3001_v53, %v2849_v1  ;;  %v3311_v9 = vrot.slane %v3203_v17, 1 }
 0x1c9   : > { %v3312_v55 = vrot.slane %v3204_v51, 1  ;;  %v3555_v31 = vrot.slane %v3447_v36, 2  ;;  %v3556_v7 = vrot.slane %v6814_v61, 2  ;;  %v1233_v20 = vadd.f32 %v5400_v19, %v1172_v28  ;;  %v1106_v61 = vpop.f32.mrf.mxu0 }
 0x1ca   : > { %v3790_v5 = vmax.f32 %v3758_v13, 0.0  ;;  %v2091_v21 = vmul.f32 %v5930_v32, %v6597_v15  ;;  %v3161_v11 = vadd.f32 %v3129_v0, %v3093_v14  ;;  %v2336_v46 = vmul.f32 %v5932_v35, %v6597_v15 }
 0x1cb   : > { %v3313_v57 = vsel %vm2167_vm3, %v3311_v9, %v3312_v55  ;;  %v2574_v47 = vmul.f32 %v5938_v43, %v6672_v52  ;;  %v3557_v24 = vsel %vm2412_vm4, %v3555_v31, %v3556_v7  ;;  %v1287_v41 = vadd.f32 3.0, %v1233_v20 }
 0x1cc   : > { %v3822_v44 = vmin.f32 %v3790_v5, 6.0  ;;  %v2201_v30 = vrot.slane %v2091_v21, 1  ;;  %v3405_v49 = vadd.f32 %v3313_v57, %v3161_v11  ;;  %v2446_v10 = vrot.slane %v2336_v46, 2 }
 0x1cd   : > { %v2649_v62 = vmul.f32 %v8070_v39, %v6720_v8  ;;  %v2893_v48 = vmul.f32 %v8074_v37, %v6720_v8  ;;  %v1341_v23 = vmax.f32 %v1287_v41, 0.0  ;;  %v3130_v0 = vmul.f32 %v8075_v56, %v6790_v40 }
 0x1ce   : > { %v3854_v15 = vmul.f32 %v3822_v44, %v3726_v60  ;;  %v2202_v22 = vsel %vm2167_vm3, %v2199_v50, %v2201_v30  ;;  %v3649_v25 = vadd.f32 %v3557_v24, %v3405_v49  ;;  %v2447_v54 = vsel %vm2412_vm4, %v2444_v18, %v2446_v10 }
 0x1cf   : > { %v2293_v33 = vadd.f32 %v2202_v22, %v2016_v42  ;;  %v2758_v1 = vrot.slane %v2649_v62, 1  ;;  %v1395_v51 = vmin.f32 %v1341_v23, 6.0  ;;  %v3002_v36 = vrot.slane %v2893_v48, 2 }
 0x1d0   : > { %v3886_v17 = vmul.f32 0.16666667, %v3854_v15  ;;  %v3205_v60 = vmul.f32 %v8076_v6, %v6835_v29  ;;  %v3688_v58 = vmul.f32 %v6669_v27, %v3649_v25  ;;  %v3449_v38 = vmul.f32 %v6700_v26, %v6835_v29 }
 0x1d1   : > { %v2538_v50 = vadd.f32 %v2447_v54, %v2293_v33  ;;  %v2759_v13 = vsel %vm2167_vm3, %v2756_v12, %v2758_v1  ;;  %v1449_v18 = vmul.f32 %v1395_v51, %v1233_v20  ;;  %v3003_v53 = vsel %vm2412_vm4, %v3000_v3, %v3002_v36  ;;  %v8093_v3 = vld [vmem:[#allocation22_spill] sm:$0xff] }
 0x1d2   : > { %5280 = vmatmul.mubr.msk.f32.gmra.mxu1 %vm1885_vm2, %v3886_v17  ;;  %v3314_v28 = vrot.slane %v3205_v60, 1  ;;  %v1175_v42 = vmul.f32 %v5399_v59, %v5259_v2  ;;  %v3727_v14 = vadd.f32 %v6687_v16, %v3688_v58  ;;  %v3558_v31 = vrot.slane %v3449_v38, 2 }
 0x1d3   : > { %v2606_v9 = vadd.f32 %v2574_v47, %v2538_v50  ;;  %v1174_v5 = vmul.f32 %v5399_v59, %v1106_v61  ;;  %v1503_v21 = vmul.f32 0.16666667, %v1449_v18  ;;  %v2017_v12 = vmul.f32 %v5934_v34, %v6660_v63 }
 0x1d4   : > { %v3315_v45 = vsel %vm2167_vm3, %v3312_v55, %v3314_v28  ;;  %v1236_v11 = vadd.f32 %v5400_v19, %v1175_v42  ;;  %v3759_v57 = vadd.f32 3.0, %v3727_v14  ;;  %v3559_v20 = vsel %vm2412_vm4, %v3556_v7, %v3558_v31 }
 0x1d5   : > { %v2850_v46 = vadd.f32 %v2759_v13, %v2606_v9  ;;  %v1235_v44 = vadd.f32 %v5400_v19, %v1174_v5  ;;  %v1881_v24 = vmul.f32 %v8093_v3, %v1503_v21  ;;  %v2092_v47 = vmul.f32 %v5930_v32, %v6660_v63  ;;  %v6899_v5 = vld [vmem:[#allocation2 + $0xd8] sm:$0xff]  ;;  %v6901_v21 = vld [vmem:[#allocation2 + $0xe0] sm:$0xff]  ;;  %v8095_v3 = vld [vmem:[#allocation26_spill] sm:$0xff] }
 0x1d6   : > { %v1290_v41 = vadd.f32 3.0, %v1236_v11  ;;  %v6869_v59 = vmul.f32 %v5930_v32, %v6672_v52  ;;  %v3791_v55 = vmax.f32 %v3759_v57, 0.0  ;;  %v2337_v49 = vmul.f32 %v5932_v35, %v6660_v63 }
 0x1d7   : > { %v3094_v30 = vadd.f32 %v3003_v53, %v2850_v46  ;;  %v1289_v2 = vadd.f32 3.0, %v1235_v44  ;;  %1936 = vst.msk [vmem:[#allocation2 + $0x190] sm:$0xff] %vm1885_vm2, %v1881_v24  ;;  %v2203_v19 = vrot.slane %v2092_v47, 1  ;;  %v6877_v62 = vmul.f32 %v5932_v35, %v6672_v52 }
 0x1d8   : > { %v1344_v7 = vmax.f32 %v1290_v41, 0.0  ;;  %v2204_v10 = vrot.slane %v6869_v59, 1  ;;  %v3823_v48 = vmin.f32 %v3791_v55, 6.0  ;;  %v2448_v22 = vrot.slane %v2337_v49, 2 }
 0x1d9   : > { %v3162_v15 = vadd.f32 %v3130_v0, %v3094_v30  ;;  %v1343_v23 = vmax.f32 %v1289_v2, 0.0  ;;  %v2449_v63 = vrot.slane %v6877_v62, 2  ;;  %v2575_v54 = vmul.f32 %v5938_v43, %v6783_v4 }
 0x1da   : > { %v1398_v25 = vmin.f32 %v1344_v7, 6.0  ;;  %v2205_v33 = vsel %vm2167_vm3, %v2203_v19, %v2204_v10  ;;  %v3855_v1 = vmul.f32 %v3823_v48, %v3727_v14  ;;  %v2650_v61 = vmul.f32 %v8070_v39, %v6783_v4 }
 0x1db   : > { %v3406_v17 = vadd.f32 %v3315_v45, %v3162_v15  ;;  %v1397_v51 = vmin.f32 %v1343_v23, 6.0  ;;  %v2294_v36 = vadd.f32 %v2205_v33, %v2017_v12  ;;  %v2450_v0 = vsel %vm2412_vm4, %v2448_v22, %v2449_v63  ;;  %v8094_v12 = vld [vmem:[#allocation25_spill] sm:$0xff] }
 0x1dc   : > { %v1452_v60 = vmul.f32 %v1398_v25, %v1236_v11  ;;  %v6892_v58 = vmul.f32 %v8070_v39, %v6790_v40  ;;  %v3887_v50 = vmul.f32 0.16666667, %v3855_v1  ;;  %v2760_v28 = vrot.slane %v2650_v61, 1  ;;  %v6929_v61 = vld [vmem:[#allocation2 + $0xe8] sm:$0xff] }
 0x1dd   : > { %v3650_v13 = vadd.f32 %v3559_v20, %v3406_v17  ;;  %v1451_v38 = vmul.f32 %v1397_v51, %v1235_v44  ;;  %v2539_v18 = vadd.f32 %v2450_v0, %v2294_v36  ;;  %v2894_v14 = vmul.f32 %v8074_v37, %v6783_v4 }
 0x1de   : > { %v1506_v53 = vmul.f32 0.16666667, %v1452_v60  ;;  %v2761_v42 = vrot.slane %v6892_v58, 1  ;;  %5282 = vmatprep.mubr.msk.f32.mxu1 %vm1885_vm2, %v3887_v50  ;;  %v2895_v11 = vmul.f32 %v8074_v37, %v6790_v40  ;;  %v3206_v55 = vmul.f32 %v8076_v6, %v6899_v5 }
 0x1df   : > { %v3689_v9 = vmul.f32 %v6669_v27, %v3650_v13  ;;  %v1505_v31 = vmul.f32 0.16666667, %v1451_v38  ;;  %v2607_v45 = vadd.f32 %v2575_v54, %v2539_v18  ;;  %v3004_v20 = vrot.slane %v2894_v14, 2 }
 0x1e0   : > { %v1884_v57 = vmul.f32 %v8094_v12, %v1506_v53  ;;  %v2762_v46 = vsel %vm2167_vm3, %v2760_v28, %v2761_v42  ;;  %v3005_v47 = vrot.slane %v2895_v11, 2  ;;  %v3207_v30 = vmul.f32 %v8076_v6, %v6901_v21 }
 0x1e1   : > { %v3728_v44 = vadd.f32 %v6687_v16, %v3689_v9  ;;  %v1883_v24 = vmul.f32 %v8095_v3, %v1505_v31  ;;  %v2851_v41 = vadd.f32 %v2762_v46, %v2607_v45  ;;  %v3450_v2 = vmul.f32 %v6700_v26, %v6899_v5 }
 0x1e2   : > { %1939 = vst.msk [vmem:[#allocation2 + $0x1a8] sm:$0xff] %vm1885_vm2, %v1884_v57  ;;  %v3451_v49 = vmul.f32 %v6700_v26, %v6901_v21  ;;  %v3006_v19 = vsel %vm2412_vm4, %v3004_v20, %v3005_v47  ;;  %v3131_v48 = vmul.f32 %v8075_v56, %v6899_v5  ;;  %v2094_v15 = vmul.f32 %v5930_v32, %v6720_v8 }
 0x1e3   : > { %v3760_v7 = vadd.f32 3.0, %v3728_v44  ;;  %1938 = vst.msk [vmem:[#allocation2 + $0x1a0] sm:$0xff] %vm1885_vm2, %v1883_v24  ;;  %v3095_v23 = vadd.f32 %v3006_v19, %v2851_v41  ;;  %v3316_v22 = vrot.slane %v3206_v55, 1  ;;  %v3317_v25 = vrot.slane %v3207_v30, 1 }
 0x1e4   : > { %v2018_v33 = vmul.f32 %v5934_v34, %v6672_v52  ;;  %v3561_v1 = vrot.slane %v3451_v49, 2  ;;  %v2206_v17 = vrot.slane %v2094_v15, 1  ;;  %v2339_v51 = vmul.f32 %v5932_v35, %v6720_v8 }
 0x1e5   : > { %v3792_v54 = vmax.f32 %v3760_v7, 0.0  ;;  %v3163_v36 = vadd.f32 %v3131_v48, %v3095_v23  ;;  %v3318_v60 = vsel %vm2167_vm3, %v3316_v22, %v3317_v25  ;;  %v3560_v0 = vrot.slane %v3450_v2, 2 }
 0x1e6   : > { %v2652_v58 = vmul.f32 %v8070_v39, %v6835_v29  ;;  %v2207_v52 = vsel %vm2167_vm3, %v2204_v10, %v2206_v17  ;;  %v2451_v13 = vrot.slane %v2339_v51, 2  ;;  %v2576_v38 = vmul.f32 %v5938_v43, %v6790_v40 }
 0x1e7   : > { %v3824_v50 = vmin.f32 %v3792_v54, 6.0  ;;  %v3407_v18 = vadd.f32 %v3318_v60, %v3163_v36  ;;  %v2295_v8 = vadd.f32 %v2207_v52, %v2018_v33  ;;  %v2896_v28 = vmul.f32 %v8074_v37, %v6835_v29 }
 0x1e8   : > { %v2763_v53 = vrot.slane %v2652_v58, 1  ;;  %v3562_v9 = vsel %vm2412_vm4, %v3560_v0, %v3561_v1  ;;  %v2452_v31 = vsel %vm2412_vm4, %v2449_v63, %v2451_v13  ;;  %v3208_v59 = vmul.f32 %v8076_v6, %v6929_v61  ;;  %v6982_v0 = vld [vmem:[#allocation2 + $0xf0] sm:$0xff]  ;;  %v6984_v58 = vld [vmem:[#allocation2 + $0xf8] sm:$0xff] }
 0x1e9   : > { %v3856_v14 = vmul.f32 %v3824_v50, %v3728_v44  ;;  %v3651_v10 = vadd.f32 %v3562_v9, %v3407_v18  ;;  %v2540_v45 = vadd.f32 %v2452_v31, %v2295_v8  ;;  %v3007_v11 = vrot.slane %v2896_v28, 2 }
 0x1ea   : > { %v3132_v12 = vmul.f32 %v8075_v56, %v6901_v21  ;;  %v2764_v46 = vsel %vm2167_vm3, %v2761_v42, %v2763_v53  ;;  %v3319_v20 = vrot.slane %v3208_v59, 1  ;;  %v3452_v44 = vmul.f32 %v6700_v26, %v6929_v61 }
 0x1eb   : > { %v3888_v57 = vmul.f32 0.16666667, %v3856_v14  ;;  %v3690_v62 = vmul.f32 %v6669_v27, %v3651_v10  ;;  %v2608_v3 = vadd.f32 %v2576_v38, %v2540_v45  ;;  %v2019_v63 = vmul.f32 %v5934_v34, %v6783_v4 }
 0x1ec   : > { %v2095_v24 = vmul.f32 %v5930_v32, %v6783_v4  ;;  %v3008_v41 = vsel %vm2412_vm4, %v3005_v47, %v3007_v11  ;;  %v3563_v55 = vrot.slane %v3452_v44, 2  ;;  %v6960_v42 = vmul.f32 %v5930_v32, %v6790_v40 }
 0x1ed   : > { %5283 = vmatmul.mubr.msk.f32.gmra.mxu1 %vm1885_vm2, %v3888_v57  ;;  %v2340_v30 = vmul.f32 %v5932_v35, %v6783_v4  ;;  %v3729_v2 = vadd.f32 %v6687_v16, %v3690_v62  ;;  %v2852_v49 = vadd.f32 %v2764_v46, %v2608_v3  ;;  %v6967_v19 = vmul.f32 %v5932_v35, %v6790_v40 }
 0x1ee   : > { %v2208_v7 = vrot.slane %v2095_v24, 1  ;;  %v3320_v48 = vsel %vm2167_vm3, %v3317_v25, %v3319_v20  ;;  %v3564_v47 = vsel %vm2412_vm4, %v3561_v1, %v3563_v55  ;;  %v2209_v15 = vrot.slane %v6960_v42, 1 }
 0x1ef   : > { %v2453_v23 = vrot.slane %v2340_v30, 2  ;;  %v3761_v22 = vadd.f32 3.0, %v3729_v2  ;;  %v3096_v33 = vadd.f32 %v3008_v41, %v2852_v49  ;;  %v2454_v54 = vrot.slane %v6967_v19, 2 }
 0x1f0   : > { %v2653_v4 = vmul.f32 %v8070_v39, %v6899_v5  ;;  %v2210_v17 = vsel %vm2167_vm3, %v2208_v7, %v2209_v15  ;;  %v2654_v51 = vmul.f32 %v8070_v39, %v6901_v21  ;;  %v2897_v25 = vmul.f32 %v8074_v37, %v6899_v5 }
 0x1f1   : > { %v2898_v1 = vmul.f32 %v8074_v37, %v6901_v21  ;;  %v3793_v36 = vmax.f32 %v3761_v22, 0.0  ;;  %v3164_v60 = vadd.f32 %v3132_v12, %v3096_v33  ;;  %v2296_v50 = vadd.f32 %v2210_v17, %v2019_v63 }
 0x1f2   : > { %v2577_v52 = vmul.f32 %v5938_v43, %v6899_v5  ;;  %v2455_v13 = vsel %vm2412_vm4, %v2453_v23, %v2454_v54  ;;  %v2765_v38 = vrot.slane %v2653_v4, 1  ;;  %v2766_v18 = vrot.slane %v2654_v51, 1 }
 0x1f3   : > { %v3010_v8 = vrot.slane %v2898_v1, 2  ;;  %v3825_v53 = vmin.f32 %v3793_v36, 6.0  ;;  %v3408_v28 = vadd.f32 %v3320_v48, %v3164_v60  ;;  %v2541_v14 = vadd.f32 %v2455_v13, %v2296_v50 }
 0x1f4   : > { %v3009_v9 = vrot.slane %v2897_v25, 2  ;;  %v2767_v31 = vsel %vm2167_vm3, %v2765_v38, %v2766_v18  ;;  %v3133_v59 = vmul.f32 %v8075_v56, %v6982_v0  ;;  %v3209_v10 = vmul.f32 %v8076_v6, %v6982_v0 }
 0x1f5   : > { %v3210_v45 = vmul.f32 %v8076_v6, %v6984_v58  ;;  %v3857_v11 = vmul.f32 %v3825_v53, %v3729_v2  ;;  %v3652_v12 = vadd.f32 %v3564_v47, %v3408_v28  ;;  %v2609_v57 = vadd.f32 %v2577_v52, %v2541_v14  ;;  %v7014_v47 = vld [vmem:[#allocation2 + $0x100] sm:$0xff] }
 0x1f6   : > { %v3453_v46 = vmul.f32 %v6700_v26, %v6982_v0  ;;  %v3011_v20 = vsel %vm2412_vm4, %v3009_v9, %v3010_v8  ;;  %v3321_v44 = vrot.slane %v3209_v10, 1  ;;  %v7001_v3 = vmul.f32 %v6700_v26, %v6984_v58 }
 0x1f7   : > { %v3322_v62 = vrot.slane %v3210_v45, 1  ;;  %v3889_v63 = vmul.f32 0.16666667, %v3857_v11  ;;  %v3691_v24 = vmul.f32 %v6669_v27, %v3652_v12  ;;  %v2853_v41 = vadd.f32 %v2767_v31, %v2609_v57 }
 0x1f8   : > { %v3565_v55 = vrot.slane %v3453_v46, 2  ;;  %v2020_v30 = vmul.f32 %v5934_v34, %v6790_v40  ;;  %v2097_v2 = vmul.f32 %v5930_v32, %v6835_v29  ;;  %v2342_v49 = vmul.f32 %v5932_v35, %v6835_v29 }
 0x1f9   : > { %v3323_v42 = vsel %vm2167_vm3, %v3321_v44, %v3322_v62  ;;  %5285 = vmatprep.mubr.msk.f32.mxu1 %vm1885_vm2, %v3889_v63  ;;  %v3730_v7 = vadd.f32 %v6687_v16, %v3691_v24  ;;  %v3097_v19 = vadd.f32 %v3011_v20, %v2853_v41  ;;  %v3566_v48 = vrot.slane %v7001_v3, 2 }
 0x1fa   : > { %v2655_v23 = vmul.f32 %v8070_v39, %v6929_v61  ;;  %v2211_v22 = vrot.slane %v2097_v2, 1  ;;  %v2456_v40 = vrot.slane %v2342_v49, 2  ;;  %v2578_v33 = vmul.f32 %v5938_v43, %v6901_v21 }
 0x1fb   : > { %v2899_v29 = vmul.f32 %v8074_v37, %v6929_v61  ;;  %v3762_v4 = vadd.f32 3.0, %v3730_v7  ;;  %v3165_v17 = vadd.f32 %v3133_v59, %v3097_v19  ;;  %v3567_v51 = vsel %vm2412_vm4, %v3565_v55, %v3566_v48 }
 0x1fc   : > { %v2768_v25 = vrot.slane %v2655_v23, 1  ;;  %v2212_v1 = vsel %vm2167_vm3, %v2209_v15, %v2211_v22  ;;  %v3134_v60 = vmul.f32 %v8075_v56, %v6984_v58  ;;  %v3211_v50 = vmul.f32 %v8076_v6, %v7014_v47  ;;  %v7064_v22 = vld [vmem:[#allocation2 + $0x108] sm:$0xff] }
 0x1fd   : > { %v3012_v36 = vrot.slane %v2899_v29, 2  ;;  %v3794_v52 = vmax.f32 %v3762_v4, 0.0  ;;  %v3409_v13 = vadd.f32 %v3323_v42, %v3165_v17  ;;  %v2297_v38 = vadd.f32 %v2212_v1, %v2020_v30  ;;  %v7068_v29 = vld [vmem:[#allocation2 + $0x110] sm:$0xff] }
 0x1fe   : > { %v2457_v53 = vsel %vm2412_vm4, %v2454_v54, %v2456_v40  ;;  %v2769_v28 = vsel %vm2167_vm3, %v2766_v18, %v2768_v25  ;;  %v3324_v9 = vrot.slane %v3211_v50, 1  ;;  %v3455_v15 = vmul.f32 %v6700_v26, %v7014_v47 }
 0x1ff   : > { %v3013_v14 = vsel %vm2412_vm4, %v3010_v8, %v3012_v36  ;;  %v3826_v31 = vmin.f32 %v3794_v52, 6.0  ;;  %v3653_v59 = vadd.f32 %v3567_v51, %v3409_v13  ;;  %v2542_v10 = vadd.f32 %v2457_v53, %v2297_v38 }
 0x200   : > { %v2098_v45 = vmul.f32 %v5930_v32, %v6899_v5  ;;  %v3325_v11 = vsel %vm2167_vm3, %v3322_v62, %v3324_v9  ;;  %v2021_v12 = vmul.f32 %v5934_v34, %v6899_v5  ;;  %v7042_v54 = vmul.f32 %v5930_v32, %v6901_v21 }
 0x201   : > { %v2343_v18 = vmul.f32 %v5932_v35, %v6899_v5  ;;  %v3858_v8 = vmul.f32 %v3826_v31, %v3730_v7  ;;  %v3692_v57 = vmul.f32 %v6669_v27, %v3653_v59  ;;  %v2610_v46 = vadd.f32 %v2578_v33, %v2542_v10 }
 0x202   : > { %v3568_v20 = vrot.slane %v3455_v15, 2  ;;  %v2213_v44 = vrot.slane %v2098_v45, 1  ;;  %v2214_v63 = vrot.slane %v7042_v54, 1  ;;  %v7050_v62 = vmul.f32 %v5932_v35, %v6901_v21 }
 0x203   : > { %v2458_v24 = vrot.slane %v2343_v18, 2  ;;  %v3890_v41 = vmul.f32 0.16666667, %v3858_v8  ;;  %v3731_v55 = vadd.f32 %v6687_v16, %v3692_v57  ;;  %v2854_v42 = vadd.f32 %v2769_v28, %v2610_v46 }
 0x204   : > { %v2579_v5 = vmul.f32 %v5938_v43, %v6982_v0  ;;  %v2215_v30 = vsel %vm2167_vm3, %v2213_v44, %v2214_v63  ;;  %v2459_v2 = vrot.slane %v7050_v62, 2  ;;  %v2656_v49 = vmul.f32 %v8070_v39, %v6982_v0  ;;  %v7092_v62 = vld [vmem:[#allocation2 + $0x118] sm:$0xff] }
 0x205   : > { %v7061_v7 = vmul.f32 %v8070_v39, %v6984_v58  ;;  %5286 = vmatmul.mubr.msk.f32.gmra.mxu1 %vm1885_vm2, %v3890_v41  ;;  %v3763_v19 = vadd.f32 3.0, %v3731_v55  ;;  %v3098_v23 = vadd.f32 %v3013_v14, %v2854_v42  ;;  %v2298_v40 = vadd.f32 %v2215_v30, %v2021_v12 }
 0x206   : > { %v2900_v33 = vmul.f32 %v8074_v37, %v6982_v0  ;;  %v2460_v4 = vsel %vm2412_vm4, %v2458_v24, %v2459_v2  ;;  %v2770_v17 = vrot.slane %v2656_v49, 1  ;;  %v2901_v25 = vmul.f32 %v8074_v37, %v6984_v58 }
 0x207   : > { %v2771_v51 = vrot.slane %v7061_v7, 1  ;;  %v3795_v1 = vmax.f32 %v3763_v19, 0.0  ;;  %v3166_v36 = vadd.f32 %v3134_v60, %v3098_v23  ;;  %v2543_v50 = vadd.f32 %v2460_v4, %v2298_v40 }
 0x208   : > { %v3014_v52 = vrot.slane %v2900_v33, 2  ;;  %v3569_v13 = vsel %vm2412_vm4, %v3566_v48, %v3568_v20  ;;  %v3015_v53 = vrot.slane %v2901_v25, 2  ;;  %v3212_v28 = vmul.f32 %v8076_v6, %v7064_v22 }
 0x209   : > { %v2772_v38 = vsel %vm2167_vm3, %v2770_v17, %v2771_v51  ;;  %v3827_v14 = vmin.f32 %v3795_v1, 6.0  ;;  %v3410_v9 = vadd.f32 %v3325_v11, %v3166_v36  ;;  %v2611_v15 = vadd.f32 %v2579_v5, %v2543_v50 }
 0x20a   : > { %v3213_v31 = vmul.f32 %v8076_v6, %v7068_v29  ;;  %v3016_v60 = vsel %vm2412_vm4, %v3014_v52, %v3015_v53  ;;  %v3135_v59 = vmul.f32 %v8075_v56, %v7064_v22  ;;  %v3456_v3 = vmul.f32 %v6700_v26, %v7064_v22 }
 0x20b   : > { %v3457_v48 = vmul.f32 %v6700_v26, %v7068_v29  ;;  %v3859_v10 = vmul.f32 %v3827_v14, %v3731_v55  ;;  %v3654_v45 = vadd.f32 %v3569_v13, %v3410_v9  ;;  %v2855_v12 = vadd.f32 %v2772_v38, %v2611_v15 }
 0x20c   : > { %v3327_v54 = vrot.slane %v3213_v31, 1  ;;  %v3326_v11 = vrot.slane %v3212_v28, 1  ;;  %v3570_v18 = vrot.slane %v3456_v3, 2  ;;  %v2100_v57 = vmul.f32 %v5930_v32, %v6929_v61 }
 0x20d   : > { %v3571_v8 = vrot.slane %v3457_v48, 2  ;;  %v3891_v46 = vmul.f32 0.16666667, %v3859_v10  ;;  %v3693_v20 = vmul.f32 %v6669_v27, %v3654_v45  ;;  %v3099_v44 = vadd.f32 %v3016_v60, %v2855_v12 }
 0x20e   : > { %v2022_v24 = vmul.f32 %v5934_v34, %v6901_v21  ;;  %v3328_v41 = vsel %vm2167_vm3, %v3326_v11, %v3327_v54  ;;  %v2216_v42 = vrot.slane %v2100_v57, 1  ;;  %v2345_v5 = vmul.f32 %v5932_v35, %v6929_v61 }
 0x20f   : > { %v3572_v55 = vsel %vm2412_vm4, %v3570_v18, %v3571_v8  ;;  %5288 = vmatprep.mubr.msk.f32.mxu1 %vm1885_vm2, %v3891_v46  ;;  %v3732_v30 = vadd.f32 %v6687_v16, %v3693_v20  ;;  %v3167_v49 = vadd.f32 %v3135_v59, %v3099_v44  ;;  %v2658_v7 = vmul.f32 %v8070_v39, %v7014_v47 }
 0x210   : > { %v2902_v19 = vmul.f32 %v8074_v37, %v7014_v47  ;;  %v2217_v21 = vsel %vm2167_vm3, %v2214_v63, %v2216_v42  ;;  %v2461_v23 = vrot.slane %v2345_v5, 2  ;;  %v2580_v40 = vmul.f32 %v5938_v43, %v6984_v58 }
 0x211   : > { %v3214_v61 = vmul.f32 %v8076_v6, %v7092_v62  ;;  %v3764_v33 = vadd.f32 3.0, %v3732_v30  ;;  %v3411_v4 = vadd.f32 %v3328_v41, %v3167_v49  ;;  %v2299_v17 = vadd.f32 %v2217_v21, %v2022_v24  ;;  %v7140_v41 = vld [vmem:[#allocation2 + $0x120] sm:$0xff]  ;;  %v7152_v49 = vld [vmem:[#allocation2 + $0x128] sm:$0xff] }
 0x212   : > { %v2773_v25 = vrot.slane %v2658_v7, 1  ;;  %v2462_v1 = vsel %vm2412_vm4, %v2459_v2, %v2461_v23  ;;  %v3017_v36 = vrot.slane %v2902_v19, 2  ;;  %v3458_v52 = vmul.f32 %v6700_v26, %v7092_v62 }
 0x213   : > { %v3329_v50 = vrot.slane %v3214_v61, 1  ;;  %v3796_v13 = vmax.f32 %v3764_v33, 0.0  ;;  %v3655_v63 = vadd.f32 %v3572_v55, %v3411_v4  ;;  %v2544_v38 = vadd.f32 %v2462_v1, %v2299_v17 }
 0x214   : > { %v3136_v28 = vmul.f32 %v8075_v56, %v7068_v29  ;;  %v2774_v14 = vsel %vm2167_vm3, %v2771_v51, %v2773_v25  ;;  %v3018_v9 = vsel %vm2412_vm4, %v3015_v53, %v3017_v36  ;;  %v3573_v31 = vrot.slane %v3458_v52, 2 }
 0x215   : > { %v3330_v15 = vsel %vm2167_vm3, %v3327_v54, %v3329_v50  ;;  %v3828_v60 = vmin.f32 %v3796_v13, 6.0  ;;  %v3694_v2 = vmul.f32 %v6669_v27, %v3655_v63  ;;  %v2612_v59 = vadd.f32 %v2580_v40, %v2544_v38 }
 0x216   : > { %v2101_v3 = vmul.f32 %v5930_v32, %v6982_v0  ;;  %v2023_v48 = vmul.f32 %v5934_v34, %v6982_v0  ;;  %v7126_v10 = vmul.f32 %v5930_v32, %v6984_v58  ;;  %v2346_v51 = vmul.f32 %v5932_v35, %v6982_v0 }
 0x217   : > { %v7132_v53 = vmul.f32 %v5932_v35, %v6984_v58  ;;  %v3860_v45 = vmul.f32 %v3828_v60, %v3732_v30  ;;  %v3733_v27 = vadd.f32 %v6687_v16, %v3694_v2  ;;  %v2856_v12 = vadd.f32 %v2774_v14, %v2612_v59  ;;  %v7176_v2 = vld [vmem:[%s8030_s6] ss:$0 sm:$0xff] }
 0x218   : > { %v2218_v54 = vrot.slane %v2101_v3, 1  ;;  %v3574_v11 = vsel %vm2412_vm4, %v3571_v8, %v3573_v31  ;;  %v2219_v18 = vrot.slane %v7126_v10, 1  ;;  %v2463_v57 = vrot.slane %v2346_v51, 2 }
 0x219   : > { %v2464_v46 = vrot.slane %v7132_v53, 2  ;;  %v3892_v20 = vmul.f32 0.16666667, %v3860_v45  ;;  %v3765_v44 = vadd.f32 3.0, %v3733_v27  ;;  %v3100_v24 = vadd.f32 %v3018_v9, %v2856_v12  ;;  %v7190_v12 = vld [vmem:[%s8031_s7] ss:$0 sm:$0xff] }
 0x21a   : > { %v2659_v0 = vmul.f32 %v8070_v39, %v7064_v22  ;;  %v2220_v16 = vsel %vm2167_vm3, %v2218_v54, %v2219_v18  ;;  %v2581_v8 = vmul.f32 %v5938_v43, %v7064_v22  ;;  %v2660_v55 = vmul.f32 %v8070_v39, %v7068_v29 }
 0x21b   : > { %v2903_v42 = vmul.f32 %v8074_v37, %v7064_v22  ;;  %5289 = vmatmul.mubr.msk.f32.gmra.mxu1 %vm1885_vm2, %v3892_v20  ;;  %v3797_v5 = vmax.f32 %v3765_v44, 0.0  ;;  %v3168_v30 = vadd.f32 %v3136_v28, %v3100_v24  ;;  %v2300_v7 = vadd.f32 %v2220_v16, %v2023_v48  ;;  %v7194_v20 = vld [vmem:[#allocation2 + $0x130] sm:$0xff] }
 0x21c   : > { %v2465_v19 = vsel %vm2412_vm4, %v2463_v57, %v2464_v46  ;;  %v2775_v21 = vrot.slane %v2659_v0, 1  ;;  %v2776_v23 = vrot.slane %v2660_v55, 1  ;;  %v2904_v40 = vmul.f32 %v8074_v37, %v7068_v29 }
 0x21d   : > { %v3019_v61 = vrot.slane %v2903_v42, 2  ;;  %v3829_v33 = vmin.f32 %v3797_v5, 6.0  ;;  %v3412_v4 = vadd.f32 %v3330_v15, %v3168_v30  ;;  %v2545_v17 = vadd.f32 %v2465_v19, %v2300_v7 }
 0x21e   : > { %v3215_v25 = vmul.f32 %v8076_v6, %v7140_v41  ;;  %v2777_v1 = vsel %vm2167_vm3, %v2775_v21, %v2776_v23  ;;  %v3020_v36 = vrot.slane %v2904_v40, 2  ;;  %v3216_v50 = vmul.f32 %v8076_v6, %v7152_v49 }
 0x21f   : > { %v3459_v52 = vmul.f32 %v6700_v26, %v7140_v41  ;;  %v3861_v13 = vmul.f32 %v3829_v33, %v3733_v27  ;;  %v3656_v63 = vadd.f32 %v3574_v11, %v3412_v4  ;;  %v2613_v38 = vadd.f32 %v2581_v8, %v2545_v17 }
 0x220   : > { %v3331_v28 = vrot.slane %v3215_v25, 1  ;;  %v3021_v14 = vsel %vm2412_vm4, %v3019_v61, %v3020_v36  ;;  %v3137_v9 = vmul.f32 %v8075_v56, %v7140_v41  ;;  %v3332_v15 = vrot.slane %v3216_v50, 1 }
 0x221   : > { %v7171_v31 = vmul.f32 %v6700_v26, %v7152_v49  ;;  %v3893_v60 = vmul.f32 0.16666667, %v3861_v13  ;;  %v3695_v59 = vmul.f32 %v7176_v2, %v3656_v63  ;;  %v2857_v3 = vadd.f32 %v2777_v1, %v2613_v38 }
 0x222   : > { %v3575_v48 = vrot.slane %v3459_v52, 2  ;;  %v3333_v51 = vsel %vm2167_vm3, %v3331_v28, %v3332_v15  ;;  %v2024_v45 = vmul.f32 %v5934_v34, %v6984_v58  ;;  %v2103_v27 = vmul.f32 %v5930_v32, %v7014_v47 }
 0x223   : > { %v2348_v26 = vmul.f32 %v5932_v35, %v7014_v47  ;;  %5291 = vmatprep.mubr.msk.f32.mxu1 %vm1885_vm2, %v3893_v60  ;;  %v3734_v54 = vadd.f32 %v7190_v12, %v3695_v59  ;;  %v3101_v11 = vadd.f32 %v3021_v14, %v2857_v3  ;;  %v3576_v57 = vrot.slane %v7171_v31, 2 }
 0x224   : > { %v2661_v58 = vmul.f32 %v8070_v39, %v7092_v62  ;;  %v2221_v44 = vrot.slane %v2103_v27, 1  ;;  %v2582_v47 = vmul.f32 %v5938_v43, %v7068_v29  ;;  %v2905_v0 = vmul.f32 %v8074_v37, %v7092_v62 }
 0x225   : > { %v2466_v24 = vrot.slane %v2348_v26, 2  ;;  %v3766_v16 = vadd.f32 3.0, %v3734_v54  ;;  %v3169_v8 = vadd.f32 %v3137_v9, %v3101_v11  ;;  %v3577_v55 = vsel %vm2412_vm4, %v3575_v48, %v3576_v57 }
 0x226   : > { %v2778_v42 = vrot.slane %v2661_v58, 1  ;;  %v2222_v5 = vsel %vm2167_vm3, %v2219_v18, %v2221_v44  ;;  %v3022_v30 = vrot.slane %v2905_v0, 2  ;;  %v3138_v7 = vmul.f32 %v8075_v56, %v7152_v49  ;;  %v7220_v18 = vld [vmem:[%s8029_s5 + $0x8] ss:$0 sm:$0xff]  ;;  %v7253_v44 = vld [vmem:[#allocation2 + $0x138] sm:$0xff]  ;;  %v7257_v0 = vld [vmem:[#allocation2 + $0x140] sm:$0xff] }
 0x227   : > { %v3217_v19 = vmul.f32 %v8076_v6, %v7194_v20  ;;  %v3798_v21 = vmax.f32 %v3766_v16, 0.0  ;;  %v3413_v40 = vadd.f32 %v3333_v51, %v3169_v8  ;;  %v2301_v61 = vadd.f32 %v2222_v5, %v2024_v45 }
 0x228   : > { %v2467_v33 = vsel %vm2412_vm4, %v2464_v46, %v2466_v24  ;;  %v2779_v4 = vsel %vm2167_vm3, %v2776_v23, %v2778_v42  ;;  %v3023_v10 = vsel %vm2412_vm4, %v3020_v36, %v3022_v30  ;;  %v3461_v25 = vmul.f32 %v7220_v18, %v7194_v20 }
 0x229   : > { %v3334_v17 = vrot.slane %v3217_v19, 1  ;;  %v3830_v1 = vmin.f32 %v3798_v21, 6.0  ;;  %v3657_v50 = vadd.f32 %v3577_v55, %v3413_v40  ;;  %v2546_v52 = vadd.f32 %v2467_v33, %v2301_v61 }
 0x22a   : > { %v2104_v53 = vmul.f32 %v5930_v32, %v7064_v22  ;;  %v2025_v23 = vmul.f32 %v5934_v34, %v7064_v22  ;;  %v7231_v36 = vmul.f32 %v5930_v32, %v7068_v29  ;;  %v2349_v13 = vmul.f32 %v5932_v35, %v7064_v22 }
 0x22b   : > { %v3335_v46 = vsel %vm2167_vm3, %v3332_v15, %v3334_v17  ;;  %v3862_v63 = vmul.f32 %v3830_v1, %v3734_v54  ;;  %v3696_v38 = vmul.f32 %v7176_v2, %v3657_v50  ;;  %v2614_v28 = vadd.f32 %v2582_v47, %v2546_v52 }
 0x22c   : > { %v3578_v14 = vrot.slane %v3461_v25, 2  ;;  %v2223_v9 = vrot.slane %v2104_v53, 1  ;;  %v2224_v60 = vrot.slane %v7231_v36, 1  ;;  %v7239_v15 = vmul.f32 %v5932_v35, %v7068_v29 }
 0x22d   : > { %v2468_v59 = vrot.slane %v2349_v13, 2  ;;  %v3894_v3 = vmul.f32 0.16666667, %v3862_v63  ;;  %v3735_v48 = vadd.f32 %v7190_v12, %v3696_v38  ;;  %v2858_v51 = vadd.f32 %v2779_v4, %v2614_v28 }
 0x22e   : > { %v2583_v22 = vmul.f32 %v5938_v43, %v7140_v41  ;;  %v2225_v45 = vsel %vm2167_vm3, %v2223_v9, %v2224_v60  ;;  %v2469_v27 = vrot.slane %v7239_v15, 2  ;;  %v2662_v26 = vmul.f32 %v8070_v39, %v7140_v41  ;;  %v7281_v15 = vld [vmem:[#allocation2 + $0x148] sm:$0xff] }
 0x22f   : > { %v7250_v54 = vmul.f32 %v8070_v39, %v7152_v49  ;;  %5292 = vmatmul.mubr.msk.f32.gmra.mxu1 %vm1885_vm2, %v3894_v3  ;;  %v3767_v11 = vadd.f32 3.0, %v3735_v48  ;;  %v3102_v58 = vadd.f32 %v3023_v10, %v2858_v51  ;;  %v2302_v24 = vadd.f32 %v2225_v45, %v2025_v23 }
 0x230   : > { %v2906_v47 = vmul.f32 %v8074_v37, %v7140_v41  ;;  %v2470_v16 = vsel %vm2412_vm4, %v2468_v59, %v2469_v27  ;;  %v2780_v8 = vrot.slane %v2662_v26, 1  ;;  %v2907_v42 = vmul.f32 %v8074_v37, %v7152_v49 }
 0x231   : > { %v2781_v55 = vrot.slane %v7250_v54, 1  ;;  %v3799_v5 = vmax.f32 %v3767_v11, 0.0  ;;  %v3170_v30 = vadd.f32 %v3138_v7, %v3102_v58  ;;  %v2547_v19 = vadd.f32 %v2470_v16, %v2302_v24 }
 0x232   : > { %v3024_v21 = vrot.slane %v2906_v47, 2  ;;  %v3579_v40 = vsel %vm2412_vm4, %v3576_v57, %v3578_v14  ;;  %v3025_v33 = vrot.slane %v2907_v42, 2  ;;  %v3218_v4 = vmul.f32 %v8076_v6, %v7253_v44 }
 0x233   : > { %v2782_v61 = vsel %vm2167_vm3, %v2780_v8, %v2781_v55  ;;  %v3831_v10 = vmin.f32 %v3799_v5, 6.0  ;;  %v3414_v17 = vadd.f32 %v3335_v46, %v3170_v30  ;;  %v2615_v25 = vadd.f32 %v2583_v22, %v2547_v19 }
 0x234   : > { %v3219_v1 = vmul.f32 %v8076_v6, %v7257_v0  ;;  %v3026_v7 = vsel %vm2412_vm4, %v3024_v21, %v3025_v33  ;;  %v3139_v50 = vmul.f32 %v8075_v56, %v7253_v44  ;;  %v3462_v31 = vmul.f32 %v7220_v18, %v7253_v44 }
 0x235   : > { %v3463_v57 = vmul.f32 %v7220_v18, %v7257_v0  ;;  %v3863_v52 = vmul.f32 %v3831_v10, %v3735_v48  ;;  %v3658_v53 = vadd.f32 %v3579_v40, %v3414_v17  ;;  %v2859_v23 = vadd.f32 %v2782_v61, %v2615_v25 }
 0x236   : > { %v3337_v36 = vrot.slane %v3219_v1, 1  ;;  %v3336_v46 = vrot.slane %v3218_v4, 1  ;;  %v3580_v13 = vrot.slane %v3462_v31, 2  ;;  %v2106_v38 = vmul.f32 %v5930_v32, %v7092_v62 }
 0x237   : > { %v3581_v63 = vrot.slane %v3463_v57, 2  ;;  %v3895_v28 = vmul.f32 0.16666667, %v3863_v52  ;;  %v3697_v14 = vmul.f32 %v7176_v2, %v3658_v53  ;;  %v3103_v9 = vadd.f32 %v3026_v7, %v2859_v23 }
 0x238   : > { %v2026_v59 = vmul.f32 %v5934_v34, %v7068_v29  ;;  %v3338_v3 = vsel %vm2167_vm3, %v3336_v46, %v3337_v36  ;;  %v2226_v51 = vrot.slane %v2106_v38, 1  ;;  %v2351_v22 = vmul.f32 %v5932_v35, %v7092_v62 }
 0x239   : > { %v3582_v48 = vsel %vm2412_vm4, %v3580_v13, %v3581_v63  ;;  %5294 = vmatprep.mubr.msk.f32.mxu1 %vm1885_vm2, %v3895_v28  ;;  %v3736_v45 = vadd.f32 %v7190_v12, %v3697_v14  ;;  %v3171_v26 = vadd.f32 %v3139_v50, %v3103_v9  ;;  %v2664_v54 = vmul.f32 %v8070_v39, %v7194_v20 }
 0x23a   : > { %v2908_v11 = vmul.f32 %v8074_v37, %v7194_v20  ;;  %v2227_v29 = vsel %vm2167_vm3, %v2224_v60, %v2226_v51  ;;  %v2471_v58 = vrot.slane %v2351_v22, 2  ;;  %v2584_v24 = vmul.f32 %v5938_v43, %v7152_v49 }
 0x23b   : > { %v3220_v62 = vmul.f32 %v8076_v6, %v7281_v15  ;;  %v3768_v47 = vadd.f32 3.0, %v3736_v45  ;;  %v3415_v16 = vadd.f32 %v3338_v3, %v3171_v26  ;;  %v2303_v8 = vadd.f32 %v2227_v29, %v2026_v59 }
 0x23c   : > { %v2783_v42 = vrot.slane %v2664_v54, 1  ;;  %v2472_v5 = vsel %vm2412_vm4, %v2469_v27, %v2471_v58  ;;  %v3027_v30 = vrot.slane %v2908_v11, 2  ;;  %v3464_v21 = vmul.f32 %v7220_v18, %v7281_v15  ;;  %v7339_v11 = vld [vmem:[#allocation2 + $0x158] sm:$0xff] }
 0x23d   : > { %v3339_v19 = vrot.slane %v3220_v62, 1  ;;  %v3800_v40 = vmax.f32 %v3768_v47, 0.0  ;;  %v3659_v60 = vadd.f32 %v3582_v48, %v3415_v16  ;;  %v2548_v61 = vadd.f32 %v2472_v5, %v2303_v8  ;;  %v7329_v48 = vld [vmem:[#allocation2 + $0x150] sm:$0xff] }
 0x23e   : > { %v3140_v4 = vmul.f32 %v8075_v56, %v7257_v0  ;;  %v2784_v10 = vsel %vm2167_vm3, %v2781_v55, %v2783_v42  ;;  %v3028_v17 = vsel %vm2412_vm4, %v3025_v33, %v3027_v30  ;;  %v3583_v1 = vrot.slane %v3464_v21, 2 }
 0x23f   : > { %v3340_v25 = vsel %vm2167_vm3, %v3337_v36, %v3339_v19  ;;  %v3832_v7 = vmin.f32 %v3800_v40, 6.0  ;;  %v3698_v27 = vmul.f32 %v7176_v2, %v3659_v60  ;;  %v2616_v50 = vadd.f32 %v2584_v24, %v2548_v61 }
 0x240   : > { %v2107_v31 = vmul.f32 %v5930_v32, %v7140_v41  ;;  %v2027_v57 = vmul.f32 %v5934_v34, %v7140_v41  ;;  %v7315_v52 = vmul.f32 %v5930_v32, %v7152_v49  ;;  %v2352_v55 = vmul.f32 %v5932_v35, %v7140_v41 }
 0x241   : > { %v7321_v33 = vmul.f32 %v5932_v35, %v7152_v49  ;;  %v3864_v53 = vmul.f32 %v3832_v7, %v3736_v45  ;;  %v3737_v23 = vadd.f32 %v7190_v12, %v3698_v27  ;;  %v2860_v36 = vadd.f32 %v2784_v10, %v2616_v50 }
 0x242   : > { %v2228_v46 = vrot.slane %v2107_v31, 1  ;;  %v3584_v13 = vsel %vm2412_vm4, %v3581_v63, %v3583_v1  ;;  %v2229_v38 = vrot.slane %v7315_v52, 1  ;;  %v2473_v28 = vrot.slane %v2352_v55, 2 }
 0x243   : > { %v2474_v14 = vrot.slane %v7321_v33, 2  ;;  %v3896_v9 = vmul.f32 0.16666667, %v3864_v53  ;;  %v3769_v59 = vadd.f32 3.0, %v3737_v23  ;;  %v3104_v3 = vadd.f32 %v3028_v17, %v2860_v36 }
 0x244   : > { %v2665_v41 = vmul.f32 %v8070_v39, %v7253_v44  ;;  %v2230_v51 = vsel %vm2167_vm3, %v2228_v46, %v2229_v38  ;;  %v2585_v22 = vmul.f32 %v5938_v43, %v7253_v44  ;;  %v2666_v63 = vmul.f32 %v8070_v39, %v7257_v0 }
 0x245   : > { %v2909_v45 = vmul.f32 %v8074_v37, %v7253_v44  ;;  %5295 = vmatmul.mubr.msk.f32.gmra.mxu1 %vm1885_vm2, %v3896_v9  ;;  %v3801_v26 = vmax.f32 %v3769_v59, 0.0  ;;  %v3172_v54 = vadd.f32 %v3140_v4, %v3104_v3  ;;  %v2304_v29 = vadd.f32 %v2230_v51, %v2027_v57 }
 0x246   : > { %v2475_v58 = vsel %vm2412_vm4, %v2473_v28, %v2474_v14  ;;  %v2785_v24 = vrot.slane %v2665_v41, 1  ;;  %v2786_v62 = vrot.slane %v2666_v63, 1  ;;  %v2910_v47 = vmul.f32 %v8074_v37, %v7257_v0  ;;  %v7370_v28 = vld [vmem:[#allocation2 + $0x160] sm:$0xff] }
 0x247   : > { %v3029_v16 = vrot.slane %v2909_v45, 2  ;;  %v3833_v8 = vmin.f32 %v3801_v26, 6.0  ;;  %v3416_v42 = vadd.f32 %v3340_v25, %v3172_v54  ;;  %v2549_v5 = vadd.f32 %v2475_v58, %v2304_v29 }
 0x248   : > { %v3221_v30 = vmul.f32 %v8076_v6, %v7329_v48  ;;  %v2787_v19 = vsel %vm2167_vm3, %v2785_v24, %v2786_v62  ;;  %v3030_v21 = vrot.slane %v2910_v47, 2  ;;  %v3222_v40 = vmul.f32 %v8076_v6, %v7339_v11 }
 0x249   : > { %v3465_v60 = vmul.f32 %v7220_v18, %v7329_v48  ;;  %v3865_v61 = vmul.f32 %v3833_v8, %v3737_v23  ;;  %v3660_v4 = vadd.f32 %v3584_v13, %v3416_v42  ;;  %v2617_v10 = vadd.f32 %v2585_v22, %v2549_v5 }
 0x24a   : > { %v3031_v17 = vsel %vm2412_vm4, %v3029_v16, %v3030_v21  ;;  %v3141_v25 = vmul.f32 %v8075_v56, %v7329_v48  ;;  %v3341_v1 = vrot.slane %v3221_v30, 1  ;;  %v7358_v7 = vmul.f32 %v7220_v18, %v7339_v11 }
 0x24b   : > { %v3897_v27 = vmul.f32 0.16666667, %v3865_v61  ;;  %v3699_v50 = vmul.f32 %v7176_v2, %v3660_v4  ;;  %v2861_v31 = vadd.f32 %v2787_v19, %v2617_v10  ;;  %v3585_v57 = vrot.slane %v3465_v60, 2 }
 0x24c   : > { %v3342_v52 = vrot.slane %v3222_v40, 1  ;;  %v2028_v55 = vmul.f32 %v5934_v34, %v7152_v49  ;;  %v2109_v53 = vmul.f32 %v5930_v32, %v7194_v20  ;;  %v2354_v23 = vmul.f32 %v5932_v35, %v7194_v20 }
 0x24d   : > { %5297 = vmatprep.mubr.msk.f32.mxu1 %vm1885_vm2, %v3897_v27  ;;  %v3738_v36 = vadd.f32 %v7190_v12, %v3699_v50  ;;  %v3105_v46 = vadd.f32 %v3031_v17, %v2861_v31  ;;  %v3586_v13 = vrot.slane %v7358_v7, 2  ;;  %v2667_v9 = vmul.f32 %v8070_v39, %v7281_v15 }
 0x24e   : > { %v3343_v49 = vsel %vm2167_vm3, %v3341_v1, %v3342_v52  ;;  %v2231_v59 = vrot.slane %v2109_v53, 1  ;;  %v2476_v3 = vrot.slane %v2354_v23, 2  ;;  %v2911_v41 = vmul.f32 %v8074_v37, %v7281_v15 }
 0x24f   : > { %v3770_v20 = vadd.f32 3.0, %v3738_v36  ;;  %v3173_v51 = vadd.f32 %v3141_v25, %v3105_v46  ;;  %v3587_v22 = vsel %vm2412_vm4, %v3585_v57, %v3586_v13  ;;  %v2586_v63 = vmul.f32 %v5938_v43, %v7257_v0 }
 0x250   : > { %v2232_v45 = vsel %vm2167_vm3, %v2229_v38, %v2231_v59  ;;  %v2788_v26 = vrot.slane %v2667_v9, 1  ;;  %v3142_v54 = vmul.f32 %v8075_v56, %v7339_v11  ;;  %v3223_v29 = vmul.f32 %v8076_v6, %v7370_v28 }
 0x251   : > { %v3802_v58 = vmax.f32 %v3770_v20, 0.0  ;;  %v3417_v24 = vadd.f32 %v3343_v49, %v3173_v51  ;;  %v2305_v47 = vadd.f32 %v2232_v45, %v2028_v55  ;;  %v2477_v16 = vsel %vm2412_vm4, %v2474_v14, %v2476_v3  ;;  %v7421_v49 = vld [vmem:[#allocation2 + $0x168] sm:$0xff] }
 0x252   : > { %v2789_v8 = vsel %vm2167_vm3, %v2786_v62, %v2788_v26  ;;  %v3032_v42 = vrot.slane %v2911_v41, 2  ;;  %v3344_v5 = vrot.slane %v3223_v29, 1  ;;  %v3467_v38 = vmul.f32 %v7220_v18, %v7370_v28  ;;  %v7425_v41 = vld [vmem:[#allocation2 + $0x170] sm:$0xff] }
 0x253   : > { %v3834_v30 = vmin.f32 %v3802_v58, 6.0  ;;  %v3661_v19 = vadd.f32 %v3587_v22, %v3417_v24  ;;  %v2550_v40 = vadd.f32 %v2477_v16, %v2305_v47  ;;  %v2110_v60 = vmul.f32 %v5930_v32, %v7253_v44 }
 0x254   : > { %v3033_v61 = vsel %vm2412_vm4, %v3030_v21, %v3032_v42  ;;  %v2029_v33 = vmul.f32 %v5934_v34, %v7253_v44  ;;  %v7400_v14 = vmul.f32 %v5930_v32, %v7257_v0  ;;  %v2355_v62 = vmul.f32 %v5932_v35, %v7253_v44 }
 0x255   : > { %v3866_v4 = vmul.f32 %v3834_v30, %v3738_v36  ;;  %v3700_v10 = vmul.f32 %v7176_v2, %v3661_v19  ;;  %v2618_v17 = vadd.f32 %v2586_v63, %v2550_v40  ;;  %v3345_v25 = vsel %vm2167_vm3, %v3342_v52, %v3344_v5 }
 0x256   : > { %v3588_v1 = vrot.slane %v3467_v38, 2  ;;  %v2233_v27 = vrot.slane %v2110_v60, 1  ;;  %v2234_v21 = vrot.slane %v7400_v14, 1  ;;  %v7409_v50 = vmul.f32 %v5932_v35, %v7257_v0 }
 0x257   : > { %v3898_v31 = vmul.f32 0.16666667, %v3866_v4  ;;  %v3739_v57 = vadd.f32 %v7190_v12, %v3700_v10  ;;  %v2862_v55 = vadd.f32 %v2789_v8, %v2618_v17  ;;  %v2478_v53 = vrot.slane %v2355_v62, 2 }
 0x258   : > { %v2235_v44 = vsel %vm2167_vm3, %v2233_v27, %v2234_v21  ;;  %v2479_v23 = vrot.slane %v7409_v50, 2  ;;  %v2668_v52 = vmul.f32 %v8070_v39, %v7329_v48  ;;  %v7418_v36 = vmul.f32 %v8070_v39, %v7339_v11  ;;  %v7451_v50 = vld [vmem:[#allocation2 + $0x178] sm:$0xff] }
 0x259   : > { %5298 = vmatmul.mubr.msk.f32.gmra.mxu1 %vm1885_vm2, %v3898_v31  ;;  %v3771_v46 = vadd.f32 3.0, %v3739_v57  ;;  %v3106_v9 = vadd.f32 %v3033_v61, %v2862_v55  ;;  %v2306_v59 = vadd.f32 %v2235_v44, %v2029_v33  ;;  %v2912_v3 = vmul.f32 %v8074_v37, %v7329_v48 }
 0x25a   : > { %v2480_v20 = vsel %vm2412_vm4, %v2478_v53, %v2479_v23  ;;  %v2790_v51 = vrot.slane %v2668_v52, 1  ;;  %v2791_v22 = vrot.slane %v7418_v36, 1  ;;  %v2913_v63 = vmul.f32 %v8074_v37, %v7339_v11 }
 0x25b   : > { %v3803_v45 = vmax.f32 %v3771_v46, 0.0  ;;  %v3174_v26 = vadd.f32 %v3142_v54, %v3106_v9  ;;  %v2551_v29 = vadd.f32 %v2480_v20, %v2306_v59  ;;  %v2587_v58 = vmul.f32 %v5938_v43, %v7329_v48 }
 0x25c   : > { %v3589_v24 = vsel %vm2412_vm4, %v3586_v13, %v3588_v1  ;;  %v2792_v47 = vsel %vm2167_vm3, %v2790_v51, %v2791_v22  ;;  %v3034_v16 = vrot.slane %v2912_v3, 2  ;;  %v3224_v8 = vmul.f32 %v8076_v6, %v7421_v49 }
 0x25d   : > { %v3835_v42 = vmin.f32 %v3803_v45, 6.0  ;;  %v3418_v5 = vadd.f32 %v3345_v25, %v3174_v26  ;;  %v2619_v38 = vadd.f32 %v2587_v58, %v2551_v29  ;;  %v3225_v54 = vmul.f32 %v8076_v6, %v7425_v41 }
 0x25e   : > { %v3035_v30 = vrot.slane %v2913_v63, 2  ;;  %v3143_v19 = vmul.f32 %v8075_v56, %v7421_v49  ;;  %v3468_v7 = vmul.f32 %v7220_v18, %v7421_v49  ;;  %v3469_v13 = vmul.f32 %v7220_v18, %v7425_v41 }
 0x25f   : > { %v3867_v40 = vmul.f32 %v3835_v42, %v3739_v57  ;;  %v3662_v60 = vadd.f32 %v3589_v24, %v3418_v5  ;;  %v2863_v61 = vadd.f32 %v2792_v47, %v2619_v38  ;;  %v3347_v33 = vrot.slane %v3225_v54, 1 }
 0x260   : > { %v3036_v14 = vsel %vm2412_vm4, %v3034_v16, %v3035_v30  ;;  %v3346_v62 = vrot.slane %v3224_v8, 1  ;;  %v3591_v4 = vrot.slane %v3469_v13, 2  ;;  %v2112_v10 = vmul.f32 %v5930_v32, %v7281_v15 }
 0x261   : > { %v3899_v17 = vmul.f32 0.16666667, %v3867_v40  ;;  %v3701_v25 = vmul.f32 %v7176_v2, %v3662_v60  ;;  %v3107_v1 = vadd.f32 %v3036_v14, %v2863_v61  ;;  %v3590_v27 = vrot.slane %v3468_v7, 2 }
 0x262   : > { %v3348_v31 = vsel %vm2167_vm3, %v3346_v62, %v3347_v33  ;;  %v2030_v57 = vmul.f32 %v5934_v34, %v7257_v0  ;;  %v2236_v55 = vrot.slane %v2112_v10, 1  ;;  %v2357_v53 = vmul.f32 %v5932_v35, %v7281_v15 }
 0x263   : > { %5300 = vmatprep.mubr.msk.f32.mxu1 %vm1885_vm2, %v3899_v17  ;;  %v3740_v44 = vadd.f32 %v7190_v12, %v3701_v25  ;;  %v3175_v52 = vadd.f32 %v3143_v19, %v3107_v1  ;;  %v2670_v36 = vmul.f32 %v8070_v39, %v7370_v28  ;;  %v2914_v46 = vmul.f32 %v8074_v37, %v7370_v28 }
 0x264   : > { %v3592_v9 = vsel %vm2412_vm4, %v3590_v27, %v3591_v4  ;;  %v2237_v59 = vsel %vm2167_vm3, %v2234_v21, %v2236_v55  ;;  %v2481_v0 = vrot.slane %v2357_v53, 2  ;;  %v3226_v3 = vmul.f32 %v8076_v6, %v7451_v50  ;;  %v7498_v55 = vld [vmem:[#allocation2 + $0x180] sm:$0xff] }
 0x265   : > { %v3772_v15 = vadd.f32 3.0, %v3740_v44  ;;  %v3419_v20 = vadd.f32 %v3348_v31, %v3175_v52  ;;  %v2307_v51 = vadd.f32 %v2237_v59, %v2030_v57  ;;  %v2793_v63 = vrot.slane %v2670_v36, 1 }
 0x266   : > { %v2482_v45 = vsel %vm2412_vm4, %v2479_v23, %v2481_v0  ;;  %v3037_v26 = vrot.slane %v2914_v46, 2  ;;  %v3349_v29 = vrot.slane %v3226_v3, 1  ;;  %v3470_v58 = vmul.f32 %v7220_v18, %v7451_v50  ;;  %v7507_v46 = vld [vmem:[#allocation2 + $0x188] sm:$0xff] }
 0x267   : > { %v3804_v24 = vmax.f32 %v3772_v15, 0.0  ;;  %v3663_v47 = vadd.f32 %v3592_v9, %v3419_v20  ;;  %v2552_v16 = vadd.f32 %v2482_v45, %v2307_v51  ;;  %v2588_v21 = vmul.f32 %v5938_v43, %v7339_v11 }
 0x268   : > { %v2794_v8 = vsel %vm2167_vm3, %v2791_v22, %v2793_v63  ;;  %v3038_v42 = vsel %vm2412_vm4, %v3035_v30, %v3037_v26  ;;  %v3144_v5 = vmul.f32 %v8075_v56, %v7425_v41  ;;  %v3350_v23 = vsel %vm2167_vm3, %v3347_v33, %v3349_v29 }
 0x269   : > { %v3836_v38 = vmin.f32 %v3804_v24, 6.0  ;;  %v3702_v54 = vmul.f32 %v7176_v2, %v3663_v47  ;;  %v2620_v19 = vadd.f32 %v2588_v21, %v2552_v16  ;;  %v2113_v7 = vmul.f32 %v5930_v32, %v7329_v48 }
 0x26a   : > { %v3593_v13 = vrot.slane %v3470_v58, 2  ;;  %v7483_v40 = vmul.f32 %v5930_v32, %v7339_v11  ;;  %v2358_v22 = vmul.f32 %v5932_v35, %v7329_v48  ;;  %v7489_v30 = vmul.f32 %v5932_v35, %v7339_v11 }
 0x26b   : > { %v3868_v60 = vmul.f32 %v3836_v38, %v3740_v44  ;;  %v3741_v61 = vadd.f32 %v7190_v12, %v3702_v54  ;;  %v2864_v33 = vadd.f32 %v2794_v8, %v2620_v19  ;;  %v2238_v14 = vrot.slane %v2113_v7, 1 }
 0x26c   : > { %v3594_v62 = vsel %vm2412_vm4, %v3591_v4, %v3593_v13  ;;  %v2031_v10 = vmul.f32 %v5934_v34, %v7329_v48  ;;  %v2239_v17 = vrot.slane %v7483_v40, 1  ;;  %v2483_v25 = vrot.slane %v2358_v22, 2 }
 0x26d   : > { %v3900_v1 = vmul.f32 0.16666667, %v3868_v60  ;;  %v3773_v27 = vadd.f32 3.0, %v3741_v61  ;;  %v3108_v31 = vadd.f32 %v3038_v42, %v2864_v33  ;;  %v2671_v57 = vmul.f32 %v8070_v39, %v7421_v49 }
 0x26e   : > { %v2240_v53 = vsel %vm2167_vm3, %v2238_v14, %v2239_v17  ;;  %v2484_v44 = vrot.slane %v7489_v30, 2  ;;  %v2589_v4 = vmul.f32 %v5938_v43, %v7421_v49  ;;  %v2672_v48 = vmul.f32 %v8070_v39, %v7425_v41  ;;  %v7535_v14 = vld [vmem:[#allocation2 + $0x190] sm:$0xff] }
 0x26f   : > { %5301 = vmatmul.mubr.msk.f32.gmra.mxu1 %vm1885_vm2, %v3900_v1  ;;  %v3805_v52 = vmax.f32 %v3773_v27, 0.0  ;;  %v3176_v36 = vadd.f32 %v3144_v5, %v3108_v31  ;;  %v2308_v9 = vadd.f32 %v2240_v53, %v2031_v10  ;;  %v2915_v59 = vmul.f32 %v8074_v37, %v7421_v49 }
 0x270   : > { %v2485_v0 = vsel %vm2412_vm4, %v2483_v25, %v2484_v44  ;;  %v2795_v3 = vrot.slane %v2671_v57, 1  ;;  %v2796_v15 = vrot.slane %v2672_v48, 1  ;;  %v2916_v20 = vmul.f32 %v8074_v37, %v7425_v41 }
 0x271   : > { %v3837_v51 = vmin.f32 %v3805_v52, 6.0  ;;  %v3420_v63 = vadd.f32 %v3350_v23, %v3176_v36  ;;  %v2553_v45 = vadd.f32 %v2485_v0, %v2308_v9  ;;  %v3227_v26 = vmul.f32 %v8076_v6, %v7498_v55 }
 0x272   : > { %v2797_v29 = vsel %vm2167_vm3, %v2795_v3, %v2796_v15  ;;  %v3040_v58 = vrot.slane %v2916_v20, 2  ;;  %v3228_v24 = vmul.f32 %v8076_v6, %v7507_v46  ;;  %v3471_v47 = vmul.f32 %v7220_v18, %v7498_v55 }
 0x273   : > { %v3869_v16 = vmul.f32 %v3837_v51, %v3741_v61  ;;  %v3664_v21 = vadd.f32 %v3594_v62, %v3420_v63  ;;  %v2621_v8 = vadd.f32 %v2589_v4, %v2553_v45  ;;  %v3039_v42 = vrot.slane %v2915_v59, 2 }
 0x274   : > { %v3145_v5 = vmul.f32 %v8075_v56, %v7498_v55  ;;  %v3351_v23 = vrot.slane %v3227_v26, 1  ;;  %v7525_v38 = vmul.f32 %v7220_v18, %v7507_v46  ;;  %v3352_v40 = vrot.slane %v3228_v24, 1 }
 0x275   : > { %v3901_v54 = vmul.f32 0.16666667, %v3869_v16  ;;  %v3703_v19 = vmul.f32 %v7176_v2, %v3664_v21  ;;  %v2865_v7 = vadd.f32 %v2797_v29, %v2621_v8  ;;  %v3041_v13 = vsel %vm2412_vm4, %v3039_v42, %v3040_v58 }
 0x276   : > { %v3595_v22 = vrot.slane %v3471_v47, 2  ;;  %v2115_v30 = vmul.f32 %v5930_v32, %v7370_v28  ;;  %v2360_v60 = vmul.f32 %v5932_v35, %v7370_v28  ;;  %v2032_v62 = vmul.f32 %v5934_v34, %v7339_v11 }
 0x277   : > { %5303 = vmatprep.mubr.msk.f32.mxu1 %vm1885_vm2, %v3901_v54  ;;  %v3742_v61 = vadd.f32 %v7190_v12, %v3703_v19  ;;  %v3109_v33 = vadd.f32 %v3041_v13, %v2865_v7  ;;  %v2673_v10 = vmul.f32 %v8070_v39, %v7451_v50  ;;  %v3596_v25 = vrot.slane %v7525_v38, 2 }
 0x278   : > { %v2241_v1 = vrot.slane %v2115_v30, 1  ;;  %v2486_v27 = vrot.slane %v2360_v60, 2  ;;  %v2917_v28 = vmul.f32 %v8074_v37, %v7451_v50  ;;  %v3353_v53 = vsel %vm2167_vm3, %v3351_v23, %v3352_v40 }
 0x279   : > { %v3774_v31 = vadd.f32 3.0, %v3742_v61  ;;  %v3177_v57 = vadd.f32 %v3145_v5, %v3109_v33  ;;  %v2590_v4 = vmul.f32 %v5938_v43, %v7425_v41  ;;  %v3597_v11 = vsel %vm2412_vm4, %v3595_v22, %v3596_v25 }
 0x27a   : > { %v2242_v48 = vsel %vm2167_vm3, %v2239_v17, %v2241_v1  ;;  %v2798_v52 = vrot.slane %v2673_v10, 1  ;;  %v3229_v36 = vmul.f32 %v8076_v6, %v7535_v14  ;;  %v3146_v3 = vmul.f32 %v8075_v56, %v7507_v46  ;;  %v1996_v10 = vld [vmem:[#allocation2 + $0x198] sm:$0xff] }
 0x27b   : > { %v3806_v9 = vmax.f32 %v3774_v31, 0.0  ;;  %v3421_v59 = vadd.f32 %v3353_v53, %v3177_v57  ;;  %v2309_v0 = vadd.f32 %v2242_v48, %v2032_v62  ;;  %v2487_v20 = vsel %vm2412_vm4, %v2484_v44, %v2486_v27  ;;  %v7589_v31 = vld [vmem:[#allocation2 + $0x1a0] sm:$0xff] }
 0x27c   : > { %v2799_v51 = vsel %vm2167_vm3, %v2796_v15, %v2798_v52  ;;  %v3042_v63 = vrot.slane %v2917_v28, 2  ;;  %v3354_v45 = vrot.slane %v3229_v36, 1  ;;  %v2116_v17 = vmul.f32 %v5930_v32, %v7421_v49 }
 0x27d   : > { %v3838_v26 = vmin.f32 %v3806_v9, 6.0  ;;  %v3665_v29 = vadd.f32 %v3597_v11, %v3421_v59  ;;  %v2554_v24 = vadd.f32 %v2487_v20, %v2309_v0  ;;  %v3473_v16 = vmul.f32 %v7220_v18, %v7535_v14 }
 0x27e   : > { %v3043_v47 = vsel %vm2412_vm4, %v3040_v58, %v3042_v63  ;;  %v7564_v21 = vmul.f32 %v5930_v32, %v7425_v41  ;;  %v2361_v44 = vmul.f32 %v5932_v35, %v7421_v49  ;;  %v2033_v5 = vmul.f32 %v5934_v34, %v7421_v49 }
 0x27f   : > { %v3870_v15 = vmul.f32 %v3838_v26, %v3742_v61  ;;  %v3704_v8 = vmul.f32 %v7176_v2, %v3665_v29  ;;  %v2622_v42 = vadd.f32 %v2590_v4, %v2554_v24  ;;  %v3355_v23 = vsel %vm2167_vm3, %v3352_v40, %v3354_v45 }
 0x280   : > { %v2243_v58 = vrot.slane %v2116_v17, 1  ;;  %v2244_v54 = vrot.slane %v7564_v21, 1  ;;  %v7575_v19 = vmul.f32 %v5932_v35, %v7425_v41  ;;  %v2488_v30 = vrot.slane %v2361_v44, 2 }
 0x281   : > { %v3902_v7 = vmul.f32 0.16666667, %v3870_v15  ;;  %v3743_v13 = vadd.f32 %v7190_v12, %v3704_v8  ;;  %v2866_v22 = vadd.f32 %v2799_v51, %v2622_v42  ;;  %v2674_v49 = vmul.f32 %v8070_v39, %v7498_v55 }
 0x282   : > { %v2245_v60 = vsel %vm2167_vm3, %v2243_v58, %v2244_v54  ;;  %v2489_v61 = vrot.slane %v7575_v19, 2  ;;  %v7584_v40 = vmul.f32 %v8070_v39, %v7507_v46  ;;  %v2918_v27 = vmul.f32 %v8074_v37, %v7498_v55 }
 0x283   : > { %5304 = vmatmul.mubr.msk.f32.gmra.mxu1 %vm1885_vm2, %v3902_v7  ;;  %v3775_v33 = vadd.f32 3.0, %v3743_v13  ;;  %v3110_v62 = vadd.f32 %v3043_v47, %v2866_v22  ;;  %v2310_v1 = vadd.f32 %v2245_v60, %v2033_v5  ;;  %v3598_v28 = vrot.slane %v3473_v16, 2 }
 0x284   : > { %v2490_v57 = vsel %vm2412_vm4, %v2488_v30, %v2489_v61  ;;  %v2800_v53 = vrot.slane %v2674_v49, 1  ;;  %v7594_v4 = vmul.f32 %v8074_v37, %v7507_v46  ;;  %v2591_v36 = vmul.f32 %v5938_v43, %v7498_v55 }
 0x285   : > { %v3807_v11 = vmax.f32 %v3775_v33, 0.0  ;;  %v3178_v48 = vadd.f32 %v3146_v3, %v3110_v62  ;;  %v2555_v52 = vadd.f32 %v2490_v57, %v2310_v1  ;;  %v2801_v9 = vrot.slane %v7584_v40, 1 }
 0x286   : > { %v3044_v59 = vrot.slane %v2918_v27, 2  ;;  %v3230_v0 = vmul.f32 %v8076_v6, %v1996_v10  ;;  %v3231_v45 = vmul.f32 %v8076_v6, %v7589_v31  ;;  %v3599_v26 = vsel %vm2412_vm4, %v3596_v25, %v3598_v28 }
 0x287   : > { %v3839_v20 = vmin.f32 %v3807_v11, 6.0  ;;  %v3422_v51 = vadd.f32 %v3355_v23, %v3178_v48  ;;  %v2623_v63 = vadd.f32 %v2591_v36, %v2555_v52  ;;  %v2802_v3 = vsel %vm2167_vm3, %v2800_v53, %v2801_v9 }
 0x288   : > { %v3045_v29 = vrot.slane %v7594_v4, 2  ;;  %v3475_v55 = vmul.f32 %v7220_v18, %v7589_v31  ;;  %v3357_v16 = vrot.slane %v3231_v45, 1  ;;  %v3356_v44 = vrot.slane %v3230_v0, 1 }
 0x289   : > { %v3871_v24 = vmul.f32 %v3839_v20, %v3743_v13  ;;  %v3666_v17 = vadd.f32 %v3599_v26, %v3422_v51  ;;  %v2867_v47 = vadd.f32 %v2802_v3, %v2623_v63  ;;  %v3474_v15 = vmul.f32 %v7220_v18, %v1996_v10 }
 0x28a   : > { %v3046_v21 = vsel %vm2412_vm4, %v3044_v59, %v3045_v29  ;;  %v2118_v38 = vmul.f32 %v5930_v32, %v7451_v50  ;;  %v3147_v5 = vmul.f32 %v8075_v56, %v1996_v10  ;;  %v3358_v23 = vsel %vm2167_vm3, %v3356_v44, %v3357_v16  ;;  %v4310_v44 = vld [vmem:[%s7651_s17 + $0x8] sm:$0xff] }
 0x28b   : > { %v3903_v25 = vmul.f32 0.16666667, %v3871_v24  ;;  %v3705_v8 = vmul.f32 %v7176_v2, %v3666_v17  ;;  %v3111_v42 = vadd.f32 %v3046_v21, %v2867_v47  ;;  %v3601_v58 = vrot.slane %v3475_v55, 2 }
 0x28c   : > { %v2246_v19 = vrot.slane %v2118_v38, 1  ;;  %v2363_v7 = vmul.f32 %v5932_v35, %v7451_v50  ;;  %v2034_v32 = vmul.f32 %v5934_v34, %v7425_v41  ;;  %v2676_v30 = vmul.f32 %v8070_v39, %v7535_v14  ;;  %v1998_v41 = vld [vmem:[#allocation2 + $0x1a8] sm:$0xff]  ;;  %v4312_v38 = vld [vmem:[%s7651_s17 + $0x18] sm:$0xff] }
 0x28d   : > { %5306 = vmatprep.mubr.msk.f32.mxu1 %vm1885_vm2, %v3903_v25  ;;  %v3744_v13 = vadd.f32 %v7190_v12, %v3705_v8  ;;  %v3179_v22 = vadd.f32 %v3147_v5, %v3111_v42  ;;  %v3600_v60 = vrot.slane %v3474_v15, 2  ;;  %v2920_v33 = vmul.f32 %v8074_v37, %v7535_v14  ;;  %v4311_v15 = vld [vmem:[%s7651_s17 + $0x10] sm:$0xff]  ;;  %v4313_v25 = vld [vmem:[%s7651_s17 + $0x20] sm:$0xff]  ;;  %v4314_v8 = vld [vmem:[%s7651_s17 + $0x28] sm:$0xff] }
 0x28e   : > { %v2247_v49 = vsel %vm2167_vm3, %v2244_v54, %v2246_v19  ;;  %v2491_v40 = vrot.slane %v2363_v7, 2  ;;  %v2803_v10 = vrot.slane %v2676_v30, 1  ;;  %v2592_v39 = vmul.f32 %v5938_v43, %v7507_v46  ;;  %v4315_v42 = vld [vmem:[%s7651_s17 + $0x30] sm:$0xff]  ;;  %v4316_v5 = vld [vmem:[%s7651_s17 + $0x38] sm:$0xff] }
 0x28f   : > { %v3776_v62 = vadd.f32 3.0, %v3744_v13  ;;  %v3423_v35 = vadd.f32 %v3358_v23, %v3179_v22  ;;  %v2311_v50 = vadd.f32 %v2247_v49, %v2034_v32  ;;  %v3602_v1 = vsel %vm2412_vm4, %v3600_v60, %v3601_v58  ;;  %v4317_v23 = vld [vmem:[%s7651_s17 + $0x40] sm:$0xff]  ;;  %v4319_v19 = vld [vmem:[%s7651_s17 + $0x50] sm:$0xff]  ;;  %v4320_v7 = vld [vmem:[%s7651_s17 + $0x58] sm:$0xff] }
 0x290   : > { %v2492_v27 = vsel %vm2412_vm4, %v2489_v61, %v2491_v40  ;;  %v2804_v54 = vsel %vm2167_vm3, %v2801_v9, %v2803_v10  ;;  %v3047_v53 = vrot.slane %v2920_v33, 2  ;;  %v3232_v11 = vmul.f32 %v8076_v6, %v1998_v41  ;;  %v4322_v22 = vld [vmem:[%s7651_s17 + $0x68] sm:$0xff]  ;;  %v4323_v32 = vld [vmem:[%s7651_s17 + $0x70] sm:$0xff]  ;;  %v4324_v30 = vld [vmem:[%s7651_s17 + $0x78] sm:$0xff] }
 0x291   : > { %v3808_v28 = vmax.f32 %v3776_v62, 0.0  ;;  %v3667_v34 = vadd.f32 %v3602_v1, %v3423_v35  ;;  %v2556_v57 = vadd.f32 %v2492_v27, %v2311_v50  ;;  %v3476_v59 = vmul.f32 %v7220_v18, %v1998_v41  ;;  %v4325_v60 = vld [vmem:[%s7651_s17 + $0x80] sm:$0xff]  ;;  %v4326_v49 = vld [vmem:[%s7651_s17 + $0x88] sm:$0xff]  ;;  %v4327_v40 = vld [vmem:[%s7651_s17 + $0x90] sm:$0xff] }
 0x292   : > { %v3048_v36 = vsel %vm2412_vm4, %v3045_v29, %v3047_v53  ;;  %v3148_v46 = vmul.f32 %v8075_v56, %v7589_v31  ;;  %v3359_v9 = vrot.slane %v3232_v11, 1  ;;  %v4328_v33 = vld [vmem:[%s7651_s17 + $0x98] sm:$0xff]  ;;  %v4329_v62 = vld [vmem:[%s7651_s17 + $0xa0] sm:$0xff]  ;;  %v4330_v35 = vld [vmem:[%s7651_s17 + $0xa8] sm:$0xff]  ;;  %v5272_v53 = vpop.f32.mrf.mxu1 }
 0x293   : > { %v3840_v4 = vmin.f32 %v3808_v28, 6.0  ;;  %v3706_v37 = vmul.f32 %v7176_v2, %v3667_v34  ;;  %v2624_v14 = vadd.f32 %v2592_v39, %v2556_v57  ;;  %v3603_v45 = vrot.slane %v3476_v59, 2  ;;  %v4331_v50 = vld [vmem:[%s7651_s17 + $0xb0] sm:$0xff]  ;;  %v4332_v10 = vld [vmem:[%s7651_s17 + $0xb8] sm:$0xff]  ;;  %v4333_v1 = vld [vmem:[%s7651_s17 + $0xc0] sm:$0xff] }
 0x294   : > { %v3360_v63 = vsel %vm2167_vm3, %v3357_v16, %v3359_v9  ;;  %v4334_v27 = vld [vmem:[%s7651_s17 + $0xc8] sm:$0xff]  ;;  %v4335_v28 = vld [vmem:[%s7651_s17 + $0xd0] sm:$0xff]  ;;  %v4336_v34 = vld [vmem:[%s7651_s17 + $0xd8] sm:$0xff] }
 0x295   : > { %v3872_v48 = vmul.f32 %v3840_v4, %v3744_v13  ;;  %v3745_v52 = vadd.f32 %v7190_v12, %v3706_v37  ;;  %v2868_v61 = vadd.f32 %v2804_v54, %v2624_v14  ;;  %v3604_v18 = vsel %vm2412_vm4, %v3601_v58, %v3603_v45  ;;  %v4318_v58 = vld [vmem:[%s7651_s17 + $0x48] sm:$0xff]  ;;  %v4321_v13 = vld [vmem:[%s7651_s17 + $0x60] sm:$0xff]  ;;  %v4339_v39 = vld [vmem:[%s7651_s17 + $0xf0] sm:$0xff]  ;;  %v4092_v4 = vpop.f32.mrf.mxu1 }
 0x296   : > { %v4337_v41 = vld [vmem:[%s7651_s17 + $0xe0] sm:$0xff]  ;;  %v4338_v57 = vld [vmem:[%s7651_s17 + $0xe8] sm:$0xff]  ;;  %v4340_v54 = vld [vmem:[%s7651_s17 + $0xf8] sm:$0xff] }
 0x297   : > { %v3904_v0 = vmul.f32 0.16666667, %v3872_v48  ;;  %v3777_v20 = vadd.f32 3.0, %v3745_v52  ;;  %v3112_v43 = vadd.f32 %v3048_v36, %v2868_v61  ;;  %v7718_v37 = vpop.f32.mrf.mxu1 }
 0x299   : > { %5307 = vmatmul.mubr.msk.f32.gmra.mxu1 %vm1885_vm2, %v3904_v0  ;;  %v3809_v51 = vmax.f32 %v3777_v20, 0.0  ;;  %v3180_v6 = vadd.f32 %v3148_v46, %v3112_v43  ;;  %v7720_v14 = vpop.f32.mrf.mxu1 }
 0x29b   : > { %v3841_v26 = vmin.f32 %v3809_v51, 6.0  ;;  %v3424_v3 = vadd.f32 %v3360_v63, %v3180_v6  ;;  %v7722_v11 = vpop.f32.mrf.mxu1 }
 0x29d   : > { %v3873_v29 = vmul.f32 %v3841_v26, %v3745_v52  ;;  %v3668_v55 = vadd.f32 %v3604_v18, %v3424_v3  ;;  %v7724_v48 = vpop.f32.mrf.mxu1 }
 0x29f   : > { %v3905_v24 = vmul.f32 0.16666667, %v3873_v29  ;;  %v3707_v17 = vmul.f32 %v7176_v2, %v3668_v55  ;;  %v7726_v52 = vpop.f32.mrf.mxu1 }
 0x2a1   : > { %5309 = vmatprep.mubr.msk.f32.mxu1 %vm1885_vm2, %v3905_v24  ;;  %v3746_v56 = vadd.f32 %v7190_v12, %v3707_v17  ;;  %v4309_v12 = vld [vmem:[%s7651_s17] sm:$0xff]  ;;  %v7728_v61 = vpop.f32.mrf.mxu1  ;;  %v5266_v24 = vpop.f32.mrf.mxu0 }
 0x2a3   : > { %v3778_v31 = vadd.f32 3.0, %v3746_v56 }
 0x2a5   : > { %v3810_v47 = vmax.f32 %v3778_v31, 0.0 }
 0x2a7   : > { %v3842_v21 = vmin.f32 %v3810_v47, 6.0  ;;  %v7769_v47 = vld [vmem:[%s8033_s9] ss:$0 sm:$0xff] }
 0x2a9   : > { %v3874_v2 = vmul.f32 %v3842_v21, %v3746_v56  ;;  %v4072_v56 = vpop.f32.mrf.mxu0 }
 0x2ab   : > { %v3906_v16 = vmul.f32 0.16666667, %v3874_v2  ;;  %v5269_v2 = vpop.f32.mrf.mxu0 }
 0x2ad   : > { %5310 = vmatmul.mubr.msk.f32.gmra.mxu1 %vm1885_vm2, %v3906_v16  ;;  %v7730_v36 = vpop.f32.mrf.mxu1 }
 0x2ae   : > { %5314 = vmatprep.mubr.msk.f32.mxu1 %vm613_vm1, %v4309_v12  ;;  %v7778_v12 = vld [vmem:[%s8037_s13] ss:$0 sm:$0xff] }
 0x2af   : > { %v7732_v59 = vpop.f32.mrf.mxu1 }
 0x2b1   : > { %5315 = vmatmul.mubr.msk.f32.vlgmr.msra.gmra.mxu1 %vm613_vm1, %v4310_v44  ;;  %v4239_v44 = vmul.f32 %v5266_v24, %v7769_v47 }
 0x2b2   : > { %5317 = vmatprep.mubr.msk.f32.mxu1 %vm613_vm1, %v4311_v15  ;;  %v7784_v15 = vld [vmem:[%s8034_s10] ss:$0 sm:$0xff] }
 0x2b5   : > { %5318 = vmatmul.mubr.msk.f32.gmra.mxu1 %vm613_vm1, %v4312_v38 }
 0x2b6   : > { %5320 = vmatprep.mubr.msk.f32.mxu1 %vm613_vm1, %v4313_v25  ;;  %v7789_v25 = vld [vmem:[%s8038_s14] ss:$0 sm:$0xff] }
 0x2b9   : > { %5321 = vmatmul.mubr.msk.f32.gmra.mxu1 %vm613_vm1, %v4314_v8  ;;  %v4238_v8 = vmul.f32 %v7769_v47, %v4072_v56 }
 0x2ba   : > { %5323 = vmatprep.mubr.msk.f32.mxu1 %vm613_vm1, %v4315_v42  ;;  %v4082_v42 = vpop.f32.mrf.mxu0 }
 0x2bd   : > { %5324 = vmatmul.mubr.msk.f32.gmra.mxu1 %vm613_vm1, %v4316_v5 }
 0x2be   : > { %5326 = vmatprep.mubr.msk.f32.mxu1 %vm613_vm1, %v4317_v23  ;;  %v4241_v23 = vmul.f32 %v5269_v2, %v7769_v47 }
 0x2c1   : > { %5327 = vmatmul.mubr.msk.f32.gmra.mxu1 %vm613_vm1, %v4318_v58 }
 0x2c2   : > { %5329 = vmatprep.mubr.msk.f32.mxu1 %vm613_vm1, %v4319_v19  ;;  %v4278_v19 = vadd.f32 %v7784_v15, %v4239_v44 }
 0x2c5   : > { %5330 = vmatmul.mubr.msk.f32.gmra.mxu1 %vm613_vm1, %v4320_v7  ;;  %v7734_v0 = vpop.f32.mrf.mxu1 }
 0x2c6   : > { %5332 = vmatprep.mubr.msk.f32.mxu1 %vm613_vm1, %v4321_v13 }
 0x2c7   : > { %v7736_v20 = vpop.f32.mrf.mxu1 }
 0x2c9   : > { %5333 = vmatmul.mubr.msk.f32.gmra.mxu1 %vm613_vm1, %v4322_v22  ;;  %v4240_v22 = vmul.f32 %v7769_v47, %v4082_v42 }
 0x2ca   : > { %5335 = vmatprep.mubr.msk.f32.mxu1 %vm613_vm1, %v4323_v32 }
 0x2cd   : > { %5336 = vmatmul.mubr.msk.f32.gmra.mxu1 %vm613_vm1, %v4324_v30  ;;  %v4277_v30 = vadd.f32 %v7784_v15, %v4238_v8  ;;  %v4244_v8 = vmul.f32 %v7769_v47, %v7720_v14 }
 0x2ce   : > { %5338 = vmatprep.mubr.msk.f32.mxu1 %vm613_vm1, %v4325_v60 }
 0x2d1   : > { %5339 = vmatmul.mubr.msk.f32.gmra.mxu1 %vm613_vm1, %v4326_v49 }
 0x2d2   : > { %5341 = vmatprep.mubr.msk.f32.mxu1 %vm613_vm1, %v4327_v40 }
 0x2d5   : > { %5342 = vmatmul.mubr.msk.f32.gmra.mxu1 %vm613_vm1, %v4328_v33  ;;  %v4280_v33 = vadd.f32 %v7784_v15, %v4241_v23  ;;  %v4247_v23 = vmul.f32 %v7722_v11, %v7769_v47 }
 0x2d6   : > { %5344 = vmatprep.mubr.msk.f32.mxu1 %vm613_vm1, %v4329_v62 }
 0x2d9   : > { %5345 = vmatmul.mubr.msk.f32.gmra.mxu1 %vm613_vm1, %v4330_v35  ;;  %v4243_v35 = vmul.f32 %v5272_v53, %v7769_v47 }
 0x2da   : > { %5347 = vmatprep.mubr.msk.f32.mxu1 %vm613_vm1, %v4331_v50 }
 0x2db   : > { %v7738_v43 = vpop.f32.mrf.mxu1  ;;  %v4282_v24 = vadd.f32 %v7784_v15, %v4243_v35 }
 0x2dd   : > { %5348 = vmatmul.mubr.msk.f32.gmra.mxu1 %vm613_vm1, %v4332_v10  ;;  %v7740_v46 = vpop.f32.mrf.mxu1 }
 0x2de   : > { %5350 = vmatprep.mubr.msk.f32.mxu1 %vm613_vm1, %v4333_v1 }
 0x2e1   : > { %5351 = vmatmul.mubr.msk.f32.gmra.mxu1 %vm613_vm1, %v4334_v27  ;;  %v4242_v27 = vmul.f32 %v7769_v47, %v4092_v4 }
 0x2e2   : > { %5353 = vmatprep.mubr.msk.f32.mxu1 %vm613_vm1, %v4335_v28 }
 0x2e3   : > { %v4281_v44 = vadd.f32 %v7784_v15, %v4242_v27 }
 0x2e5   : > { %5354 = vmatmul.mubr.msk.f32.gmra.mxu1 %vm613_vm1, %v4336_v34  ;;  %v4279_v34 = vadd.f32 %v7784_v15, %v4240_v22  ;;  %v4246_v22 = vmul.f32 %v7769_v47, %v7724_v48 }
 0x2e6   : > { %5356 = vmatprep.mubr.msk.f32.mxu1 %vm613_vm1, %v4337_v41 }
 0x2e7   : > { %v4285_v27 = vadd.f32 %v7784_v15, %v4246_v22 }
 0x2e9   : > { %5357 = vmatmul.mubr.msk.f32.gmra.mxu1 %vm613_vm1, %v4338_v57 }
 0x2ea   : > { %5359 = vmatprep.mubr.msk.f32.mxu1 %vm613_vm1, %v4339_v39 }
 0x2ed   : > { %5360 = vmatmul.mubr.msk.f32.gmra.mxu1 %vm613_vm1, %v4340_v54  ;;  %v4245_v54 = vmul.f32 %v7718_v37, %v7769_v47 }
 0x2ef   : > { %v7742_v9 = vpop.f32.mrf.mxu1 }
 0x2f1   : > { %v7744_v51 = vpop.f32.mrf.mxu1 }
 0x305   : > { %v7746_v6 = vpop.f32.mrf.mxu1 }
 0x307   : > { %v7748_v63 = vpop.f32.mrf.mxu1 }
 0x319   : > { %v7750_v45 = vpop.f32.mrf.mxu1 }
 0x31b   : > { %v7752_v26 = vpop.f32.mrf.mxu1 }
 0x32f   : > { %v7754_v3 = vpop.f32.mrf.mxu1 }
 0x331   : > { %v7756_v18 = vpop.f32.mrf.mxu1 }
 0x343   : > { %v7758_v29 = vpop.f32.mrf.mxu1 }
 0x345   : > { %v7760_v55 = vpop.f32.mrf.mxu1 }
 0x359   : > { %v7762_v17 = vpop.f32.mrf.mxu1 }
 0x35b   : > { %v7764_v31 = vpop.f32.mrf.mxu1 }
 0x36d   : > { %v7771_v21 = vpop.f32.mrf.mxu1 }
 0x36f   : > { %v7773_v16 = vpop.f32.mrf.mxu1 }
 0x371   : > { %v5316_v38 = vpop.f32.mrf.mxu1 }
 0x372   : > { %v4676_v5 = vmul.f32 %v5316_v38, %v7778_v12 }
 0x373   : > { %v4509_v58 = vpop.f32.mrf.mxu1 }
 0x374   : > { %v4715_v7 = vadd.f32 %v7789_v25, %v4676_v5  ;;  %v4675_v13 = vmul.f32 %v7778_v12, %v4509_v58 }
 0x375   : > { %v5319_v32 = vpop.f32.mrf.mxu1 }
 0x376   : > { %v4747_v60 = vadd.f32 %v4715_v7, %v4278_v19  ;;  %v4714_v49 = vadd.f32 %v7789_v25, %v4675_v13  ;;  %v4678_v40 = vmul.f32 %v5319_v32, %v7778_v12  ;;  %v4284_v19 = vadd.f32 %v7784_v15, %v4245_v54 }
 0x377   : > { %v4519_v62 = vpop.f32.mrf.mxu1 }
 0x378   : > { %4780 = vst.msk [vmem:[%s7802_s22 + $0x8] sm:$0xff] %vm4778_vm5, %v4747_v60  ;;  %v4746_v50 = vadd.f32 %v4714_v49, %v4277_v30  ;;  %v4717_v10 = vadd.f32 %v7789_v25, %v4678_v40  ;;  %v4677_v1 = vmul.f32 %v7778_v12, %v4519_v62  ;;  %v4283_v30 = vadd.f32 %v7784_v15, %v4244_v8 }
 0x379   : > { %v5322_v28 = vpop.f32.mrf.mxu1  ;;  %v4286_v40 = vadd.f32 %v7784_v15, %v4247_v23  ;;  %v4249_v62 = vmul.f32 %v7726_v52, %v7769_v47 }
 0x37a   : > { %4779 = vst.msk [vmem:[%s7802_s22] sm:$0xff] %vm4778_vm5, %v4746_v50  ;;  %v4749_v41 = vadd.f32 %v4717_v10, %v4280_v33  ;;  %v4716_v57 = vadd.f32 %v7789_v25, %v4677_v1  ;;  %v4680_v39 = vmul.f32 %v5322_v28, %v7778_v12  ;;  %v4248_v10 = vmul.f32 %v7769_v47, %v7728_v61 }
 0x37b   : > { %v4529_v53 = vpop.f32.mrf.mxu1 }
 0x37c   : > { %4782 = vst.msk [vmem:[%s7802_s22 + $0x18] sm:$0xff] %vm4778_vm5, %v4749_v41  ;;  %v4748_v4 = vadd.f32 %v4716_v57, %v4279_v34  ;;  %v4719_v56 = vadd.f32 %v7789_v25, %v4680_v39  ;;  %v4679_v2 = vmul.f32 %v7778_v12, %v4529_v53  ;;  %v4251_v41 = vmul.f32 %v7730_v36, %v7769_v47 }
 0x37d   : > { %v5325_v38 = vpop.f32.mrf.mxu1  ;;  %v4288_v39 = vadd.f32 %v7784_v15, %v4249_v62 }
 0x37e   : > { %4781 = vst.msk [vmem:[%s7802_s22 + $0x10] sm:$0xff] %vm4778_vm5, %v4748_v4  ;;  %v4751_v37 = vadd.f32 %v4719_v56, %v4282_v24  ;;  %v4718_v42 = vadd.f32 %v7789_v25, %v4679_v2  ;;  %v4682_v5 = vmul.f32 %v5325_v38, %v7778_v12  ;;  %v4250_v24 = vmul.f32 %v7769_v47, %v7732_v59 }
 0x37f   : > { %v4539_v58 = vpop.f32.mrf.mxu1  ;;  %v4287_v56 = vadd.f32 %v7784_v15, %v4248_v10  ;;  %v4290_v38 = vadd.f32 %v7784_v15, %v4251_v41 }
 0x380   : > { %4784 = vst.msk [vmem:[%s7802_s22 + $0x28] sm:$0xff] %vm4778_vm5, %v4751_v37  ;;  %v4750_v7 = vadd.f32 %v4718_v42, %v4281_v44  ;;  %v4721_v13 = vadd.f32 %v7789_v25, %v4682_v5  ;;  %v4681_v14 = vmul.f32 %v7778_v12, %v4539_v58  ;;  %v4253_v37 = vmul.f32 %v7734_v0, %v7769_v47 }
 0x381   : > { %v5328_v32 = vpop.f32.mrf.mxu1  ;;  %v4289_v23 = vadd.f32 %v7784_v15, %v4250_v24  ;;  %v4258_v24 = vmul.f32 %v7769_v47, %v7748_v63 }
 0x382   : > { %4783 = vst.msk [vmem:[%s7802_s22 + $0x20] sm:$0xff] %vm4778_vm5, %v4750_v7  ;;  %v4753_v11 = vadd.f32 %v4721_v13, %v4284_v19  ;;  %v4720_v60 = vadd.f32 %v7789_v25, %v4681_v14  ;;  %v4684_v49 = vmul.f32 %v5328_v32, %v7778_v12  ;;  %v4252_v19 = vmul.f32 %v7769_v47, %v7736_v20 }
 0x383   : > { %v4549_v33 = vpop.f32.mrf.mxu1  ;;  %v4255_v14 = vmul.f32 %v7738_v43, %v7769_v47  ;;  %v4292_v32 = vadd.f32 %v7784_v15, %v4253_v37 }
 0x384   : > { %4786 = vst.msk [vmem:[%s7802_s22 + $0x38] sm:$0xff] %vm4778_vm5, %v4753_v11  ;;  %v4752_v48 = vadd.f32 %v4720_v60, %v4283_v30  ;;  %v4723_v35 = vadd.f32 %v7789_v25, %v4684_v49  ;;  %v4683_v50 = vmul.f32 %v7778_v12, %v4549_v33  ;;  %v4254_v60 = vmul.f32 %v7769_v47, %v7740_v46 }
 0x385   : > { %v5331_v1 = vpop.f32.mrf.mxu1 }
 0x386   : > { %4785 = vst.msk [vmem:[%s7802_s22 + $0x30] sm:$0xff] %vm4778_vm5, %v4752_v48  ;;  %v4755_v28 = vadd.f32 %v4723_v35, %v4286_v40  ;;  %v4722_v34 = vadd.f32 %v7789_v25, %v4683_v50  ;;  %v4686_v52 = vmul.f32 %v5331_v1, %v7778_v12  ;;  %v4291_v40 = vadd.f32 %v7784_v15, %v4252_v19 }
 0x387   : > { %v4559_v57 = vpop.f32.mrf.mxu1  ;;  %v4294_v48 = vadd.f32 %v7784_v15, %v4255_v14  ;;  %v4257_v50 = vmul.f32 %v7742_v9, %v7769_v47 }
 0x388   : > { %4788 = vst.msk [vmem:[%s7802_s22 + $0x48] sm:$0xff] %vm4778_vm5, %v4755_v28  ;;  %v4754_v61 = vadd.f32 %v4722_v34, %v4285_v27  ;;  %v4725_v54 = vadd.f32 %v7789_v25, %v4686_v52  ;;  %v4685_v53 = vmul.f32 %v7778_v12, %v4559_v57  ;;  %v4293_v27 = vadd.f32 %v7784_v15, %v4254_v60 }
 0x389   : > { %v5334_v4 = vpop.f32.mrf.mxu1  ;;  %v4256_v34 = vmul.f32 %v7769_v47, %v7744_v51  ;;  %v4259_v57 = vmul.f32 %v7746_v6, %v7769_v47 }
 0x38a   : > { %4787 = vst.msk [vmem:[%s7802_s22 + $0x40] sm:$0xff] %vm4778_vm5, %v4754_v61  ;;  %v4757_v36 = vadd.f32 %v4725_v54, %v4288_v39  ;;  %v4724_v2 = vadd.f32 %v7789_v25, %v4685_v53  ;;  %v4688_v44 = vmul.f32 %v5334_v4, %v7778_v12  ;;  %v4296_v61 = vadd.f32 %v7784_v15, %v4257_v50 }
 0x38b   : > { %v4569_v8 = vpop.f32.mrf.mxu1  ;;  %v4264_v50 = vmul.f32 %v7769_v47, %v7760_v55 }
 0x38c   : > { %4790 = vst.msk [vmem:[%s7802_s22 + $0x58] sm:$0xff] %vm4778_vm5, %v4757_v36  ;;  %v4756_v59 = vadd.f32 %v4724_v2, %v4287_v56  ;;  %v4727_v42 = vadd.f32 %v7789_v25, %v4688_v44  ;;  %v4687_v5 = vmul.f32 %v7778_v12, %v4569_v8  ;;  %v4295_v56 = vadd.f32 %v7784_v15, %v4256_v34 }
 0x38d   : > { %v5337_v58 = vpop.f32.mrf.mxu1  ;;  %v4298_v44 = vadd.f32 %v7784_v15, %v4259_v57  ;;  %v4261_v8 = vmul.f32 %v7750_v45, %v7769_v47  ;;  %v4303_v57 = vadd.f32 %v7784_v15, %v4264_v50 }
 0x38e   : > { %4789 = vst.msk [vmem:[%s7802_s22 + $0x50] sm:$0xff] %vm4778_vm5, %v4756_v59  ;;  %v4759_v7 = vadd.f32 %v4727_v42, %v4290_v38  ;;  %v4726_v13 = vadd.f32 %v7789_v25, %v4687_v5  ;;  %v4690_v0 = vmul.f32 %v5337_v58, %v7778_v12  ;;  %v4297_v42 = vadd.f32 %v7784_v15, %v4258_v24 }
 0x38f   : > { %v4579_v22 = vpop.f32.mrf.mxu1 }
 0x390   : > { %4792 = vst.msk [vmem:[%s7802_s22 + $0x68] sm:$0xff] %vm4778_vm5, %v4759_v7  ;;  %v4758_v30 = vadd.f32 %v4726_v13, %v4289_v23  ;;  %v4729_v11 = vadd.f32 %v7789_v25, %v4690_v0  ;;  %v4689_v20 = vmul.f32 %v7778_v12, %v4579_v22  ;;  %v4260_v23 = vmul.f32 %v7769_v47, %v7752_v26 }
 0x391   : > { %v5340_v49 = vpop.f32.mrf.mxu1  ;;  %v4263_v7 = vmul.f32 %v7754_v3, %v7769_v47  ;;  %v4300_v0 = vadd.f32 %v7784_v15, %v4261_v8 }
 0x392   : > { %4791 = vst.msk [vmem:[%s7802_s22 + $0x60] sm:$0xff] %vm4778_vm5, %v4758_v30  ;;  %v4761_v43 = vadd.f32 %v4729_v11, %v4292_v32  ;;  %v4728_v33 = vadd.f32 %v7789_v25, %v4689_v20  ;;  %v4692_v62 = vmul.f32 %v5340_v49, %v7778_v12  ;;  %v4262_v32 = vmul.f32 %v7769_v47, %v7756_v18 }
 0x393   : > { %v4589_v35 = vpop.f32.mrf.mxu1  ;;  %v4299_v11 = vadd.f32 %v7784_v15, %v4260_v23  ;;  %v4302_v49 = vadd.f32 %v7784_v15, %v4263_v7 }
 0x394   : > { %4794 = vst.msk [vmem:[%s7802_s22 + $0x78] sm:$0xff] %vm4778_vm5, %v4761_v43  ;;  %v4760_v46 = vadd.f32 %v4728_v33, %v4291_v40  ;;  %v4731_v10 = vadd.f32 %v7789_v25, %v4692_v62  ;;  %v4691_v1 = vmul.f32 %v7778_v12, %v4589_v35  ;;  %v4265_v43 = vmul.f32 %v7758_v29, %v7769_v47 }
 0x395   : > { %v5343_v28 = vpop.f32.mrf.mxu1 }
 0x396   : > { %4793 = vst.msk [vmem:[%s7802_s22 + $0x70] sm:$0xff] %vm4778_vm5, %v4760_v46  ;;  %v4763_v52 = vadd.f32 %v4731_v10, %v4294_v48  ;;  %v4730_v41 = vadd.f32 %v7789_v25, %v4691_v1  ;;  %v4694_v9 = vmul.f32 %v5343_v28, %v7778_v12  ;;  %v4301_v48 = vadd.f32 %v7784_v15, %v4262_v32 }
 0x397   : > { %v4599_v39 = vpop.f32.mrf.mxu1  ;;  %v4267_v1 = vmul.f32 %v7762_v17, %v7769_v47  ;;  %v4304_v28 = vadd.f32 %v7784_v15, %v4265_v43 }
 0x398   : > { %4796 = vst.msk [vmem:[%s7802_s22 + $0x88] sm:$0xff] %vm4778_vm5, %v4763_v52  ;;  %v4762_v54 = vadd.f32 %v4730_v41, %v4293_v27  ;;  %v4733_v53 = vadd.f32 %v7789_v25, %v4694_v9  ;;  %v4693_v51 = vmul.f32 %v7778_v12, %v4599_v39  ;;  %v4266_v41 = vmul.f32 %v7769_v47, %v7764_v31 }
 0x399   : > { %v5346_v4 = vpop.f32.mrf.mxu1 }
 0x39a   : > { %4795 = vst.msk [vmem:[%s7802_s22 + $0x80] sm:$0xff] %vm4778_vm5, %v4762_v54  ;;  %v4765_v6 = vadd.f32 %v4733_v53, %v4296_v61  ;;  %v4732_v36 = vadd.f32 %v7789_v25, %v4693_v51  ;;  %v4696_v2 = vmul.f32 %v5346_v4, %v7778_v12  ;;  %v4306_v54 = vadd.f32 %v7784_v15, %v4267_v1 }
 0x39b   : > { %v4609_v38 = vpop.f32.mrf.mxu1  ;;  %v4269_v51 = vmul.f32 %v7771_v21, %v7769_v47 }
 0x39c   : > { %4798 = vst.msk [vmem:[%s7802_s22 + $0x98] sm:$0xff] %vm4778_vm5, %v4765_v6  ;;  %v4764_v63 = vadd.f32 %v4732_v36, %v4295_v56  ;;  %v4735_v37 = vadd.f32 %v7789_v25, %v4696_v2  ;;  %v4695_v59 = vmul.f32 %v7778_v12, %v4609_v38  ;;  %v4305_v56 = vadd.f32 %v7784_v15, %v4266_v41 }
 0x39d   : > { %v5349_v5 = vpop.f32.mrf.mxu1  ;;  %v4268_v36 = vmul.f32 %v7769_v47, %v7773_v16  ;;  %v4308_v8 = vadd.f32 %v7784_v15, %v4269_v51 }
 0x39e   : > { %4797 = vst.msk [vmem:[%s7802_s22 + $0x90] sm:$0xff] %vm4778_vm5, %v4764_v63  ;;  %v4767_v58 = vadd.f32 %v4735_v37, %v4298_v44  ;;  %v4734_v19 = vadd.f32 %v7789_v25, %v4695_v59  ;;  %v4698_v45 = vmul.f32 %v5349_v5, %v7778_v12 }
 0x39f   : > { %v4619_v13 = vpop.f32.mrf.mxu1  ;;  %v4307_v47 = vadd.f32 %v7784_v15, %v4268_v36 }
 0x3a0   : > { %4800 = vst.msk [vmem:[%s7802_s22 + $0xa8] sm:$0xff] %vm4778_vm5, %v4767_v58  ;;  %v4766_v14 = vadd.f32 %v4734_v19, %v4297_v42  ;;  %v4737_v22 = vadd.f32 %v7789_v25, %v4698_v45  ;;  %v4697_v26 = vmul.f32 %v7778_v12, %v4619_v13 }
 0x3a1   : > { %v5352_v30 = vpop.f32.mrf.mxu1 }
 0x3a2   : > { %4799 = vst.msk [vmem:[%s7802_s22 + $0xa0] sm:$0xff] %vm4778_vm5, %v4766_v14  ;;  %v4769_v3 = vadd.f32 %v4737_v22, %v4300_v0  ;;  %v4736_v20 = vadd.f32 %v7789_v25, %v4697_v26  ;;  %v4700_v60 = vmul.f32 %v5352_v30, %v7778_v12 }
 0x3a3   : > { %v4629_v40 = vpop.f32.mrf.mxu1 }
 0x3a4   : > { %4802 = vst.msk [vmem:[%s7802_s22 + $0xb8] sm:$0xff] %vm4778_vm5, %v4769_v3  ;;  %v4768_v18 = vadd.f32 %v4736_v20, %v4299_v11  ;;  %v4739_v33 = vadd.f32 %v7789_v25, %v4700_v60  ;;  %v4699_v62 = vmul.f32 %v7778_v12, %v4629_v40 }
 0x3a5   : > { %v5355_v35 = vpop.f32.mrf.mxu1 }
 0x3a6   : > { %4801 = vst.msk [vmem:[%s7802_s22 + $0xb0] sm:$0xff] %vm4778_vm5, %v4768_v18  ;;  %v4771_v46 = vadd.f32 %v4739_v33, %v4302_v49  ;;  %v4738_v10 = vadd.f32 %v7789_v25, %v4699_v62  ;;  %v4702_v29 = vmul.f32 %v5355_v35, %v7778_v12 }
 0x3a7   : > { %v4639_v27 = vpop.f32.mrf.mxu1 }
 0x3a8   : > { %4804 = vst.msk [vmem:[%s7802_s22 + $0xc8] sm:$0xff] %vm4778_vm5, %v4771_v46  ;;  %v4770_v34 = vadd.f32 %v4738_v10, %v4301_v48  ;;  %v4741_v52 = vadd.f32 %v7789_v25, %v4702_v29  ;;  %v4701_v55 = vmul.f32 %v7778_v12, %v4639_v27 }
 0x3a9   : > { %v5358_v9 = vpop.f32.mrf.mxu1 }
 0x3aa   : > { %4803 = vst.msk [vmem:[%s7802_s22 + $0xc0] sm:$0xff] %vm4778_vm5, %v4770_v34  ;;  %v4773_v17 = vadd.f32 %v4741_v52, %v4304_v28  ;;  %v4740_v39 = vadd.f32 %v7789_v25, %v4701_v55  ;;  %v4704_v61 = vmul.f32 %v5358_v9, %v7778_v12 }
 0x3ab   : > { %v4649_v53 = vpop.f32.mrf.mxu1 }
 0x3ac   : > { %4806 = vst.msk [vmem:[%s7802_s22 + $0xd8] sm:$0xff] %vm4778_vm5, %v4773_v17  ;;  %v4772_v31 = vadd.f32 %v4740_v39, %v4303_v57  ;;  %v4743_v24 = vadd.f32 %v7789_v25, %v4704_v61  ;;  %v4703_v4 = vmul.f32 %v7778_v12, %v4649_v53 }
 0x3ad   : > { %v5361_v6 = vpop.f32.mrf.mxu1 }
 0x3ae   : > { %4805 = vst.msk [vmem:[%s7802_s22 + $0xd0] sm:$0xff] %vm4778_vm5, %v4772_v31  ;;  %v4775_v2 = vadd.f32 %v4743_v24, %v4306_v54  ;;  %v4742_v21 = vadd.f32 %v7789_v25, %v4703_v4  ;;  %v4706_v44 = vmul.f32 %v5361_v6, %v7778_v12 }
 0x3af   : > { %v4659_v38 = vpop.f32.mrf.mxu1 }
 0x3b0   : > { %4808 = vst.msk [vmem:[%s7802_s22 + $0xe8] sm:$0xff] %vm4778_vm5, %v4775_v2  ;;  %v4774_v63 = vadd.f32 %v4742_v21, %v4305_v56  ;;  %v4745_v37 = vadd.f32 %v7789_v25, %v4706_v44  ;;  %v4705_v59 = vmul.f32 %v7778_v12, %v4659_v38 }
 0x3b2   : > { %4807 = vst.msk [vmem:[%s7802_s22 + $0xe0] sm:$0xff] %vm4778_vm5, %v4774_v63  ;;  %v4777_v16 = vadd.f32 %v4745_v37, %v4308_v8  ;;  %v4744_v42 = vadd.f32 %v7789_v25, %v4705_v59 }
 0x3b4   : > { %4810 = vst.msk [vmem:[%s7802_s22 + $0xf8] sm:$0xff] %vm4778_vm5, %v4777_v16  ;;  %v4776_v5 = vadd.f32 %v4744_v42, %v4307_v47 }
 0x3b6   : > { %4809 = vst.msk [vmem:[%s7802_s22 + $0xf0] sm:$0xff] %vm4778_vm5, %v4776_v5 }
 0x3b7 PF: > { %s25_s20 = sadd.s32 1, %s5426_s20   ;;  %s8096_s18 = smov %s5422_s19 }
 0x3b8   : > { %p22_p5 = scmp.ge.s32.totalorder %s25_s20, 4   ;;  %s8097_s19 = smov %s8099_s21 }
 0x3ba   :  { %24 = sbr.rel (!%p22_p5) target bundleno = 2 (0x2), region = 118 }

</bundles_post_ra>
